<compile_context>
chip_gen: v7x
topology: tpu7x:2x2x1
jax: 0.10.0
libtpu: 0.0.40
codegen_flags: <defaults>
</compile_context>

<pallas_src>
import functools

import jax
import jax.numpy as jnp
from jax import lax
from jax.experimental import pallas as pl
from jax.experimental.pallas import tpu as pltpu


# -----------------------------------------------------------------------------
# Kernel 1: fused per-pixel LSS chain
# -----------------------------------------------------------------------------
def _lss_pixel_kernel(pix_ref, wbb_ref, bbb_ref, wd_ref, bd_ref,
                      wc_ref, bc_ref, e_ref, o_ref):
    x = pix_ref[...]                                                 # (tm, C_in)
    feats = jnp.dot(x, wbb_ref[...], preferred_element_type=jnp.float32)
    feats = jnp.maximum(feats + bbb_ref[...], 0.0)                   # (tm, C_feat)

    # depth logits (tm, D) and pre-tiled context (tm, D*C) in two matmuls
    logits = jnp.dot(feats, wd_ref[...],
                     preferred_element_type=jnp.float32) + bd_ref[...]
    ctx_wide = jnp.dot(feats, wc_ref[...],
                       preferred_element_type=jnp.float32) + bc_ref[...]

    m = jnp.max(logits, axis=-1, keepdims=True)
    e = jnp.exp(logits - m)
    inv = pl.reciprocal(jnp.sum(e, axis=-1, keepdims=True), approx=True)
    p = e * inv                                                      # (tm, D)

    # expand p to (tm, D*C): column d*C + c = p[:, d]   (tiny 0/1 MXU matmul)
    p_wide = jnp.dot(p, e_ref[...], preferred_element_type=jnp.float32)
    o_ref[...] = p_wide * ctx_wide                                   # (tm, D*C)


def pallas_lss_pixels(pix, w_bb, b_bb, w_dn, b_dn, D, C):
    M, C_in = pix.shape
    C_feat = w_bb.shape[1]
    tm = 256
    M_pad = pl.cdiv(M, tm) * tm
    pix_p = jnp.pad(pix, ((0, M_pad - M), (0, 0))).astype(jnp.float32)

    # split / pre-tile depth-net weights in the wrapper (XLA, done once)
    w_d = w_dn[:, :D].astype(jnp.float32)                    # (C_feat, D)
    b_d = b_dn[:D].reshape(1, D).astype(jnp.float32)
    w_c = jnp.tile(w_dn[:, D:], (1, D)).astype(jnp.float32)  # (C_feat, D*C)
    b_c = jnp.tile(b_dn[D:], (D,)).reshape(1, D * C).astype(jnp.float32)
    expand = (jnp.arange(D * C)[None, :] // C
              == jnp.arange(D)[:, None]).astype(jnp.float32)  # (D, D*C)

    full = lambda i: (0, 0)
    out = pl.pallas_call(
        _lss_pixel_kernel,
        out_shape=jax.ShapeDtypeStruct((M_pad, D * C), jnp.float32),
        grid_spec=pltpu.PrefetchScalarGridSpec(
            num_scalar_prefetch=0,
            grid=(M_pad // tm,),
            in_specs=[
                pl.BlockSpec((tm, C_in), lambda i: (i, 0)),
                pl.BlockSpec((C_in, C_feat), full),   # tiny weights stay
                pl.BlockSpec((1, C_feat), full),      # VMEM-resident
                pl.BlockSpec((C_feat, D), full),
                pl.BlockSpec((1, D), full),
                pl.BlockSpec((C_feat, D * C), full),
                pl.BlockSpec((1, D * C), full),
                pl.BlockSpec((D, D * C), full),
            ],
            out_specs=pl.BlockSpec((tm, D * C), lambda i: (i, 0)),
        ),
        compiler_params=pltpu.CompilerParams(dimension_semantics=("parallel",)),
    )(pix_p,
      w_bb.astype(jnp.float32), b_bb.reshape(1, -1).astype(jnp.float32),
      w_d, b_d, w_c, b_c, expand)
    return out[:M]


# -----------------------------------------------------------------------------
# Kernel 2: voxel pooling (splat) as an in-kernel one-hot scatter-add
# -----------------------------------------------------------------------------
def _voxel_splat_kernel(idx_ref, feat_ref, o_ref, *, txy):
    x = pl.program_id(1)                                     # BEV tile
    c = pl.program_id(2)                                     # point chunk
    idx = idx_ref[0]                                         # (1, tp) int32
    feats = feat_ref[0]                                      # (C, tp) bf16
    tp = idx.shape[-1]
    # absolute cell id of every sublane of this BEV tile
    cells = lax.broadcasted_iota(jnp.int32, (txy, tp), 0) + x * txy
    # idx == -1 (out-of-grid / padded point) never matches -> contributes 0.
    onehot = (cells == idx).astype(jnp.bfloat16)             # (txy, tp)
    # (C, tp) x (txy, tp)^T -> (C, txy): lane-dense accumulator, f32 accumulate
    contrib = lax.dot_general(
        feats, onehot, dimension_numbers=(((1,), (1,)), ((), ())),
        preferred_element_type=jnp.float32)

    @pl.when(c == 0)
    def _():
        o_ref[0] = contrib

    @pl.when(c > 0)
    def _():
        o_ref[0] = o_ref[0] + contrib


def pallas_voxel_splat(flat_idx, frustum, XY, tp=1024, txy=128):
    """flat_idx: (B, P) int; frustum: (B, P, C) -> BEV map (B, C, XY)."""
    B, P, C = frustum.shape
    if XY % txy != 0 or txy % 128 != 0:
        txy = XY
    P_pad = pl.cdiv(P, tp) * tp
    idx = jnp.pad(flat_idx.astype(jnp.int32), ((0, 0), (0, P_pad - P)),
                  constant_values=-1).reshape(B, 1, P_pad)
    # channel-major points so the matmul output is (C, XY_tile); bf16 operands
    feats = jnp.pad(jnp.transpose(frustum, (0, 2, 1)),
                    ((0, 0), (0, 0), (0, P_pad - P))).astype(jnp.bfloat16)
    return pl.pallas_call(
        functools.partial(_voxel_splat_kernel, txy=txy),
        out_shape=jax.ShapeDtypeStruct((B, C, XY), jnp.float32),
        grid_spec=pltpu.PrefetchScalarGridSpec(
            num_scalar_prefetch=0,
            grid=(B, XY // txy, P_pad // tp),
            in_specs=[
                pl.BlockSpec((1, 1, tp), lambda b, x, c: (b, 0, c)),
                pl.BlockSpec((1, C, tp), lambda b, x, c: (b, 0, c)),
            ],
            # Output block constant across the chunk axis -> VMEM-resident
            # accumulator; varies over the parallel (b, x) axes.
            out_specs=pl.BlockSpec((1, C, txy), lambda b, x, c: (b, 0, x)),
        ),
        compiler_params=pltpu.CompilerParams(
            dimension_semantics=("parallel", "parallel", "arbitrary")),
    )(idx, feats)


# -----------------------------------------------------------------------------
# Kernel 3: fused BEV head (3x3 trunk conv + ReLU + heatmap/regression heads)
# -----------------------------------------------------------------------------
def _bev_head_kernel(bm1_ref, b0_ref, bp1_ref, wt_ref, bt_ref, wh_ref, bh_ref,
                     o_ref, *, Y):
    txy = b0_ref.shape[2]
    # y position of every lane (tile size is a multiple of Y)
    y_pos = lax.broadcasted_iota(jnp.int32, (1, txy), 1) % Y
    mask_m1 = (y_pos >= 1).astype(jnp.float32)        # valid for y-shift -1
    mask_p1 = (y_pos < Y - 1).astype(jnp.float32)     # valid for y-shift +1

    taps = []
    for slab_ref in (bm1_ref, b0_ref, bp1_ref):       # x-shift oi = -1, 0, +1
        slab = slab_ref[0]                            # (C, txy)
        taps.append(pltpu.roll(slab, shift=1, axis=1) * mask_m1)        # oj=-1
        taps.append(slab)                                               # oj= 0
        taps.append(pltpu.roll(slab, shift=txy - 1, axis=1) * mask_p1)  # oj=+1
    patches = jnp.concatenate(taps, axis=0)           # (9*C, txy)

    # single K=9*C matmul for the trunk, then the fused heads matmul
    trunk = jnp.maximum(
        jnp.dot(wt_ref[...], patches, preferred_element_type=jnp.float32)
        + bt_ref[...], 0.0)                           # (C_head, txy)
    heads = jnp.dot(wh_ref[...], trunk,
                    preferred_element_type=jnp.float32) + bh_ref[...]
    o_ref[0] = heads                                  # (n_out, txy) lane-dense


def pallas_bev_head(bev_cxy, w_trunk, b_trunk, w_heads, b_heads, X, Y):
    """bev_cxy: (B, C, XY) channel-major flat BEV map -> (B, n_out, XY)."""
    B, C, XY = bev_cxy.shape
    C_head = w_trunk.shape[1]
    n_out = w_heads.shape[1]
    txy = 128 if (XY % 128 == 0 and 128 % Y == 0) else XY

    # Three views shifted by -Y / 0 / +Y rows (zero padded) so every row slice
    # the kernel sees is aligned; +-1 y-shifts are in-kernel lane rolls.
    bev_f = bev_cxy.astype(jnp.float32)
    padded = jnp.pad(bev_f, ((0, 0), (0, 0), (Y, Y)))
    v_m1 = padded[:, :, 0:XY]                 # value at cell r - Y (0 at edge)
    v_p1 = padded[:, :, 2 * Y:2 * Y + XY]     # value at cell r + Y (0 at edge)

    wt_t = jnp.transpose(w_trunk).astype(jnp.float32)      # (C_head, 9*C)
    wh_t = jnp.transpose(w_heads).astype(jnp.float32)      # (n_out, C_head)

    full = lambda b, t: (0, 0)
    view_spec = pl.BlockSpec((1, C, txy), lambda b, t: (b, 0, t))
    return pl.pallas_call(
        functools.partial(_bev_head_kernel, Y=Y),
        out_shape=jax.ShapeDtypeStruct((B, n_out, XY), jnp.float32),
        grid_spec=pltpu.PrefetchScalarGridSpec(
            num_scalar_prefetch=0,
            grid=(B, XY // txy),
            in_specs=[
                view_spec, view_spec, view_spec,
                pl.BlockSpec((C_head, 9 * C), full),
                pl.BlockSpec((C_head, 1), full),
                pl.BlockSpec((n_out, C_head), full),
                pl.BlockSpec((n_out, 1), full),
            ],
            out_specs=pl.BlockSpec((1, n_out, txy), lambda b, t: (b, 0, t)),
        ),
        compiler_params=pltpu.CompilerParams(
            dimension_semantics=("parallel", "parallel")),
    )(v_m1, bev_f, v_p1,
      wt_t, b_trunk.reshape(-1, 1).astype(jnp.float32),
      wh_t, b_heads.reshape(-1, 1).astype(jnp.float32))


# -----------------------------------------------------------------------------
# Config / parameters / mats (synthetic, deterministic)
# -----------------------------------------------------------------------------
class Config:
    B = 2            # batch
    S = 1            # num_sweeps (key frame only)
    N_CAMS = 2       # num_cameras
    C_IN = 4         # input image channels
    H = 16
    W = 16
    C_FEAT = 32      # image encoder channels
    D = 8            # depth bins
    D_START = 1.0
    D_STEP = 1.0
    C_CTX = 16       # lifted context channels
    BEV_X = 16
    BEV_Y = 16
    X_MIN, X_MAX = 0.0, 10.0
    Y_MIN, Y_MAX = -10.0, 10.0
    C_HEAD = 32
    NUM_CLASSES = 2
    REG_SPLITS = (('reg', 2), ('height', 1), ('dim', 3), ('rot', 2))


def init_params(key, cfg):
    ks = jax.random.split(key, 6)

    def w(k, shape, scale=0.1):
        return scale * jax.random.normal(k, shape, dtype=jnp.float32)

    reg_ch = sum(c for _, c in cfg.REG_SPLITS)
    return {
        'w_bb': w(ks[0], (cfg.C_IN, cfg.C_FEAT)),
        'b_bb': jnp.zeros((cfg.C_FEAT,), jnp.float32),
        'w_dn': w(ks[1], (cfg.C_FEAT, cfg.D + cfg.C_CTX)),
        'b_dn': jnp.zeros((cfg.D + cfg.C_CTX,), jnp.float32),
        'w_trunk': w(ks[2], (9 * cfg.C_CTX, cfg.C_HEAD)),
        'b_trunk': jnp.zeros((cfg.C_HEAD,), jnp.float32),
        'w_hm': w(ks[3], (cfg.C_HEAD, cfg.NUM_CLASSES)),
        'b_hm': jnp.full((cfg.NUM_CLASSES,), -2.19, jnp.float32),  # centerpoint init
        'w_reg': w(ks[4], (cfg.C_HEAD, reg_ch)),
        'b_reg': jnp.zeros((reg_ch,), jnp.float32),
    }


def build_mats(cfg):
    B, S, N = cfg.B, cfg.S, cfg.N_CAMS
    f = 8.0
    cx, cy = cfg.W / 2.0, cfg.H / 2.0
    intrin = jnp.array([[f, 0., cx, 0.],
                        [0., f, cy, 0.],
                        [0., 0., 1., 0.],
                        [0., 0., 0., 1.]], jnp.float32)
    intrin = jnp.broadcast_to(intrin, (B, S, N, 4, 4))
    # camera->ego: cam z -> ego x, cam x -> -ego y, cam y -> -ego z (+ offset)
    s2e = jnp.stack([jnp.array([[0., 0., 1., 0.5 * n],
                                [-1., 0., 0., 0.2 * n],
                                [0., -1., 0., 1.5],
                                [0., 0., 0., 1.]], jnp.float32)
                     for n in range(N)])
    sensor2ego = jnp.broadcast_to(s2e, (B, S, N, 4, 4))
    eye = jnp.broadcast_to(jnp.eye(4, dtype=jnp.float32), (B, S, N, 4, 4))
    bda = jnp.broadcast_to(jnp.eye(4, dtype=jnp.float32), (B, 4, 4))
    return {
        'sensor2ego_mats': sensor2ego,
        'intrin_mats': intrin,
        'ida_mats': eye,
        'sensor2sensor_mats': eye,
        'bda_mat': bda,
    }


# -----------------------------------------------------------------------------
# Backbone (BaseLSSFPN, miniature) and Head (BEVDepthHead, miniature)
# -----------------------------------------------------------------------------
def compute_bev_indices(mats_dict, cfg):
    """Geometry glue (XLA): frustum point -> flat BEV cell index (-1 = invalid)."""
    B, N, H, W, D = cfg.B, cfg.N_CAMS, cfg.H, cfg.W, cfg.D
    sensor2ego = mats_dict['sensor2ego_mats'][:, 0]   # (B, N, 4, 4)
    intrin = mats_dict['intrin_mats'][:, 0]
    ida = mats_dict['ida_mats'][:, 0]
    bda = mats_dict['bda_mat']                        # (B, 4, 4)

    v = jnp.arange(H, dtype=jnp.float32)
    u = jnp.arange(W, dtype=jnp.float32)
    d = cfg.D_START + cfg.D_STEP * jnp.arange(D, dtype=jnp.float32)
    vv, uu, dd = jnp.meshgrid(v, u, d, indexing='ij')            # (H, W, D)
    pts_img = jnp.stack([uu * dd, vv * dd, dd, jnp.ones_like(dd)], axis=-1)

    mat = jnp.einsum('bij,bnjk,bnkl,bnlm->bnim',
                     bda, sensor2ego,
                     jnp.linalg.inv(intrin), jnp.linalg.inv(ida))  # (B,N,4,4)
    pts_ego = jnp.einsum('bnij,hwdj->bnhwdi', mat, pts_img)        # (B,N,H,W,D,4)

    x_res = (cfg.X_MAX - cfg.X_MIN) / cfg.BEV_X
    y_res = (cfg.Y_MAX - cfg.Y_MIN) / cfg.BEV_Y
    ix = jnp.floor((pts_ego[..., 0] - cfg.X_MIN) / x_res).astype(jnp.int32)
    iy = jnp.floor((pts_ego[..., 1] - cfg.Y_MIN) / y_res).astype(jnp.int32)
    valid = (ix >= 0) & (ix < cfg.BEV_X) & (iy >= 0) & (iy < cfg.BEV_Y)
    flat = jnp.where(valid, ix * cfg.BEV_Y + iy, -1)
    return flat.reshape(B, N * H * W * D)


def base_lss_fpn_forward(params, x, mats_dict, cfg):
    B, S, N, C_in, H, W = x.shape
    # fold (B, S, N, C, H, W) NCHW -> channel-last pixel matrix
    imgs = jnp.transpose(x[:, 0], (0, 1, 3, 4, 2))            # (B, N, H, W, C)
    pix = imgs.reshape(B * N * H * W, C_in)

    # fused image encoder + depth net + softmax + lift -------------- Pallas
    frustum = pallas_lss_pixels(pix, params['w_bb'], params['b_bb'],
                                params['w_dn'], params['b_dn'],
                                cfg.D, cfg.C_CTX)             # (B*N*H*W, D*C)
    P = N * H * W * cfg.D
    frustum = frustum.reshape(B, P, cfg.C_CTX)                # point = (n,h,w,d)

    # voxel pooling (splat) as in-kernel one-hot scatter-add -------- Pallas
    flat_idx = compute_bev_indices(mats_dict, cfg)            # (B, P)
    bev = pallas_voxel_splat(flat_idx, frustum, cfg.BEV_X * cfg.BEV_Y)
    return bev                                                # (B, C_CTX, X*Y)


def bev_depth_head_forward(params, bev_cxy, cfg):
    B = bev_cxy.shape[0]
    X, Y = cfg.BEV_X, cfg.BEV_Y
    # concatenated heads: one matmul, split afterwards
    w_heads = jnp.concatenate([params['w_hm'], params['w_reg']], axis=1)
    b_heads = jnp.concatenate([params['b_hm'], params['b_reg']], axis=0)
    # fused 3x3 trunk conv + ReLU + heads ---------------------------- Pallas
    out = pallas_bev_head(bev_cxy, params['w_trunk'], params['b_trunk'],
                          w_heads, b_heads, X, Y)             # (B, n_out, XY)
    out = out.reshape(B, -1, X, Y)                            # already NCHW

    nc = cfg.NUM_CLASSES
    task_pred = {'heatmap': out[:, :nc]}
    off = nc
    for name, c in cfg.REG_SPLITS:
        task_pred[name] = out[:, off:off + c]
        off += c
    return [[task_pred]]        # list over tasks, centerpoint-style dict


def base_bev_depth_forward(params, x, points, mats_dict, timestamps=None,
                           is_train_depth=False, training=False, cfg=Config):
    """Eval-path semantics of BaseBEVDepth.forward: returns (preds, preds)."""
    # TODO(synk): training-mode branch (is_train_depth and self.training) that
    # additionally returns the raw depth distribution is not exercised here.
    bev = base_lss_fpn_forward(params, x, mats_dict, cfg)
    preds = bev_depth_head_forward(params, bev, cfg)
    return (preds, preds)


# -----------------------------------------------------------------------------
# Pure-jnp reference (for a numeric sanity check of the Pallas path)
# -----------------------------------------------------------------------------
def reference_preds(params, x, mats_dict, cfg):
    B, S, N, C_in, H, W = x.shape
    pix = jnp.transpose(x[:, 0], (0, 1, 3, 4, 2)).reshape(B * N * H * W, C_in)
    feats = jnp.maximum(pix @ params['w_bb'] + params['b_bb'], 0.0)
    dn = feats @ params['w_dn'] + params['b_dn']
    p = jax.nn.softmax(dn[:, :cfg.D], axis=-1)
    ctx = dn[:, cfg.D:]
    frustum = (p[:, :, None] * ctx[:, None, :]).reshape(B, -1, cfg.C_CTX)
    flat_idx = compute_bev_indices(mats_dict, cfg)
    XY = cfg.BEV_X * cfg.BEV_Y
    onehot = (flat_idx[..., None] == jnp.arange(XY)[None, None, :]).astype(jnp.float32)
    bev = jnp.einsum('bpx,bpc->bxc', onehot, frustum)              # (B, XY, C)
    bev_img = bev.reshape(B, cfg.BEV_X, cfg.BEV_Y, cfg.C_CTX)
    xp = jnp.pad(bev_img, ((0, 0), (1, 1), (1, 1), (0, 0)))
    cols = [xp[:, di:di + cfg.BEV_X, dj:dj + cfg.BEV_Y, :]
            for di in range(3) for dj in range(3)]
    patches = jnp.concatenate(cols, axis=-1).reshape(B * XY, 9 * cfg.C_CTX)
    trunk = jnp.maximum(patches @ params['w_trunk'] + params['b_trunk'], 0.0)
    hm = trunk @ params['w_hm'] + params['b_hm']
    rg = trunk @ params['w_reg'] + params['b_reg']
    out = jnp.concatenate([hm, rg], axis=-1).reshape(B, cfg.BEV_X, cfg.BEV_Y, -1)

    def to_nchw(t):
        return jnp.transpose(t, (0, 3, 1, 2))

    preds = {'heatmap': to_nchw(out[..., :cfg.NUM_CLASSES])}
    off = cfg.NUM_CLASSES
    for name, c in cfg.REG_SPLITS:
        preds[name] = to_nchw(out[..., off:off + c])
        off += c
    return preds


# -----------------------------------------------------------------------------
if __name__ == "__main__":
    cfg = Config
    key = jax.random.PRNGKey(0)
    k_params, k_x = jax.random.split(key)

    params = init_params(k_params, cfg)
    x = jax.random.normal(
        k_x, (cfg.B, cfg.S, cfg.N_CAMS, cfg.C_IN, cfg.H, cfg.W),
        dtype=jnp.float32)
    mats_dict = build_mats(cfg)
    points = None  # unused by the forward pass

    fwd = jax.jit(lambda p, xx, m: base_bev_depth_forward(p, xx, None, m))
    out = jax.block_until_ready(fwd(params, x, mats_dict))

    preds = out[0][0][0]
    assert preds['heatmap'].shape == (cfg.B, cfg.NUM_CLASSES, cfg.BEV_X, cfg.BEV_Y)
    assert preds['reg'].shape == (cfg.B, 2, cfg.BEV_X, cfg.BEV_Y)
    assert preds['dim'].shape == (cfg.B, 3, cfg.BEV_X, cfg.BEV_Y)

    # Numeric check against the pure-jnp reference of the same forward
    # (bf16 MXU operands in the splat + approx reciprocal softmax -> loose tol).
    ref = reference_preds(params, x, mats_dict, cfg)
    for name, want in ref.items():
        got = preds[name]
        assert got.shape == want.shape, name
        assert jnp.allclose(got, want, rtol=2e-2, atol=2e-2), name

    print("KERNEL_OK")
</pallas_src>

<mosaic_0001>
module attributes {stable_mosaic.version = 11 : i64} {
  func.func @_lss_pixel_kernel(%arg0: i32, %arg1: memref<256x4xf32, #tpu.memory_space<vmem>>, %arg2: memref<4x32xf32, #tpu.memory_space<vmem>>, %arg3: memref<1x32xf32, #tpu.memory_space<vmem>>, %arg4: memref<32x8xf32, #tpu.memory_space<vmem>>, %arg5: memref<1x8xf32, #tpu.memory_space<vmem>>, %arg6: memref<32x128xf32, #tpu.memory_space<vmem>>, %arg7: memref<1x128xf32, #tpu.memory_space<vmem>>, %arg8: memref<8x128xf32, #tpu.memory_space<vmem>>, %arg9: memref<256x128xf32, #tpu.memory_space<vmem>>) attributes {dimension_semantics = [#tpu.dimension_semantics<parallel>], iteration_bounds = array<i64: 4>, scalar_prefetch = 0 : i64, scratch_operands = 0 : i64, tpu.core_type = #tpu.core_type<tc>, window_params = [{transform_indices = @transform_0, window_bounds = array<i64: 256, 4>}, {pipeline_mode = #tpu.pipeline_mode<synchronous>, transform_indices = @transform_1, window_bounds = array<i64: 4, 32>}, {pipeline_mode = #tpu.pipeline_mode<synchronous>, transform_indices = @transform_2, window_bounds = array<i64: 1, 32>}, {pipeline_mode = #tpu.pipeline_mode<synchronous>, transform_indices = @transform_3, window_bounds = array<i64: 32, 8>}, {pipeline_mode = #tpu.pipeline_mode<synchronous>, transform_indices = @transform_4, window_bounds = array<i64: 1, 8>}, {pipeline_mode = #tpu.pipeline_mode<synchronous>, transform_indices = @transform_5, window_bounds = array<i64: 32, 128>}, {pipeline_mode = #tpu.pipeline_mode<synchronous>, transform_indices = @transform_6, window_bounds = array<i64: 1, 128>}, {pipeline_mode = #tpu.pipeline_mode<synchronous>, transform_indices = @transform_7, window_bounds = array<i64: 8, 128>}, {transform_indices = @transform_8, window_bounds = array<i64: 256, 128>}]} {
    %c0 = arith.constant 0 : index
    %c0_0 = arith.constant 0 : index
    %0 = vector.load %arg1[%c0, %c0_0] : memref<256x4xf32, #tpu.memory_space<vmem>>, vector<256x4xf32>
    %c0_1 = arith.constant 0 : index
    %c0_2 = arith.constant 0 : index
    %1 = vector.load %arg2[%c0_1, %c0_2] : memref<4x32xf32, #tpu.memory_space<vmem>>, vector<4x32xf32>
    %cst = arith.constant dense<0.000000e+00> : vector<256x32xf32>
    %2 = tpu.matmul %0, %1, %cst {dimension_numbers = #tpu.dot_dimension_numbers<[1], [0], [0], [1], [0, 0, 1, 1], [], []>} : vector<256x4xf32>, vector<4x32xf32>, vector<256x32xf32> -> vector<256x32xf32>
    %c0_3 = arith.constant 0 : index
    %c0_4 = arith.constant 0 : index
    %3 = vector.load %arg3[%c0_3, %c0_4] : memref<1x32xf32, #tpu.memory_space<vmem>>, vector<1x32xf32>
    %4 = vector.broadcast %3 : vector<1x32xf32> to vector<256x32xf32>
    %5 = arith.addf %2, %4 : vector<256x32xf32>
    %cst_5 = arith.constant 0.000000e+00 : f32
    %6 = vector.broadcast %cst_5 : f32 to vector<256x32xf32>
    %7 = arith.maximumf %5, %6 : vector<256x32xf32>
    %c0_6 = arith.constant 0 : index
    %c0_7 = arith.constant 0 : index
    %8 = vector.load %arg4[%c0_6, %c0_7] : memref<32x8xf32, #tpu.memory_space<vmem>>, vector<32x8xf32>
    %cst_8 = arith.constant dense<0.000000e+00> : vector<256x8xf32>
    %9 = tpu.matmul %7, %8, %cst_8 {dimension_numbers = #tpu.dot_dimension_numbers<[1], [0], [0], [1], [0, 0, 1, 1], [], []>} : vector<256x32xf32>, vector<32x8xf32>, vector<256x8xf32> -> vector<256x8xf32>
    %c0_9 = arith.constant 0 : index
    %c0_10 = arith.constant 0 : index
    %10 = vector.load %arg5[%c0_9, %c0_10] : memref<1x8xf32, #tpu.memory_space<vmem>>, vector<1x8xf32>
    %11 = vector.broadcast %10 : vector<1x8xf32> to vector<256x8xf32>
    %12 = arith.addf %9, %11 : vector<256x8xf32>
    %c0_11 = arith.constant 0 : index
    %c0_12 = arith.constant 0 : index
    %13 = vector.load %arg6[%c0_11, %c0_12] : memref<32x128xf32, #tpu.memory_space<vmem>>, vector<32x128xf32>
    %cst_13 = arith.constant dense<0.000000e+00> : vector<256x128xf32>
    %14 = tpu.matmul %7, %13, %cst_13 {dimension_numbers = #tpu.dot_dimension_numbers<[1], [0], [0], [1], [0, 0, 1, 1], [], []>} : vector<256x32xf32>, vector<32x128xf32>, vector<256x128xf32> -> vector<256x128xf32>
    %c0_14 = arith.constant 0 : index
    %c0_15 = arith.constant 0 : index
    %15 = vector.load %arg7[%c0_14, %c0_15] : memref<1x128xf32, #tpu.memory_space<vmem>>, vector<1x128xf32>
    %16 = vector.broadcast %15 : vector<1x128xf32> to vector<256x128xf32>
    %17 = arith.addf %14, %16 : vector<256x128xf32>
    %cst_16 = arith.constant dense<0xFF800000> : vector<256xf32>
    %18 = vector.multi_reduction <maximumf>, %12, %cst_16 [1] : vector<256x8xf32> to vector<256xf32>
    %19 = vector.shape_cast %18 : vector<256xf32> to vector<256x1xf32>
    %20 = vector.broadcast %19 : vector<256x1xf32> to vector<256x8xf32>
    %21 = arith.subf %12, %20 : vector<256x8xf32>
    %22 = math.exp %21 : vector<256x8xf32>
    %cst_17 = arith.constant dense<0.000000e+00> : vector<256xf32>
    %23 = vector.multi_reduction <add>, %22, %cst_17 [1] : vector<256x8xf32> to vector<256xf32>
    %24 = vector.shape_cast %23 : vector<256xf32> to vector<256x1xf32>
    %25 = tpu.reciprocal %24 {approx = true} : vector<256x1xf32> -> vector<256x1xf32>
    %26 = vector.broadcast %25 : vector<256x1xf32> to vector<256x8xf32>
    %27 = arith.mulf %22, %26 : vector<256x8xf32>
    %c0_18 = arith.constant 0 : index
    %c0_19 = arith.constant 0 : index
    %28 = vector.load %arg8[%c0_18, %c0_19] : memref<8x128xf32, #tpu.memory_space<vmem>>, vector<8x128xf32>
    %cst_20 = arith.constant dense<0.000000e+00> : vector<256x128xf32>
    %29 = tpu.matmul %27, %28, %cst_20 {dimension_numbers = #tpu.dot_dimension_numbers<[1], [0], [0], [1], [0, 0, 1, 1], [], []>} : vector<256x8xf32>, vector<8x128xf32>, vector<256x128xf32> -> vector<256x128xf32>
    %30 = arith.mulf %29, %17 : vector<256x128xf32>
    %c0_21 = arith.constant 0 : index
    %c0_22 = arith.constant 0 : index
    %31 = vector.load %arg9[%c0_21, %c0_22] : memref<256x128xf32, #tpu.memory_space<vmem>>, vector<256x128xf32>
    tpu.vector_store %arg9[%c0_21, %c0_22], %30 {strides = array<i32>} : memref<256x128xf32, #tpu.memory_space<vmem>>, vector<256x128xf32>,
    return
  }
  func.func @transform_0(%arg0: i32) -> (i32, i32) {
    %c0_i32 = arith.constant 0 : i32
    %c0_i32_0 = arith.constant 0 : i32
    return %arg0, %c0_i32 : i32, i32
  }
  func.func @transform_1(%arg0: i32) -> (i32, i32) {
    %c0_i32 = arith.constant 0 : i32
    %c0_i32_0 = arith.constant 0 : i32
    %c0_i32_1 = arith.constant 0 : i32
    return %c0_i32, %c0_i32_0 : i32, i32
  }
  func.func @transform_2(%arg0: i32) -> (i32, i32) {
    %c0_i32 = arith.constant 0 : i32
    %c0_i32_0 = arith.constant 0 : i32
    %c0_i32_1 = arith.constant 0 : i32
    return %c0_i32, %c0_i32_0 : i32, i32
  }
  func.func @transform_3(%arg0: i32) -> (i32, i32) {
    %c0_i32 = arith.constant 0 : i32
    %c0_i32_0 = arith.constant 0 : i32
    %c0_i32_1 = arith.constant 0 : i32
    return %c0_i32, %c0_i32_0 : i32, i32
  }
  func.func @transform_4(%arg0: i32) -> (i32, i32) {
    %c0_i32 = arith.constant 0 : i32
    %c0_i32_0 = arith.constant 0 : i32
    %c0_i32_1 = arith.constant 0 : i32
    return %c0_i32, %c0_i32_0 : i32, i32
  }
  func.func @transform_5(%arg0: i32) -> (i32, i32) {
    %c0_i32 = arith.constant 0 : i32
    %c0_i32_0 = arith.constant 0 : i32
    %c0_i32_1 = arith.constant 0 : i32
    return %c0_i32, %c0_i32_0 : i32, i32
  }
  func.func @transform_6(%arg0: i32) -> (i32, i32) {
    %c0_i32 = arith.constant 0 : i32
    %c0_i32_0 = arith.constant 0 : i32
    %c0_i32_1 = arith.constant 0 : i32
    return %c0_i32, %c0_i32_0 : i32, i32
  }
  func.func @transform_7(%arg0: i32) -> (i32, i32) {
    %c0_i32 = arith.constant 0 : i32
    %c0_i32_0 = arith.constant 0 : i32
    %c0_i32_1 = arith.constant 0 : i32
    return %c0_i32, %c0_i32_0 : i32, i32
  }
  func.func @transform_8(%arg0: i32) -> (i32, i32) {
    %c0_i32 = arith.constant 0 : i32
    %c0_i32_0 = arith.constant 0 : i32
    return %arg0, %c0_i32 : i32, i32
  }
}

module attributes {stable_mosaic.version = 11 : i64} {
  func.func @_voxel_splat_kernel(%arg0: i32, %arg1: i32, %arg2: i32, %arg3: memref<1x1x1024xi32, #tpu.memory_space<vmem>>, %arg4: memref<1x16x1024xbf16, #tpu.memory_space<vmem>>, %arg5: memref<1x16x128xf32, #tpu.memory_space<vmem>>) attributes {dimension_semantics = [#tpu.dimension_semantics<parallel>, #tpu.dimension_semantics<parallel>, #tpu.dimension_semantics<arbitrary>], iteration_bounds = array<i64: 2, 2, 4>, scalar_prefetch = 0 : i64, scratch_operands = 0 : i64, tpu.core_type = #tpu.core_type<tc>, window_params = [{transform_indices = @transform_0, window_bounds = array<i64: 1, 1, 1024>}, {transform_indices = @transform_1, window_bounds = array<i64: 1, 16, 1024>}, {transform_indices = @transform_2, window_bounds = array<i64: 1, 16, 128>}]} {
    %c0 = arith.constant 0 : index
    %c0_0 = arith.constant 0 : index
    %c0_1 = arith.constant 0 : index
    %0 = vector.load %arg3[%c0, %c0_0, %c0_1] : memref<1x1x1024xi32, #tpu.memory_space<vmem>>, vector<1x1x1024xi32>
    %1 = vector.shape_cast %0 : vector<1x1x1024xi32> to vector<1x1024xi32>
    %c0_2 = arith.constant 0 : index
    %c0_3 = arith.constant 0 : index
    %c0_4 = arith.constant 0 : index
    %2 = vector.load %arg4[%c0_2, %c0_3, %c0_4] : memref<1x16x1024xbf16, #tpu.memory_space<vmem>>, vector<1x16x1024xbf16>
    %3 = vector.shape_cast %2 : vector<1x16x1024xbf16> to vector<16x1024xbf16>
    %4 = tpu.iota {dimensions = array<i32: 0>} : vector<128x1024xi32>
    %c128_i32 = arith.constant 128 : i32
    %5 = arith.muli %arg1, %c128_i32 : i32
    %6 = vector.broadcast %5 : i32 to vector<128x1024xi32>
    %7 = arith.addi %4, %6 : vector<128x1024xi32>
    %8 = vector.broadcast %1 : vector<1x1024xi32> to vector<128x1024xi32>
    %9 = arith.cmpi eq, %7, %8 : vector<128x1024xi32>
    %10 = arith.extui %9 : vector<128x1024xi1> to vector<128x1024xi32>
    %11 = arith.sitofp %10 : vector<128x1024xi32> to vector<128x1024xf32>
    %12 = arith.truncf %11 : vector<128x1024xf32> to vector<128x1024xbf16>
    %cst = arith.constant dense<0.000000e+00> : vector<16x128xf32>
    %13 = tpu.matmul %3, %12, %cst {dimension_numbers = #tpu.dot_dimension_numbers<[1], [1], [0], [0], [0, 0, 1, 0], [], []>} : vector<16x1024xbf16>, vector<128x1024xbf16>, vector<16x128xf32> -> vector<16x128xf32>
    %c0_i32 = arith.constant 0 : i32
    %14 = arith.cmpi eq, %arg2, %c0_i32 : i32
    %15 = arith.extui %14 : i1 to i32
    %c0_i32_5 = arith.constant 0 : i32
    %16 = arith.cmpi ne, %15, %c0_i32_5 : i32
    scf.if %16 {
      %c0_8 = arith.constant 0 : index
      %c0_9 = arith.constant 0 : index
      %c0_10 = arith.constant 0 : index
      %20 = vector.load %arg5[%c0_8, %c0_9, %c0_10] : memref<1x16x128xf32, #tpu.memory_space<vmem>>, vector<1x16x128xf32>
      %21 = vector.shape_cast %20 : vector<1x16x128xf32> to vector<16x128xf32>
      %22 = vector.shape_cast %13 : vector<16x128xf32> to vector<1x16x128xf32>
      tpu.vector_store %arg5[%c0_8, %c0_9, %c0_10], %22 {strides = array<i32>} : memref<1x16x128xf32, #tpu.memory_space<vmem>>, vector<1x16x128xf32>,
    } else {
    }
    %c0_i32_6 = arith.constant 0 : i32
    %17 = arith.cmpi sgt, %arg2, %c0_i32_6 : i32
    %18 = arith.extui %17 : i1 to i32
    %c0_i32_7 = arith.constant 0 : i32
    %19 = arith.cmpi ne, %18, %c0_i32_7 : i32
    scf.if %19 {
      %c0_8 = arith.constant 0 : index
      %c0_9 = arith.constant 0 : index
      %c0_10 = arith.constant 0 : index
      %20 = vector.load %arg5[%c0_8, %c0_9, %c0_10] : memref<1x16x128xf32, #tpu.memory_space<vmem>>, vector<1x16x128xf32>
      %21 = vector.shape_cast %20 : vector<1x16x128xf32> to vector<16x128xf32>
      %22 = arith.addf %21, %13 : vector<16x128xf32>
      %c0_11 = arith.constant 0 : index
      %c0_12 = arith.constant 0 : index
      %c0_13 = arith.constant 0 : index
      %23 = vector.load %arg5[%c0_11, %c0_12, %c0_13] : memref<1x16x128xf32, #tpu.memory_space<vmem>>, vector<1x16x128xf32>
      %24 = vector.shape_cast %23 : vector<1x16x128xf32> to vector<16x128xf32>
      %25 = vector.shape_cast %22 : vector<16x128xf32> to vector<1x16x128xf32>
      tpu.vector_store %arg5[%c0_11, %c0_12, %c0_13], %25 {strides = array<i32>} : memref<1x16x128xf32, #tpu.memory_space<vmem>>, vector<1x16x128xf32>,
    } else {
    }
    return
  }
  func.func @transform_0(%arg0: i32, %arg1: i32, %arg2: i32) -> (i32, i32, i32) {
    %c0_i32 = arith.constant 0 : i32
    %c0_i32_0 = arith.constant 0 : i32
    return %arg0, %c0_i32, %arg2 : i32, i32, i32
  }
  func.func @transform_1(%arg0: i32, %arg1: i32, %arg2: i32) -> (i32, i32, i32) {
    %c0_i32 = arith.constant 0 : i32
    %c0_i32_0 = arith.constant 0 : i32
    return %arg0, %c0_i32, %arg2 : i32, i32, i32
  }
  func.func @transform_2(%arg0: i32, %arg1: i32, %arg2: i32) -> (i32, i32, i32) {
    %c0_i32 = arith.constant 0 : i32
    %c0_i32_0 = arith.constant 0 : i32
    return %arg0, %c0_i32, %arg1 : i32, i32, i32
  }
}

module attributes {stable_mosaic.version = 11 : i64} {
  func.func @_bev_head_kernel(%arg0: i32, %arg1: i32, %arg2: memref<1x16x128xf32, #tpu.memory_space<vmem>>, %arg3: memref<1x16x128xf32, #tpu.memory_space<vmem>>, %arg4: memref<1x16x128xf32, #tpu.memory_space<vmem>>, %arg5: memref<32x144xf32, #tpu.memory_space<vmem>>, %arg6: memref<32x1xf32, #tpu.memory_space<vmem>>, %arg7: memref<10x32xf32, #tpu.memory_space<vmem>>, %arg8: memref<10x1xf32, #tpu.memory_space<vmem>>, %arg9: memref<1x10x128xf32, #tpu.memory_space<vmem>>) attributes {dimension_semantics = [#tpu.dimension_semantics<parallel>, #tpu.dimension_semantics<parallel>], iteration_bounds = array<i64: 2, 2>, scalar_prefetch = 0 : i64, scratch_operands = 0 : i64, tpu.core_type = #tpu.core_type<tc>, window_params = [{transform_indices = @transform_0, window_bounds = array<i64: 1, 16, 128>}, {transform_indices = @transform_1, window_bounds = array<i64: 1, 16, 128>}, {transform_indices = @transform_2, window_bounds = array<i64: 1, 16, 128>}, {pipeline_mode = #tpu.pipeline_mode<synchronous>, transform_indices = @transform_3, window_bounds = array<i64: 32, 144>}, {pipeline_mode = #tpu.pipeline_mode<synchronous>, transform_indices = @transform_4, window_bounds = array<i64: 32, 1>}, {pipeline_mode = #tpu.pipeline_mode<synchronous>, transform_indices = @transform_5, window_bounds = array<i64: 10, 32>}, {pipeline_mode = #tpu.pipeline_mode<synchronous>, transform_indices = @transform_6, window_bounds = array<i64: 10, 1>}, {transform_indices = @transform_7, window_bounds = array<i64: 1, 10, 128>}]} {
    %0 = tpu.iota {dimensions = array<i32: 1>} : vector<1x128xi32>
    %c16_i32 = arith.constant 16 : i32
    %c0_i32 = arith.constant 0 : i32
    %1 = arith.cmpi eq, %c16_i32, %c0_i32 : i32
    %c1_i32 = arith.constant 1 : i32
    %2 = arith.select %1, %c1_i32, %c16_i32 : i32
    %3 = vector.broadcast %2 : i32 to vector<1x128xi32>
    %4 = arith.remsi %0, %3 : vector<1x128xi32>
    %c0_i32_0 = arith.constant 0 : i32
    %5 = vector.broadcast %c0_i32_0 : i32 to vector<1x128xi32>
    %6 = arith.cmpi ne, %4, %5 : vector<1x128xi32>
    %c0_i32_1 = arith.constant 0 : i32
    %7 = vector.broadcast %c0_i32_1 : i32 to vector<1x128xi32>
    %8 = arith.cmpi slt, %4, %7 : vector<1x128xi32>
    %c0_i32_2 = arith.constant 0 : i32
    %9 = arith.cmpi slt, %2, %c0_i32_2 : i32
    %10 = vector.broadcast %9 : i1 to vector<1x128xi1>
    %11 = vector.broadcast %10 : vector<1x128xi1> to vector<1x128xi1>
    %12 = arith.xori %8, %11 : vector<1x128xi1>
    %13 = arith.andi %12, %6 : vector<1x128xi1>
    %14 = vector.broadcast %2 : i32 to vector<1x128xi32>
    %15 = arith.addi %4, %14 : vector<1x128xi32>
    %16 = arith.select %13, %15, %4 : vector<1x128xi1>, vector<1x128xi32>
    %c1_i32_3 = arith.constant 1 : i32
    %17 = vector.broadcast %c1_i32_3 : i32 to vector<1x128xi32>
    %18 = arith.cmpi sge, %16, %17 : vector<1x128xi32>
    %19 = arith.extui %18 : vector<1x128xi1> to vector<1x128xi32>
    %20 = arith.sitofp %19 : vector<1x128xi32> to vector<1x128xf32>
    %c15_i32 = arith.constant 15 : i32
    %21 = vector.broadcast %c15_i32 : i32 to vector<1x128xi32>
    %22 = arith.cmpi slt, %16, %21 : vector<1x128xi32>
    %23 = arith.extui %22 : vector<1x128xi1> to vector<1x128xi32>
    %24 = arith.sitofp %23 : vector<1x128xi32> to vector<1x128xf32>
    %c0 = arith.constant 0 : index
    %c0_4 = arith.constant 0 : index
    %c0_5 = arith.constant 0 : index
    %25 = vector.load %arg2[%c0, %c0_4, %c0_5] : memref<1x16x128xf32, #tpu.memory_space<vmem>>, vector<1x16x128xf32>
    %26 = vector.shape_cast %25 : vector<1x16x128xf32> to vector<16x128xf32>
    %c1_i32_6 = arith.constant 1 : i32
    %27 = tpu.dynamic_rotate %26 by %c1_i32_6 dim 1 : vector<16x128xf32>, i32 -> vector<16x128xf32>
    %28 = vector.broadcast %20 : vector<1x128xf32> to vector<16x128xf32>
    %29 = arith.mulf %27, %28 : vector<16x128xf32>
    %c127_i32 = arith.constant 127 : i32
    %30 = tpu.dynamic_rotate %26 by %c127_i32 dim 1 : vector<16x128xf32>, i32 -> vector<16x128xf32>
    %31 = vector.broadcast %24 : vector<1x128xf32> to vector<16x128xf32>
    %32 = arith.mulf %30, %31 : vector<16x128xf32>
    %c0_7 = arith.constant 0 : index
    %c0_8 = arith.constant 0 : index
    %c0_9 = arith.constant 0 : index
    %33 = vector.load %arg3[%c0_7, %c0_8, %c0_9] : memref<1x16x128xf32, #tpu.memory_space<vmem>>, vector<1x16x128xf32>
    %34 = vector.shape_cast %33 : vector<1x16x128xf32> to vector<16x128xf32>
    %c1_i32_10 = arith.constant 1 : i32
    %35 = tpu.dynamic_rotate %34 by %c1_i32_10 dim 1 : vector<16x128xf32>, i32 -> vector<16x128xf32>
    %36 = vector.broadcast %20 : vector<1x128xf32> to vector<16x128xf32>
    %37 = arith.mulf %35, %36 : vector<16x128xf32>
    %c127_i32_11 = arith.constant 127 : i32
    %38 = tpu.dynamic_rotate %34 by %c127_i32_11 dim 1 : vector<16x128xf32>, i32 -> vector<16x128xf32>
    %39 = vector.broadcast %24 : vector<1x128xf32> to vector<16x128xf32>
    %40 = arith.mulf %38, %39 : vector<16x128xf32>
    %c0_12 = arith.constant 0 : index
    %c0_13 = arith.constant 0 : index
    %c0_14 = arith.constant 0 : index
    %41 = vector.load %arg4[%c0_12, %c0_13, %c0_14] : memref<1x16x128xf32, #tpu.memory_space<vmem>>, vector<1x16x128xf32>
    %42 = vector.shape_cast %41 : vector<1x16x128xf32> to vector<16x128xf32>
    %c1_i32_15 = arith.constant 1 : i32
    %43 = tpu.dynamic_rotate %42 by %c1_i32_15 dim 1 : vector<16x128xf32>, i32 -> vector<16x128xf32>
    %44 = vector.broadcast %20 : vector<1x128xf32> to vector<16x128xf32>
    %45 = arith.mulf %43, %44 : vector<16x128xf32>
    %c127_i32_16 = arith.constant 127 : i32
    %46 = tpu.dynamic_rotate %42 by %c127_i32_16 dim 1 : vector<16x128xf32>, i32 -> vector<16x128xf32>
    %47 = vector.broadcast %24 : vector<1x128xf32> to vector<16x128xf32>
    %48 = arith.mulf %46, %47 : vector<16x128xf32>
    %49 = tpu.concatenate %29, %26, %32, %37, %34, %40, %45, %42, %48 in 0 : vector<16x128xf32>, vector<16x128xf32>, vector<16x128xf32>, vector<16x128xf32>, vector<16x128xf32>, vector<16x128xf32>, vector<16x128xf32>, vector<16x128xf32>, vector<16x128xf32> -> vector<144x128xf32>
    %c0_17 = arith.constant 0 : index
    %c0_18 = arith.constant 0 : index
    %50 = vector.load %arg5[%c0_17, %c0_18] : memref<32x144xf32, #tpu.memory_space<vmem>>, vector<32x144xf32>
    %cst = arith.constant dense<0.000000e+00> : vector<32x128xf32>
    %51 = tpu.matmul %50, %49, %cst {dimension_numbers = #tpu.dot_dimension_numbers<[1], [0], [0], [1], [0, 0, 1, 1], [], []>} : vector<32x144xf32>, vector<144x128xf32>, vector<32x128xf32> -> vector<32x128xf32>
    %c0_19 = arith.constant 0 : index
    %c0_20 = arith.constant 0 : index
    %52 = vector.load %arg6[%c0_19, %c0_20] : memref<32x1xf32, #tpu.memory_space<vmem>>, vector<32x1xf32>
    %53 = vector.broadcast %52 : vector<32x1xf32> to vector<32x128xf32>
    %54 = arith.addf %51, %53 : vector<32x128xf32>
    %cst_21 = arith.constant 0.000000e+00 : f32
    %55 = vector.broadcast %cst_21 : f32 to vector<32x128xf32>
    %56 = arith.maximumf %54, %55 : vector<32x128xf32>
    %c0_22 = arith.constant 0 : index
    %c0_23 = arith.constant 0 : index
    %57 = vector.load %arg7[%c0_22, %c0_23] : memref<10x32xf32, #tpu.memory_space<vmem>>, vector<10x32xf32>
    %cst_24 = arith.constant dense<0.000000e+00> : vector<10x128xf32>
    %58 = tpu.matmul %57, %56, %cst_24 {dimension_numbers = #tpu.dot_dimension_numbers<[1], [0], [0], [1], [0, 0, 1, 1], [], []>} : vector<10x32xf32>, vector<32x128xf32>, vector<10x128xf32> -> vector<10x128xf32>
    %c0_25 = arith.constant 0 : index
    %c0_26 = arith.constant 0 : index
    %59 = vector.load %arg8[%c0_25, %c0_26] : memref<10x1xf32, #tpu.memory_space<vmem>>, vector<10x1xf32>
    %60 = vector.broadcast %59 : vector<10x1xf32> to vector<10x128xf32>
    %61 = arith.addf %58, %60 : vector<10x128xf32>
    %c0_27 = arith.constant 0 : index
    %c0_28 = arith.constant 0 : index
    %c0_29 = arith.constant 0 : index
    %62 = vector.load %arg9[%c0_27, %c0_28, %c0_29] : memref<1x10x128xf32, #tpu.memory_space<vmem>>, vector<1x10x128xf32>
    %63 = vector.shape_cast %62 : vector<1x10x128xf32> to vector<10x128xf32>
    %64 = vector.shape_cast %61 : vector<10x128xf32> to vector<1x10x128xf32>
    tpu.vector_store %arg9[%c0_27, %c0_28, %c0_29], %64 {strides = array<i32>} : memref<1x10x128xf32, #tpu.memory_space<vmem>>, vector<1x10x128xf32>,
    return
  }
  func.func @transform_0(%arg0: i32, %arg1: i32) -> (i32, i32, i32) {
    %c0_i32 = arith.constant 0 : i32
    %c0_i32_0 = arith.constant 0 : i32
    return %arg0, %c0_i32, %arg1 : i32, i32, i32
  }
  func.func @transform_1(%arg0: i32, %arg1: i32) -> (i32, i32, i32) {
    %c0_i32 = arith.constant 0 : i32
    %c0_i32_0 = arith.constant 0 : i32
    return %arg0, %c0_i32, %arg1 : i32, i32, i32
  }
  func.func @transform_2(%arg0: i32, %arg1: i32) -> (i32, i32, i32) {
    %c0_i32 = arith.constant 0 : i32
    %c0_i32_0 = arith.constant 0 : i32
    return %arg0, %c0_i32, %arg1 : i32, i32, i32
  }
  func.func @transform_3(%arg0: i32, %arg1: i32) -> (i32, i32) {
    %c0_i32 = arith.constant 0 : i32
    %c0_i32_0 = arith.constant 0 : i32
    %c0_i32_1 = arith.constant 0 : i32
    return %c0_i32, %c0_i32_0 : i32, i32
  }
  func.func @transform_4(%arg0: i32, %arg1: i32) -> (i32, i32) {
    %c0_i32 = arith.constant 0 : i32
    %c0_i32_0 = arith.constant 0 : i32
    %c0_i32_1 = arith.constant 0 : i32
    return %c0_i32, %c0_i32_0 : i32, i32
  }
  func.func @transform_5(%arg0: i32, %arg1: i32) -> (i32, i32) {
    %c0_i32 = arith.constant 0 : i32
    %c0_i32_0 = arith.constant 0 : i32
    %c0_i32_1 = arith.constant 0 : i32
    return %c0_i32, %c0_i32_0 : i32, i32
  }
  func.func @transform_6(%arg0: i32, %arg1: i32) -> (i32, i32) {
    %c0_i32 = arith.constant 0 : i32
    %c0_i32_0 = arith.constant 0 : i32
    %c0_i32_1 = arith.constant 0 : i32
    return %c0_i32, %c0_i32_0 : i32, i32
  }
  func.func @transform_7(%arg0: i32, %arg1: i32) -> (i32, i32, i32) {
    %c0_i32 = arith.constant 0 : i32
    %c0_i32_0 = arith.constant 0 : i32
    return %arg0, %c0_i32, %arg1 : i32, i32, i32
  }
}

</mosaic_0001>

<bundles_post_ra>
// kernel: custom-call.22
= control target key start
LH: loop header
LB: loop body
LE: loop exit
PB: predicated region body
PF: predicated region fallthrough
CT: control target
= control target key end

     0   :  { %s1082_s0 = inlined_call_operand.hbm [shape: f32[2,2,4,4], index: 0, kind: input, shape index: {}]   ;;  %s1083_s1 = inlined_call_operand.vmem [shape: f32[2,2,4,4], index: 1, kind: output, shape index: {0}]   ;;  %s1084_s2 = inlined_call_operand.hbm [shape: s32[2,2,4], index: 2, kind: output, shape index: {1}]   ;;  %s1085_s3 = inlined_call_operand.vmem [shape: s32[2,2,4], index: 3, kind: output, shape index: {2}]  }
   0x1   :  { %1088 = sst [smem:[#allocation14_spill]] %s1082_s0 }
   0x2   :  { %5 = vsyncpa [#allocation2], 0 }
   0x3   :  { %7 = vsyncpa [#allocation2 + $0x1], 0 }
   0x4   :  { %8 = vsyncpa [#allocation3], 0 }
   0x5   :  { %10 = vsyncpa [#allocation3 + $0x1], 0  ;;  %s841_s12 = smov 0   ;;  %s843_s13 = smov 0  }
   0x6   :  { %s845_s14 = smov 0   ;;  %s847_s15 = smov 0  }
   0x7   :  { %s849_s16 = smov 0   ;;  %s851_s17 = smov 0  }
   0x8   :  { %s853_s18 = smov 0   ;;  %s855_s19 = smov 0  }
   0x9 LB: > { %s575_s20 = sadd.s32 4294967295, %s812_s19   ;;  %s576_s21 = sadd.s32 4294967294, %s812_s19   ;;  %s812_s19 = sphi %s855_s19, %s16_s19   ;;  %s808_s18 = sphi %s853_s18, %s1105_s18   ;;  %s804_s17 = sphi %s851_s17, %s1104_s17   ;;  %s800_s16 = sphi %s849_s16, %s1103_s16   ;;  %s796_s15 = sphi %s847_s15, %s1102_s15   ;;  %s792_s14 = sphi %s845_s14, %s1101_s14   ;;  %s788_s13 = sphi %s843_s13, %s1100_s13   ;;  %s784_s12 = sphi %s841_s12, %s1099_s12  }
   0xa   : > { %s25_s22 = sadd.s32 1, %s804_s17  ;;  %s28_s23 = sadd.s32 1, %s808_s18 }
   0xb   : > { %p26_p0 = scmp.ge.s32.totalorder %s25_s22, 2  ;;  %s32_s24 = sshrl.u32 %s804_s17, 3 }
   0xc   : > { %s39_s25 = sadd.s32 1, %s792_s14  ;;  %p49_p1 = scmp.ne.s32.totalorder %s792_s14, %s788_s13 }
   0xd   : > { %s1107_s22 = smov (%p26_p0, %s25_s22), 0  ;;  %s1109_s23 = smov (!%p26_p0, %s28_s23), %s808_s18 }
   0xe   : > { %s33_s26 = sshrl.u32 %s1107_s22, 3  ;;  %p50_p2 = scmp.eq.s32.totalorder %s575_s20, 3 }
   0xf   : > { %p30_p3 = scmp.ge.s32.totalorder %s1109_s23, 2  ;;  %s35_s27 = ssub.s32 %s32_s24, %s33_s26 }
  0x10   : > { %p895_p4 = por %p50_p2, %p49_p1  ;;  %p55_p5 = scmp.ne.s32.totalorder %s788_s13, %s784_s12 }
  0x11   : > { %s1111_s23 = smov (%p30_p3, %s1109_s23), 0  ;;  %p56_p6 = scmp.eq.s32.totalorder %s576_s21, 3 }
  0x12   : > { %1090 = sst [smem:[#allocation13_spill]] %s1111_s23  ;;  %s34_s29 = ssub.s32 %s808_s18, %s1111_s23 }
  0x13   : > { %p607_p7 = scmp.lt.s32.totalorder %s812_s19, 4  ;;  %s36_s30 = sor.u32 %s35_s27, %s34_s29 }
  0x14   : > { %p906_p8 = por %p56_p6, %p55_p5  ;;  %p37_p9 = scmp.eq.s32.totalorder %s36_s30, 0 }
  0x15   : > { %s103_s5 = sand.u32 1, %s812_s19   ;;  %s580_s8 = sshll.u32 %s808_s18, 1 }
  0x16   : > { %s1091_s4 = scalar_select %p906_p8, 1, 0 }
  0x17   : > { %s579_s6 = sshll.u32 %s103_s5, 2  ;;  %s112_s9 = sadd.s32 %s804_s17, %s580_s8 }
  0x18   : > { %s912_s7 = scalar_select %p37_p9, %s792_s14, %s39_s25  }
  0x19   : > { %s107_s10 = scalar_lea.vmem [#allocation1], %s579_s6  ;;  %s581_s24 = sshll.u32 %s112_s9, 6 }
  0x1a   : > { %s116_s11 = sshll.u32 %s107_s10, 4  ;;  %s1092_s0 = sld [smem:[#allocation14_spill]]  ;;  %s916_s11 = int_to_ptr.vmem [resolvable:$true] %s116_s11 }
  0x1b   : > { %s104_s29 = scalar_lea.sflag [#allocation2], %s103_s5 }
  0x20   : > { %s921_s27 = scalar_lea.hbm %s1092_s0, %s581_s24  ;;  %s688_s8 = scalar_lea.hbm %s1092_s0, 256 }
  0x21   : > { %s684_s25 = scalar_lea.hbm %s921_s27, 64  ;;  %p689_p0 = scmp.lt.u32.totalorder %s921_s27, %s1092_s0 }
  0x22   : > { %p685_p11 = scmp.ne.s32.totalorder %s921_s27, %s684_s25  ;;  %p690_p1 = scmp.lt.u32.totalorder %s688_s8, %s684_s25 }
  0x23   : > { %p692_p3 = scmp.lt.u32.totalorder %s684_s25, %s921_s27 }
  0x24   : > { %p686_p12 = pnand %p685_p11, %p607_p7  ;;  %p691_p2 = por %p690_p1, %p689_p0 }
  0x26   : > { %p687_p13 = pneg %p686_p12  ;;  %p693_p5 = por %p692_p3, %p691_p2 }
  0x28   : > { %p694_p6 = pnand %p693_p5, %p687_p13 }
  0x2a   : > { %697 = shalt.err (!%p694_p6)
}
  0x2b   : > { %s698_s5 = scalar_lea.vmem %s916_s11, 64  ;;  %s818_s24 = smov [#allocation1]  }
  0x2c   : > { %p699_p9 = scmp.ne.s32.totalorder %s916_s11, %s698_s5  ;;  %s702_s21 = sshll.u32 %s818_s24, 4  ;;  %s703_s21 = int_to_ptr.vmem [resolvable:$false] %s702_s21 }
  0x2d   : > { %s704_s26 = scalar_lea.vmem %s703_s21, 128  ;;  %p705_p10 = scmp.lt.s32.totalorder %s916_s11, %s703_s21 }
  0x2e   : > { %p700_p11 = pnand %p699_p9, %p607_p7  ;;  %p706_p8 = scmp.lt.s32.totalorder %s704_s26, %s698_s5 }
  0x30   : > { %p701_p12 = pneg %p700_p11  ;;  %p707_p0 = por %p706_p8, %p705_p10 }
  0x32   : > { %p708_p1 = pnand %p707_p0, %p701_p12 }
  0x34   : > { %711 = shalt.err (!%p708_p1)
}
  0x35   : > { %600 = dma.hbm_to_vmem [thread:$0]  (%p607_p7), %s921_s27, 64, %s916_s11, %s104_s29  }
  0x36   : > { %p121_p13 = scmp.lt.s32.totalorder %s812_s19, 5  ;;  %p1093_p2 = scmp.ge.s32.totalorder %s812_s19, 1 }
  0x38   : > { %p122_p3 = pnand %p1093_p2, %p121_p13 }
  0x3a   : > { %125 = sbr.rel (%p122_p3) target bundleno = 493 (0x1ed), region = 20 }
  0x41   : > { %s127_s25 = sand.u32 1, %s575_s20  }
  0x42   : > { %s128_s30 = scalar_lea.sflag [#allocation2], %s127_s25 }
  0x43   : > { %776 = dma.done.wait %s128_s30, 64  }
  0x44   : > { %777 = vsyncadd %s128_s30, 4294967232  ;;  %s583_s6 = sshll.u32 %s127_s25, 2  ;;  %s163_s8 = sand.u32 7, %s796_s15   ;;  %v168_v0 = vlaneseq  ;;  %v819_v2 = vmov 0  }
  0x45   : > { %s954_s11 = scalar_lea.vmem [#allocation6], %s163_s8  ;;  %s1086_s27 = sand.u32 1, %s788_s13  }
  0x46   : > { %v952_v1 = vshrl.u32 %v168_v0, 7  ;;  %167 = vst [vmem:[%s954_s11] sm:$0x1] %v819_v2  ;;  %s961_s20 = sshll.u32 %s1086_s27, 1  ;;  %s137_s29 = scalar_lea.vmem [#allocation1], %s583_s6 }
  0x47   : > { %v157_v3 = vld [vmem:[%s137_s29] sm:$0xf]  ;;  %s963_s9 = scalar_lea.vmem [#allocation5], %s583_s6  ;;  %s148_s10 = scalar_lea.vmem [#allocation7], %s961_s20 }
  0x48   : > { %172 = vst [vmem:[#allocation10] sm:$0xff] %v952_v1  ;;  %158 = vst [vmem:[#allocation0] sm:$0xf] %v157_v3  ;;  %s967_s24 = scalar_lea.vmem [#allocation8], %s163_s8  ;;  %s969_s21 = smov 0  }
  0x4f   : > { %v161_v4 = vld [vmem:[#allocation0] sm:$0xff] }
  0x50   : > { %162 = vst [vmem:[#allocation4] sm:$0xff] %v161_v4 }
  0x51 LB: >> { %vm188_vm0 = vcmp.lt.s32.totalorder %v952_v1, 4  ;;  %v976_v7 = vstv %s816_s21  ;;  %s229_s26 = ssub.s32 128, %s816_s21  ;;  %v235_v37 = vand.u32 127, %v168_v0  ;;  %v238_v39 = vld [vmem:[%s954_s11] ss:$0 sm:$0xff]  ;;  %s241_s25 = scalar_lea.vmem [#allocation4], %s816_s21  ;;  %s816_s21 = sphi %s969_s21, %s178_s21  }
  0x52   : >> { %vm187_vm1 = vcmp.ge.s32.totalorder %v952_v1, %v976_v7  ;;  %s247_s6 = scalar_lea.vmem [#allocation10], %s816_s21  ;;  %vm267_vm15 = vcmp.gt.s32.totalorder %v952_v1, %v976_v7  ;;  %s178_s21 = sadd.s32 1, %s816_s21  }
  0x53   : >> { %vm189_vm3 = vmand %vm187_vm1, %vm188_vm0  ;;  %vm259_vm12 = vcmp.gt.s32.totalorder %v235_v37, %v976_v7  ;;  %vm236_vm13 = vcmp.eq.s32.totalorder %v235_v37, %v976_v7  ;;  %v249_v41 = vld [vmem:[%s247_s6] ss:$0 sm:$0xff]  ;;  %p175_p7 = scmp.ge.s32.totalorder %s178_s21, 4  }
  0x54   : >> { %vm271_vm1 = vmand %vm267_vm15, %vm236_vm13 }
  0x57   : >> { %v183_v5 = vld [vmem:[#allocation4] sm:$0xff]  ;;  %v243_v40 = vld [vmem:[%s241_s25] ss:$0 sm:$0xff] }
  0x58   : >> { %v184_v6 = vand.u32 2147483647, %v183_v5 }
  0x5a   : >> { %vm587_vm2 = vcmp.gt.f32.partialorder %v184_v6, -inf }
  0x5b   : >> { %vm191_vm4 = vmand %vm189_vm3, %vm587_vm2 }
  0x5c   : >> { %v192_v8 = vsel %vm191_vm4, %v952_v1, %v976_v7  ;;  %v193_v9 = vsel %vm191_vm4, %v184_v6, -inf }
  0x5d   : >> { %v194_v10 = vrot.slane %v193_v9, 1  ;;  %v195_v11 = vrot.slane %v192_v8, 1 }
  0x5f   : >> { %vm196_vm5 = vcmp.ge.f32.partialorder %v194_v10, %v193_v9  ;;  %v199_v12 = vrot.slane %v194_v10, 1  ;;  %v200_v13 = vrot.slane %v195_v11, 1 }
  0x60   : >> { %v197_v14 = vsel %vm196_vm5, %v194_v10, %v193_v9  ;;  %v198_v15 = vsel %vm196_vm5, %v195_v11, %v192_v8 }
  0x61   : >> { %vm201_vm6 = vcmp.ge.f32.partialorder %v199_v12, %v197_v14  ;;  %v204_v16 = vrot.slane %v199_v12, 1  ;;  %v205_v17 = vrot.slane %v200_v13, 1 }
  0x62   : >> { %v202_v18 = vsel %vm201_vm6, %v199_v12, %v197_v14  ;;  %v203_v19 = vsel %vm201_vm6, %v200_v13, %v198_v15 }
  0x63   : >> { %vm206_vm7 = vcmp.ge.f32.partialorder %v204_v16, %v202_v18  ;;  %v209_v20 = vrot.slane %v204_v16, 1  ;;  %v210_v21 = vrot.slane %v205_v17, 1 }
  0x64   : >> { %v207_v22 = vsel %vm206_vm7, %v204_v16, %v202_v18  ;;  %v208_v23 = vsel %vm206_vm7, %v205_v17, %v203_v19 }
  0x65   : >> { %vm211_vm8 = vcmp.ge.f32.partialorder %v209_v20, %v207_v22  ;;  %v214_v24 = vrot.slane %v209_v20, 1  ;;  %v215_v25 = vrot.slane %v210_v21, 1 }
  0x66   : >> { %v212_v26 = vsel %vm211_vm8, %v209_v20, %v207_v22  ;;  %v213_v27 = vsel %vm211_vm8, %v210_v21, %v208_v23 }
  0x67   : >> { %vm216_vm9 = vcmp.ge.f32.partialorder %v214_v24, %v212_v26  ;;  %v219_v28 = vrot.slane %v214_v24, 1  ;;  %v220_v29 = vrot.slane %v215_v25, 1 }
  0x68   : >> { %v217_v30 = vsel %vm216_vm9, %v214_v24, %v212_v26  ;;  %v218_v31 = vsel %vm216_vm9, %v215_v25, %v213_v27 }
  0x69   : >> { %vm221_vm10 = vcmp.ge.f32.partialorder %v219_v28, %v217_v30  ;;  %v224_v32 = vrot.slane %v219_v28, 1  ;;  %v225_v33 = vrot.slane %v220_v29, 1 }
  0x6a   : >> { %v222_v34 = vsel %vm221_vm10, %v219_v28, %v217_v30  ;;  %v223_v35 = vsel %vm221_vm10, %v220_v29, %v218_v31 }
  0x6b   : >> { %vm226_vm11 = vcmp.ge.f32.partialorder %v224_v32, %v222_v34 }
  0x6c   : >> { %v228_v36 = vsel %vm226_vm11, %v225_v33, %v223_v35 }
  0x6d   : >> { %230 = vrot.lane.b32.xlu0 %v228_v36, %s229_s26  ;;  %s591_s26 = sshll.u32 (%p175_p7), %s800_s16, 1 }
  0xdf   : >> { %v231_v38 = vpop.permute.xlu0 %230 }
  0xe0   : >> { %597 = vpush %v231_v38 }
 0x111   : >> { %s598_s30 = spop %597 }
 0x112   : >> { %v237_v42 = vstv %s598_s30  ;;  %s242_s8 = scalar_lea.vmem [#allocation4], %s598_s30  ;;  %s248_s29 = scalar_lea.vmem [#allocation10], %s598_s30 }
 0x113   : >> { %v244_v43 = vld [vmem:[%s242_s8] ss:$0 sm:$0xff]  ;;  %v239_v45 = vsel %vm236_vm13, %v237_v42, %v238_v39  ;;  %s359_s30 = sadd.s32 (%p175_p7), %s796_s15, %s591_s26 }
 0x114   : >> { %v250_v44 = vld [vmem:[%s248_s29] ss:$0 sm:$0xff]  ;;  %245 = vst [vmem:[%s242_s8] sm:$0x1] %v243_v40  ;;  %vm253_vm14 = vcmp.ne.f32.partialorder %v244_v43, 0.0  ;;  %240 = vst [vmem:[%s954_s11] sm:$0x1] %v239_v45  ;;  %v260_v52 = vsel %vm259_vm12, %v244_v43, 0.0 }
 0x115   : >> { %251 = vst [vmem:[%s248_s29] sm:$0x1] %v249_v41  ;;  %246 = vst [vmem:[%s241_s25] sm:$0x1] %v244_v43  ;;  %s396_s25 = sshrl.u32 (%p175_p7), %s796_s15, 3  ;;  %s592_s11 = sshll.u32 (%p175_p7), %s359_s30, 2 }
 0x116   : >> { %252 = vst [vmem:[%s247_s6] sm:$0x1] %v250_v44  ;;  %vm254_vm0 = vmand %vm236_vm13, %vm253_vm14  ;;  %s1008_s6 = sadd.s32 (%p175_p7), %s800_s16, %s396_s25  ;;  %s361_s5 = scalar_lea.vmem (%p175_p7), %s1083_s1, %s592_s11 }
 0x117   : >> { %v255_v46 = vsel %vm254_vm0, %v244_v43, 1.0  ;;  %s593_s21 = sshll.u32 (%p175_p7), %s1008_s6, 5  ;;  %s404_s15 = sshll.u32 (%p175_p7), %s148_s10, 4  ;;  %s405_s15 = int_to_ptr.vmem [resolvable:$true] %s404_s15 }
 0x118   : >> { %v268_v47 = vsel %vm267_vm15, %v255_v46, 1.0  ;;  %s1020_s23 = scalar_lea.hbm (%p175_p7), %s1084_s2, %s593_s21  ;;  %s1094_s16 = sand.u32 (%p175_p7), 1, %s788_s13  }
 0x119   : >> { %682 = vrcp.f32 %v268_v47  ;;  %s350_s26 = scalar_lea.sflag (%p175_p7), [#allocation3], %s1094_s16  ;;  %s712_s25 = scalar_lea.vmem (%p175_p7), %s405_s15, 32 }
 0x11a   : > { %p713_p8 = scmp.ne.s32.totalorder (%p175_p7), %s405_s15, %s712_s25  ;;  %s820_s30 = smov (%p175_p7), [#allocation7]  }
 0x11b   : > { %v336_v58 = vld [vmem:[#allocation6] sm:$0x3] (%p175_p7)  ;;  %s716_s8 = sshll.u32 (%p175_p7), %s820_s30, 4  ;;  %s717_s8 = int_to_ptr.vmem [resolvable:$false] %s716_s8 }
 0x11c   : >> { %v264_v49 = vld [vmem:[#allocation4] sm:$0xff]  ;;  %338 = vst [vmem:[%s148_s10] sm:$0x3] (%p175_p7), %v336_v58  ;;  %p714_p10 = pnand (%p175_p7), %p713_p8, %p895_p4  ;;  %p719_p6 = scmp.lt.s32.totalorder (%p175_p7), %s405_s15, %s717_s8 }
 0x11d   : > { %v278_v56 = vld [vmem:[#allocation10] sm:$0xff] (%p175_p7) }
 0x11e   : > { %p715_p5 = pneg (%p175_p7), %p714_p10 }
 0x123   : >> { %v683_v48 = vpop.eup %682 }
 0x124   : >> { %v270_v50 = vmul.f32 %v683_v48, %v264_v49 }
 0x126   : >> { %v272_v51 = vsel %vm271_vm1, %v270_v50, 0.0 }
 0x127   : >> { %273 = vadd.xlane.f32.xlu0 %v272_v51 }
 0x154   : > { %294 = vxpose.xlu0.b32.start.end [1/1] (short) (narrow) (%p175_p7), %v278_v56, 8 }
 0x1b3   : > { %177 = sbr.rel (!%p175_p7) target bundleno = 81 (0x51), region = 173 }
 0x1b4   : >> { %v274_v53 = vpop.xlane.xlu0 %273 }
 0x1b5   : >> { %v275_v54 = vmul.f32 %v274_v53, %v260_v52 }
 0x1b7   : >> { %v276_v55 = vsub.f32 %v270_v50, %v275_v54 }
 0x1b9   : >> { %277 = vst [vmem:[#allocation4] sm:$0xff] %v276_v55 }
 0x1c0   : > { %v330_v57 = vld [vmem:[#allocation4] sm:$0xf] }
 0x1c1   : > { %332 = vst [vmem:[%s963_s9] sm:$0xf] %v330_v57 }
 0x1c8   : > { %v377_v59 = vld [vmem:[%s963_s9] sm:$0xf]  ;;  %s718_s9 = scalar_lea.vmem %s717_s8, 64 }
 0x1c9   : > { %378 = vst [vmem:[%s361_s5] sm:$0xf] %v377_v59  ;;  %p720_p9 = scmp.lt.s32.totalorder %s718_s9, %s712_s25 }
 0x1cb   : > { %p721_p11 = por %p720_p9, %p719_p6 }
 0x1cd   : > { %p722_p12 = pnand %p721_p11, %p715_p5 }
 0x1cf   : > { %725 = shalt.err (!%p722_p12)
}
 0x1d0   : > { %s726_s0 = scalar_lea.hbm %s1020_s23, 32  ;;  %s730_s5 = scalar_lea.hbm %s1084_s2, 64 }
 0x1d1   : > { %p727_p0 = scmp.ne.s32.totalorder %s1020_s23, %s726_s0  ;;  %p731_p2 = scmp.lt.u32.totalorder %s1020_s23, %s1084_s2 }
 0x1d2   : > { %p732_p3 = scmp.lt.u32.totalorder %s730_s5, %s726_s0  ;;  %p734_p8 = scmp.lt.u32.totalorder %s726_s0, %s1020_s23 }
 0x1d3   : > { %p728_p1 = pnand %p727_p0, %p895_p4 }
 0x1d4   : > { %p733_p7 = por %p732_p3, %p731_p2 }
 0x1d5   : > { %p729_p13 = pneg %p728_p1 }
 0x1d6   : > { %p735_p10 = por %p734_p8, %p733_p7 }
 0x1d8   : > { %p736_p5 = pnand %p735_p10, %p729_p13 }
 0x1da   : > { %739 = shalt.err (!%p736_p5)
}
 0x1db   : > { %601 = dma.vmem_to_hbm [thread:$0]  (%p895_p4), %s405_s15, 32, %s1020_s23, %s350_s26   ;;  %v310_v60 = vpop.trf.xlu0 }
 0x1dc   : > { %326 = vst [vmem:[%s967_s24] sm:$0x1] %v310_v60  ;;  %s1095_s29 = scalar_lea.vmem [#allocation9], %s961_s20  ;;  %s594_s16 = sshll.u32 (%p895_p4), %s1008_s6, 1 }
 0x1dd   : > { %s1096_s25 = scalar_lea.vmem (%p895_p4), [#allocation9], %s961_s20  ;;  %s414_s9 = scalar_lea.vmem (%p895_p4), %s1085_s3, %s594_s16 }
 0x1de   : > { %410 = sbr.rel (!%p895_p4) target bundleno = 493 (0x1ed), region = 66 }
 0x1e3   : > { %v342_v61 = vld [vmem:[#allocation8] sm:$0x3] }
 0x1e4   : > { %344 = vst [vmem:[%s1095_s29] sm:$0x3] %v342_v61 }
 0x1eb   : > { %v430_v62 = vld [vmem:[%s1096_s25] sm:$0x3] }
 0x1ec   : > { %431 = vst [vmem:[%s414_s9] sm:$0x3] %v430_v62 }
 0x1ed PF: > { %p608_p6 = scmp.ge.s32.totalorder %s812_s19, 2  ;;  %s458_s23 = sand.u32 1, %s784_s12  }
 0x1ee   : > { %p1097_p9 = scmp.ne.s32.totalorder %s1091_s4, 0  ;;  %s459_s28 = scalar_lea.sflag [#allocation3], %s458_s23 }
 0x1f0   : > { %p604_p11 = pnand %p608_p6, %p1097_p9 }
 0x1f2   : > { %779 = dma.done.wait (!%p604_p11), %s459_s28, 32  }
 0x1f3   : > { %781 = vsyncadd (!%p604_p11), %s459_s28, 4294967264  ;;  %s16_s19 = sadd.s32 1, %s812_s19   ;;  %s1098_s20 = sld [smem:[#allocation13_spill]] }
 0x1f4   : > { %p13_p4 = scmp.ge.s32.totalorder %s16_s19, 6   ;;  %s1099_s12 = smov %s788_s13 }
 0x1f5   : > { %s1100_s13 = smov %s792_s14  ;;  %s1101_s14 = smov %s912_s7 }
 0x1f6   : > { %s1102_s15 = smov %s804_s17  ;;  %s1103_s16 = smov %s808_s18 }
 0x1f7   : > { %s1104_s17 = smov %s1107_s22  ;;  %15 = sbr.rel (!%p13_p4) target bundleno = 9 (0x9), region = 184 }
 0x1f9   : > { %s1105_s18 = smov %s1098_s20 }
 0x1fe   :  { %471 = vsyncpa [#allocation2], 1 }
 0x1ff   :  { %473 = vsyncpa [#allocation2 + $0x1], 1 }
 0x200   :  { %474 = vsyncpa [#allocation3], 1 }
 0x201   :  { %476 = vsyncpa [#allocation3 + $0x1], 1 }

// kernel: custom-call.29
= control target key start
LH: loop header
LB: loop body
LE: loop exit
PB: predicated region body
PF: predicated region fallthrough
CT: control target
= control target key end

     0   :  { %s408_s6 = smov 0   ;;  %s410_s7 = smov 0   ;;  %s477_s0 = inlined_call_operand.vmem [shape: f32[2,2,1,4,4], index: 0, kind: input, shape index: {}]   ;;  %s478_s1 = inlined_call_operand.vmem [shape: f32[2,2,1,4,4], index: 1, kind: output, shape index: {}]  }
   0x1   :  { %s412_s8 = smov 0   ;;  %s414_s9 = smov 0  }
   0x2   :  { %s416_s10 = smov 0  }
   0x3 LB: > { %s300_s11 = sadd.s32 4294967295, %s395_s10   ;;  %s36_s12 = sadd.s32 1, %s387_s8  ;;  %s395_s10 = sphi %s416_s10, %s7_s10   ;;  %s391_s9 = sphi %s414_s9, %s482_s9   ;;  %s387_s8 = sphi %s412_s8, %s481_s8   ;;  %s383_s7 = sphi %s410_s7, %s480_s7   ;;  %s379_s6 = sphi %s408_s6, %s479_s6  }
   0x4   : > { %p38_p0 = scmp.ge.s32.totalorder %s36_s12, 2  ;;  %s40_s13 = sadd.s32 1, %s391_s9 }
   0x5   : > { %p302_p2 = scmp.ge.s32.totalorder %s395_s10, 4 }
   0x6   : > { %s484_s12 = smov (%p38_p0, %s36_s12), 0  ;;  %s486_s13 = smov (!%p38_p0, %s40_s13), %s391_s9 }
   0x7   : > { %p42_p1 = scmp.ge.s32.totalorder %s486_s13, 2  ;;  %54 = sbr.rel (%p302_p2) target bundleno = 15 (0xf), region = 16 }
   0x8   : > { %s56_s14 = sand.u32 (!%p302_p2), 1, %s395_s10   ;;  %s304_s15 = sshll.u32 (!%p302_p2), %s391_s9, 1 }
   0x9   : > { %s488_s13 = smov (%p42_p1, %s486_s13), 0  ;;  %s303_s16 = sshll.u32 (!%p302_p2), %s56_s14, 2 }
   0xa   : > { %s63_s17 = sadd.s32 (!%p302_p2), %s387_s8, %s304_s15  ;;  %s58_s22 = scalar_lea.vmem (!%p302_p2), [#allocation1], %s303_s16 }
   0xb   : > { %s305_s18 = sshll.u32 (!%p302_p2), %s63_s17, 2 }
   0xc   : > { %s65_s21 = scalar_lea.vmem (!%p302_p2), %s477_s0, %s305_s18 }
   0xd   : > { %v81_v0 = vld [vmem:[%s65_s21] sm:$0xf] (!%p302_p2) }
   0xe   : > { %82 = vst [vmem:[%s58_s22] sm:$0xf] %v81_v0 }
   0xf PF: > { %p306_p3 = scmp.ge.s32.totalorder %s395_s10, 1  ;;  %p98_p4 = scmp.lt.s32.totalorder %s395_s10, 5 }
  0x11   : > { %p99_p5 = pnand %p306_p3, %p98_p4 }
  0x13   : > { %102 = sbr.rel (%p99_p5) target bundleno = 659 (0x293), region = 50 }
  0x1a   : > { %s450_s23 = sand.u32 1, %s300_s11   ;;  %v120_v1 = vlaneseq  ;;  %v397_v11 = vmov -1.0   ;;  %s310_s26 = sshll.u32 %s383_s7, 1 }
  0x1b   : > { %s307_s24 = sshll.u32 %s450_s23, 2  ;;  %s197_s27 = sadd.s32 %s379_s6, %s310_s26 }
  0x1c   : > { %s111_s25 = scalar_lea.vmem [#allocation1], %s307_s24  ;;  %v121_v3 = vand.u32 127, %v120_v1  ;;  %v124_v4 = vshrl.u32 %v120_v1, 7  ;;  %s115_s28 = scalar_lea.vmem [#allocation3], %s307_s24 }
  0x1d   : > { %v118_v2 = vld [vmem:[%s111_s25] sm:$0xf]  ;;  %s311_s29 = sshll.u32 %s197_s27, 2 }
  0x1e   : > { %119 = vst [vmem:[#allocation0] sm:$0xf] %v118_v2  ;;  %vm122_vm0 = vcmp.lt.s32.totalorder %v121_v3, 4  ;;  %vm131_vm1 = vcmp.ge.s32.totalorder %v124_v4, %v121_v3  ;;  %vm126_vm2 = vcmp.eq.s32.totalorder %v124_v4, %v121_v3  ;;  %vm145_vm4 = vcmp.eq.s32.totalorder %v121_v3, 0  ;;  %s199_s3 = scalar_lea.vmem %s478_s1, %s311_s29 }
  0x1f   : > { %vm132_vm3 = vmand %vm131_vm1, %vm122_vm0  ;;  %vm142_vm5 = vcmp.eq.s32.totalorder %v121_v3, %v124_v4  ;;  %v146_v12 = vsel %vm145_vm4, 1.0, %v397_v11  ;;  %vm153_vm6 = vcmp.eq.s32.totalorder %v121_v3, 1  ;;  %vm163_vm7 = vcmp.eq.s32.totalorder %v121_v3, 2 }
  0x20   : > { %v147_v13 = vsel %vm142_vm5, %v146_v12, 0.0  ;;  %vm173_vm8 = vcmp.eq.s32.totalorder %v121_v3, 3 }
  0x25   : > { %v127_v5 = vld [vmem:[#allocation0] sm:$0xff] }
  0x26   : > { %v128_v6 = vsel %vm126_vm2, %v127_v5, 0.0  ;;  %v133_v7 = vsel %vm132_vm3, %v127_v5, 0.0 }
  0x27   : > { %129 = vadd.xlane.f32.xlu0 %v128_v6 }
  0xb4   : > { %v130_v8 = vpop.xlane.xlu0 %129 }
  0xb5   : > { %355 = vrcp.f32 %v130_v8  ;;  %vm180_vm9 = vweird.f32 %v130_v8 }
  0xbf   : > { %v356_v9 = vpop.eup %355 }
  0xc0   : > { %v135_v10 = vmul.f32 %v356_v9, %v133_v7 }
  0xc2   : > { %136 = vst [vmem:[#allocation4] sm:$0xff] %v135_v10 }
  0xc9   : > { %v149_v14 = vld [vmem:[#allocation4 + $0x1] ss:$0 sm:$0xff]  ;;  %v159_v17 = vld [vmem:[#allocation4 + $0x2] ss:$0 sm:$0xff]  ;;  %v169_v22 = vld [vmem:[#allocation4 + $0x3] ss:$0 sm:$0xff] }
  0xca   : > { %v150_v15 = vxor.u32 2147483648, %v149_v14  ;;  %v160_v19 = vxor.u32 2147483648, %v159_v17  ;;  %v170_v24 = vxor.u32 2147483648, %v169_v22 }
  0xcc   : > { %v154_v16 = vmul.f32 %v150_v15, %v147_v13 }
  0xce   : > { %155 = vadd.xlane.f32.xlu0 %v154_v16 }
 0x15b   : > { %v156_v18 = vpop.xlane.xlu0 %155 }
 0x15c   : > { %v157_v20 = vsel %vm153_vm6, %v156_v18, %v147_v13 }
 0x15d   : > { %v164_v21 = vmul.f32 %v160_v19, %v157_v20 }
 0x15f   : > { %165 = vadd.xlane.f32.xlu1 %v164_v21 }
 0x1ec   : > { %v166_v23 = vpop.xlane.xlu1 %165 }
 0x1ed   : > { %v167_v25 = vsel %vm163_vm7, %v166_v23, %v157_v20 }
 0x1ee   : > { %v174_v26 = vmul.f32 %v170_v24, %v167_v25 }
 0x1f0   : > { %175 = vadd.xlane.f32.xlu1 %v174_v26 }
 0x27d   : > { %v176_v27 = vpop.xlane.xlu1 %175 }
 0x27e   : > { %v177_v28 = vsel %vm173_vm8, %v176_v27, %v167_v25 }
 0x27f   : > { %v179_v29 = vmul.f32 %v356_v9, %v177_v28 }
 0x281   : > { %v181_v30 = vsel %vm180_vm9, %v177_v28, %v179_v29 }
 0x282   : > { %182 = vst [vmem:[#allocation2] sm:$0xff] %v181_v30 }
 0x289   : > { %v186_v31 = vld [vmem:[#allocation2] sm:$0xf] }
 0x28a   : > { %188 = vst [vmem:[%s115_s28] sm:$0xf] %v186_v31 }
 0x291   : > { %v215_v32 = vld [vmem:[%s115_s28] sm:$0xf] }
 0x292   : > { %216 = vst [vmem:[%s199_s3] sm:$0xf] %v215_v32 }
 0x293 PF: > { %s7_s10 = sadd.s32 1, %s395_s10   ;;  %s479_s6 = smov %s387_s8 }
 0x294   : > { %p4_p6 = scmp.ge.s32.totalorder %s7_s10, 6   ;;  %s480_s7 = smov %s391_s9 }
 0x295   : > { %s481_s8 = smov %s484_s12  ;;  %s482_s9 = smov %s488_s13 }
 0x296   :  { %6 = sbr.rel (!%p4_p6) target bundleno = 3 (0x3), region = 113 }

// kernel: custom-call.28
= control target key start
LH: loop header
LB: loop body
LE: loop exit
PB: predicated region body
PF: predicated region fallthrough
CT: control target
= control target key end

     0   :  { %s407_s6 = smov 0   ;;  %s409_s7 = smov 0   ;;  %s476_s0 = inlined_call_operand.vmem [shape: f32[2,2,1,4,4], index: 0, kind: input, shape index: {}]   ;;  %s477_s1 = inlined_call_operand.vmem [shape: f32[2,2,1,4,4], index: 1, kind: output, shape index: {}]  }
   0x1   :  { %s411_s8 = smov 0   ;;  %s413_s9 = smov 0  }
   0x2   :  { %s415_s10 = smov 0  }
   0x3 LB: > { %s299_s11 = sadd.s32 4294967295, %s394_s10   ;;  %s36_s12 = sadd.s32 1, %s386_s8  ;;  %s394_s10 = sphi %s415_s10, %s7_s10   ;;  %s390_s9 = sphi %s413_s9, %s481_s9   ;;  %s386_s8 = sphi %s411_s8, %s480_s8   ;;  %s382_s7 = sphi %s409_s7, %s479_s7   ;;  %s378_s6 = sphi %s407_s6, %s478_s6  }
   0x4   : > { %p38_p0 = scmp.ge.s32.totalorder %s36_s12, 2  ;;  %s40_s13 = sadd.s32 1, %s390_s9 }
   0x5   : > { %p301_p2 = scmp.ge.s32.totalorder %s394_s10, 4 }
   0x6   : > { %s483_s12 = smov (%p38_p0, %s36_s12), 0  ;;  %s485_s13 = smov (!%p38_p0, %s40_s13), %s390_s9 }
   0x7   : > { %p42_p1 = scmp.ge.s32.totalorder %s485_s13, 2  ;;  %54 = sbr.rel (%p301_p2) target bundleno = 15 (0xf), region = 16 }
   0x8   : > { %s56_s14 = sand.u32 (!%p301_p2), 1, %s394_s10   ;;  %s303_s15 = sshll.u32 (!%p301_p2), %s390_s9, 1 }
   0x9   : > { %s487_s13 = smov (%p42_p1, %s485_s13), 0  ;;  %s302_s16 = sshll.u32 (!%p301_p2), %s56_s14, 2 }
   0xa   : > { %s63_s17 = sadd.s32 (!%p301_p2), %s386_s8, %s303_s15  ;;  %s58_s22 = scalar_lea.vmem (!%p301_p2), [#allocation1], %s302_s16 }
   0xb   : > { %s304_s18 = sshll.u32 (!%p301_p2), %s63_s17, 2 }
   0xc   : > { %s65_s21 = scalar_lea.vmem (!%p301_p2), %s476_s0, %s304_s18 }
   0xd   : > { %v81_v0 = vld [vmem:[%s65_s21] sm:$0xf] (!%p301_p2) }
   0xe   : > { %82 = vst [vmem:[%s58_s22] sm:$0xf] %v81_v0 }
   0xf PF: > { %p305_p3 = scmp.ge.s32.totalorder %s394_s10, 1  ;;  %p98_p4 = scmp.lt.s32.totalorder %s394_s10, 5 }
  0x11   : > { %p99_p5 = pnand %p305_p3, %p98_p4 }
  0x13   : > { %102 = sbr.rel (%p99_p5) target bundleno = 659 (0x293), region = 50 }
  0x1a   : > { %s449_s23 = sand.u32 1, %s299_s11   ;;  %v120_v1 = vlaneseq  ;;  %v396_v11 = vmov -1.0   ;;  %s309_s26 = sshll.u32 %s382_s7, 1 }
  0x1b   : > { %s306_s24 = sshll.u32 %s449_s23, 2  ;;  %s196_s27 = sadd.s32 %s378_s6, %s309_s26 }
  0x1c   : > { %s111_s25 = scalar_lea.vmem [#allocation1], %s306_s24  ;;  %v121_v3 = vand.u32 127, %v120_v1  ;;  %v124_v4 = vshrl.u32 %v120_v1, 7  ;;  %s115_s28 = scalar_lea.vmem [#allocation3], %s306_s24 }
  0x1d   : > { %v118_v2 = vld [vmem:[%s111_s25] sm:$0xf]  ;;  %s310_s29 = sshll.u32 %s196_s27, 2 }
  0x1e   : > { %119 = vst [vmem:[#allocation0] sm:$0xf] %v118_v2  ;;  %vm122_vm0 = vcmp.lt.s32.totalorder %v121_v3, 4  ;;  %vm131_vm1 = vcmp.le.s32.totalorder %v124_v4, %v121_v3  ;;  %vm126_vm2 = vcmp.eq.s32.totalorder %v124_v4, %v121_v3  ;;  %vm145_vm4 = vcmp.eq.s32.totalorder %v121_v3, 3  ;;  %s198_s3 = scalar_lea.vmem %s477_s1, %s310_s29 }
  0x1f   : > { %vm132_vm3 = vmand %vm131_vm1, %vm122_vm0  ;;  %vm142_vm5 = vcmp.eq.s32.totalorder %v121_v3, %v124_v4  ;;  %v146_v12 = vsel %vm145_vm4, 1.0, %v396_v11  ;;  %vm153_vm6 = vcmp.eq.s32.totalorder %v121_v3, 2  ;;  %vm163_vm7 = vcmp.eq.s32.totalorder %v121_v3, 1 }
  0x20   : > { %v147_v13 = vsel %vm142_vm5, %v146_v12, 0.0  ;;  %vm172_vm8 = vcmp.eq.s32.totalorder %v121_v3, 0 }
  0x25   : > { %v127_v5 = vld [vmem:[#allocation0] sm:$0xff] }
  0x26   : > { %v128_v6 = vsel %vm126_vm2, %v127_v5, 0.0  ;;  %v133_v7 = vsel %vm132_vm3, %v127_v5, 0.0 }
  0x27   : > { %129 = vadd.xlane.f32.xlu0 %v128_v6 }
  0xb4   : > { %v130_v8 = vpop.xlane.xlu0 %129 }
  0xb5   : > { %354 = vrcp.f32 %v130_v8  ;;  %vm179_vm9 = vweird.f32 %v130_v8 }
  0xbf   : > { %v355_v9 = vpop.eup %354 }
  0xc0   : > { %v135_v10 = vmul.f32 %v355_v9, %v133_v7 }
  0xc2   : > { %136 = vst [vmem:[#allocation4] sm:$0xff] %v135_v10 }
  0xc9   : > { %v149_v14 = vld [vmem:[#allocation4 + $0x2] ss:$0 sm:$0xff]  ;;  %v159_v17 = vld [vmem:[#allocation4 + $0x1] ss:$0 sm:$0xff]  ;;  %v168_v22 = vld [vmem:[#allocation4] ss:$0 sm:$0xff] }
  0xca   : > { %v150_v15 = vxor.u32 2147483648, %v149_v14  ;;  %v160_v19 = vxor.u32 2147483648, %v159_v17  ;;  %v169_v24 = vxor.u32 2147483648, %v168_v22 }
  0xcc   : > { %v154_v16 = vmul.f32 %v150_v15, %v147_v13 }
  0xce   : > { %155 = vadd.xlane.f32.xlu0 %v154_v16 }
 0x15b   : > { %v156_v18 = vpop.xlane.xlu0 %155 }
 0x15c   : > { %v157_v20 = vsel %vm153_vm6, %v156_v18, %v147_v13 }
 0x15d   : > { %v164_v21 = vmul.f32 %v160_v19, %v157_v20 }
 0x15f   : > { %165 = vadd.xlane.f32.xlu1 %v164_v21 }
 0x1ec   : > { %v166_v23 = vpop.xlane.xlu1 %165 }
 0x1ed   : > { %v167_v25 = vsel %vm163_vm7, %v166_v23, %v157_v20 }
 0x1ee   : > { %v173_v26 = vmul.f32 %v169_v24, %v167_v25 }
 0x1f0   : > { %174 = vadd.xlane.f32.xlu1 %v173_v26 }
 0x27d   : > { %v175_v27 = vpop.xlane.xlu1 %174 }
 0x27e   : > { %v176_v28 = vsel %vm172_vm8, %v175_v27, %v167_v25 }
 0x27f   : > { %v178_v29 = vmul.f32 %v355_v9, %v176_v28 }
 0x281   : > { %v180_v30 = vsel %vm179_vm9, %v176_v28, %v178_v29 }
 0x282   : > { %181 = vst [vmem:[#allocation2] sm:$0xff] %v180_v30 }
 0x289   : > { %v185_v31 = vld [vmem:[#allocation2] sm:$0xf] }
 0x28a   : > { %187 = vst [vmem:[%s115_s28] sm:$0xf] %v185_v31 }
 0x291   : > { %v214_v32 = vld [vmem:[%s115_s28] sm:$0xf] }
 0x292   : > { %215 = vst [vmem:[%s198_s3] sm:$0xf] %v214_v32 }
 0x293 PF: > { %s7_s10 = sadd.s32 1, %s394_s10   ;;  %s478_s6 = smov %s386_s8 }
 0x294   : > { %p4_p6 = scmp.ge.s32.totalorder %s7_s10, 6   ;;  %s479_s7 = smov %s390_s9 }
 0x295   : > { %s480_s8 = smov %s483_s12  ;;  %s481_s9 = smov %s487_s13 }
 0x296   :  { %6 = sbr.rel (!%p4_p6) target bundleno = 3 (0x3), region = 112 }

// kernel: tile.18
= control target key start
LH: loop header
LB: loop body
LE: loop exit
PB: predicated region body
PF: predicated region fallthrough
CT: control target
= control target key end

     0   :  { %s22_s0 = inlined_call_operand.vmem [shape: f32[16], index: 0, kind: input, shape index: {}]   ;;  %s23_s1 = inlined_call_operand.vmem [shape: f32[8,16], index: 1, kind: output, shape index: {}]  }
   0x1   :  { %v4_v0 = vld [vmem:[%s22_s0] ss:$0 sm:$0xff] }
   0x2   :  { %5 = vst [vmem:[%s23_s1] sm:$0xff] %v4_v0 }

// kernel: tile.19
= control target key start
LH: loop header
LB: loop body
LE: loop exit
PB: predicated region body
PF: predicated region fallthrough
CT: control target
= control target key end

     0   :  { %s67_s10 = smov 112   ;;  %s68_s11 = smov 80   ;;  %vm3_vm0 = vcmask 130048   ;;  %vm9_vm1 = vcmask 1048448   ;;  %vm15_vm2 = vcmask 917248   ;;  %vm21_vm3 = vcmask 786048   ;;  %s111_s0 = inlined_call_operand.vmem [shape: f32[8,16], index: 0, kind: input, shape index: {}]   ;;  %s112_s1 = inlined_call_operand.vmem [shape: f32[1,128], index: 1, kind: output, shape index: {}]  }
   0x1   :  { %v53_v0 = vld [vmem:[%s111_s0 + $0x7] sm:$0x1]   ;;  %v55_v1 = vld [vmem:[%s111_s0 + $0x5] sm:$0x1]   ;;  %v54_v2 = vld [vmem:[%s111_s0 + $0x6] sm:$0x1]  }
   0x2   :  { %7 = vrot.lane.b32.xlu0 %v53_v0, %s67_s10  ;;  %19 = vrot.lane.b32.xlu1 %v55_v1, %s68_s11  ;;  %v56_v3 = vld [vmem:[%s111_s0 + $0x4] sm:$0x1]   ;;  %v2_v4 = vld [vmem:[%s111_s0] sm:$0x1]   ;;  %s69_s18 = smov 96   ;;  %s70_s19 = smov 64  }
   0x3   :  { %4 = vst.msk [vmem:[#allocation0] sm:$0x1] %vm3_vm0, %v2_v4   ;;  %v57_v5 = vld [vmem:[%s111_s0 + $0x3] sm:$0x1]   ;;  %v58_v6 = vld [vmem:[%s111_s0 + $0x2] sm:$0x1]  }
   0x4   :  { %s71_s24 = smov 48   ;;  %s72_s25 = smov 32   ;;  %v59_v7 = vld [vmem:[%s111_s0 + $0x1] sm:$0x1]   ;;  %vm27_vm4 = vcmask 654848   ;;  %vm33_vm5 = vcmask 523648  }
   0x5   :  { %s73_s0 = smov 16   ;;  %vm39_vm6 = vcmask 392448   ;;  %vm45_vm7 = vcmask 261248  }
   0x6   :  { %13 = vrot.lane.b32.xlu0 %v54_v2, %s69_s18  ;;  %25 = vrot.lane.b32.xlu1 %v56_v3, %s70_s19 }
   0xa   :  { %31 = vrot.lane.b32.xlu0 %v57_v5, %s71_s24  ;;  %37 = vrot.lane.b32.xlu1 %v58_v6, %s72_s25 }
   0xe   :  { %43 = vrot.lane.b32.xlu0 %v59_v7, %s73_s0 }
  0x74   :  { %v8_v8 = vpop.permute.xlu0 %7   ;;  %v20_v9 = vpop.permute.xlu1 %19  }
  0x75   :  { %10 = vst.msk [vmem:[#allocation0] sm:$0x1] %vm9_vm1, %v8_v8  }
  0x78   :  { %v14_v10 = vpop.permute.xlu0 %13   ;;  %v26_v11 = vpop.permute.xlu1 %25  }
  0x79   :  { %16 = vst.msk [vmem:[#allocation0] sm:$0x1] %vm15_vm2, %v14_v10  }
  0x7a   :  { %22 = vst.msk [vmem:[#allocation0] sm:$0x1] %vm21_vm3, %v20_v9  }
  0x7b   :  { %28 = vst.msk [vmem:[#allocation0] sm:$0x1] %vm27_vm4, %v26_v11  }
  0x7c   :  { %v32_v12 = vpop.permute.xlu0 %31   ;;  %v38_v13 = vpop.permute.xlu1 %37  }
  0x7d   :  { %34 = vst.msk [vmem:[#allocation0] sm:$0x1] %vm33_vm5, %v32_v12  }
  0x7e   :  { %40 = vst.msk [vmem:[#allocation0] sm:$0x1] %vm39_vm6, %v38_v13  }
  0x80   :  { %v44_v14 = vpop.permute.xlu0 %43  }
  0x81   :  { %46 = vst.msk [vmem:[#allocation0] sm:$0x1] %vm45_vm7, %v44_v14  }
  0x88   :  { %v50_v15 = vld [vmem:[#allocation0] sm:$0x1] }
  0x89   :  { %52 = vst [vmem:[%s112_s1] sm:$0x1] %v50_v15 }

// kernel: _lambda_.3
= control target key start
LH: loop header
LB: loop body
LE: loop exit
PB: predicated region body
PF: predicated region fallthrough
CT: control target
= control target key end

     0   :  { %s2769_s27 = smov 0   ;;  %s3546_s0 = inlined_call_operand.vmem [shape: f32[1024,4], index: 0, kind: input, shape index: {}]   ;;  %s3547_s1 = inlined_call_operand.vmem [shape: f32[4,32], index: 1, kind: input, shape index: {}]   ;;  %s3548_s2 = inlined_call_operand.vmem [shape: f32[1,32], index: 2, kind: input, shape index: {}]   ;;  %s3549_s3 = inlined_call_operand.vmem [shape: f32[32,8], index: 3, kind: input, shape index: {}]   ;;  %s3550_s4 = inlined_call_operand.vmem [shape: f32[1,8], index: 4, kind: input, shape index: {}]   ;;  %s3551_s5 = inlined_call_operand.vmem [shape: f32[32,128], index: 5, kind: input, shape index: {}]   ;;  %s3552_s6 = inlined_call_operand.vmem [shape: f32[1,128], index: 6, kind: input, shape index: {}]   ;;  %s3553_s7 = inlined_call_operand.vmem [shape: f32[8,128], index: 7, kind: input, shape index: {}]   ;;  %s3554_s8 = inlined_call_operand.vmem [shape: f32[1024,128], index: 8, kind: output, shape index: {}]  }
   0x1 LB: > { %s2071_s28 = sadd.s32 4294967295, %s2722_s27   ;;  %p2075_p0 = scmp.ge.s32.totalorder %s2722_s27, 1  ;;  %s2722_s27 = sphi %s2769_s27, %s18_s27  }
   0x2   : > { %p263_p1 = scmp.lt.s32.totalorder %s2722_s27, 5 }
   0x4   : > { %p264_p2 = pnand %p2075_p0, %p263_p1 }
   0x6   : > { %267 = sbr.rel (%p264_p2) target bundleno = 1049 (0x419), region = 52 }
   0xd   : > { %v341_v0 = vld [vmem:[%s3547_s1] sm:$0xf]  ;;  %vm446_vm0 = vcmask 1043456   ;;  %s2076_s9 = sshll.u32 %s2071_s28, 5  ;;  %v708_v2 = vld [vmem:[%s3549_s3 + $0x8] sm:$0xff]  ;;  %vm349_vm1 = vcmask 31744  }
   0xe   : > { %v707_v1 = vld [vmem:[%s3549_s3] sm:$0xff]  ;;  %2352 = vmatprep.subr.msk.mxu0 %vm446_vm0, %v341_v0  ;;  %p298_p3 = scmp.lt.s32.totalorder %s2076_s9, 127  ;;  %v1041_v4 = vld [vmem:[%s3551_s5 + $0x8] sm:$0xff]  ;;  %v709_v39 = vld [vmem:[%s3549_s3 + $0x10] sm:$0xff]  ;;  %vm718_vm2 = vcmask 261120   ;;  %vm1276_vm3 = vcmask 64512  }
   0xf   : > { %v1040_v3 = vld [vmem:[%s3551_s5] sm:$0xff]  ;;  %2353 = vmatpush3.msk.msra.mxu0 %vm446_vm0, %v341_v0  ;;  %v2564_v5 = vpack.c.bf16 %v708_v2, %v707_v1  ;;  %v710_v40 = vld [vmem:[%s3549_s3 + $0x18] sm:$0xff]  ;;  %v1042_v42 = vld [vmem:[%s3551_s5 + $0x10] sm:$0xff] }
  0x10   : > { %v2572_v6 = vpack.c.bf16 %v1041_v4, %v1040_v3  ;;  %s3584_s9 = smov (!%p298_p3, %s2076_s9), 127  ;;  %v2568_v41 = vpack.c.bf16 %v710_v40, %v709_v39  ;;  %v1043_v43 = vld [vmem:[%s3551_s5 + $0x18] sm:$0xff]  ;;  %v2881_v45 = vld [vmem:[%s3548_s2] ss:$0 sm:$0xff] }
  0x11   : > { %2565 = vmatprep.subr.bf16.mxu1 %v2564_v5  ;;  %s2077_s18 = sshll.u32 %s3584_s9, 3  ;;  %v2576_v44 = vpack.c.bf16 %v1043_v43, %v1042_v42 }
  0x12   : > { %2573 = vmatprep.subr.bf16.mxu0 %v2572_v6  ;;  %2567 = vmatpush3.bf16.msra.mxu1 %v2564_v5  ;;  %s2800_s21 = scalar_lea.vmem %s3546_s0, %s2077_s18 }
  0x13   : > { %v309_v7 = vld [vmem:[%s2800_s21] sm:$0xff]  ;;  %v310_v8 = vld [vmem:[%s2800_s21 + $0x8] sm:$0xff]  ;;  %v311_v9 = vld [vmem:[%s2800_s21 + $0x10] sm:$0xff]  ;;  %2569 = vmatprep.subr.bf16.mxu1 %v2568_v41 }
  0x14   : > { %2354 = vmatprep.mubr.msk.f32.mxu0 %vm349_vm1, %v309_v7  ;;  %v312_v10 = vld [vmem:[%s2800_s21 + $0x18] sm:$0xff]  ;;  %v313_v11 = vld [vmem:[%s2800_s21 + $0x20] sm:$0xff]  ;;  %v314_v12 = vld [vmem:[%s2800_s21 + $0x28] sm:$0xff] }
  0x15   : > { %2355 = vmatmul.mubr.msk.f32.vlgmr.msra.gmra.mrb[0].mxu0 %vm349_vm1, %v310_v8  ;;  %v315_v13 = vld [vmem:[%s2800_s21 + $0x30] sm:$0xff]  ;;  %v316_v14 = vld [vmem:[%s2800_s21 + $0x38] sm:$0xff]  ;;  %v317_v15 = vld [vmem:[%s2800_s21 + $0x40] sm:$0xff] }
  0x16   : > { %2357 = vmatprep.mubr.msk.f32.mxu0 %vm349_vm1, %v311_v9  ;;  %2575 = vmatpush3.bf16.msra.mxu0 %v2572_v6  ;;  %v318_v16 = vld [vmem:[%s2800_s21 + $0x48] sm:$0xff]  ;;  %v319_v17 = vld [vmem:[%s2800_s21 + $0x50] sm:$0xff]  ;;  %v320_v18 = vld [vmem:[%s2800_s21 + $0x58] sm:$0xff] }
  0x17   : > { %v321_v19 = vld [vmem:[%s2800_s21 + $0x60] sm:$0xff]  ;;  %v322_v20 = vld [vmem:[%s2800_s21 + $0x68] sm:$0xff]  ;;  %v323_v21 = vld [vmem:[%s2800_s21 + $0x70] sm:$0xff]  ;;  %2577 = vmatprep.subr.bf16.mxu0 %v2576_v44  ;;  %2571 = vmatpush3.bf16.msra.mxu1 %v2568_v41 }
  0x18   : > { %v324_v22 = vld [vmem:[%s2800_s21 + $0x78] sm:$0xff]  ;;  %v325_v23 = vld [vmem:[%s2800_s21 + $0x80] sm:$0xff]  ;;  %v326_v24 = vld [vmem:[%s2800_s21 + $0x88] sm:$0xff] }
  0x19   : > { %2358 = vmatmul.mubr.msk.f32.gmra.mrb[2].mxu0 %vm349_vm1, %v312_v10  ;;  %v327_v25 = vld [vmem:[%s2800_s21 + $0x90] sm:$0xff]  ;;  %v328_v26 = vld [vmem:[%s2800_s21 + $0x98] sm:$0xff]  ;;  %v329_v27 = vld [vmem:[%s2800_s21 + $0xa0] sm:$0xff] }
  0x1a   : > { %2360 = vmatprep.mubr.msk.f32.mxu0 %vm349_vm1, %v313_v11  ;;  %v330_v28 = vld [vmem:[%s2800_s21 + $0xa8] sm:$0xff]  ;;  %v331_v29 = vld [vmem:[%s2800_s21 + $0xb0] sm:$0xff]  ;;  %v332_v30 = vld [vmem:[%s2800_s21 + $0xb8] sm:$0xff]  ;;  %2579 = vmatpush3.bf16.msra.mxu0 %v2576_v44 }
  0x1b   : > { %v333_v31 = vld [vmem:[%s2800_s21 + $0xc0] sm:$0xff]  ;;  %v334_v32 = vld [vmem:[%s2800_s21 + $0xc8] sm:$0xff]  ;;  %v335_v33 = vld [vmem:[%s2800_s21 + $0xd0] sm:$0xff] }
  0x1c   : > { %v336_v34 = vld [vmem:[%s2800_s21 + $0xd8] sm:$0xff]  ;;  %v337_v35 = vld [vmem:[%s2800_s21 + $0xe0] sm:$0xff]  ;;  %v338_v36 = vld [vmem:[%s2800_s21 + $0xe8] sm:$0xff] }
  0x1d   : > { %2361 = vmatmul.mubr.msk.f32.gmra.mrb[4].mxu0 %vm349_vm1, %v314_v12  ;;  %v339_v37 = vld [vmem:[%s2800_s21 + $0xf0] sm:$0xff]  ;;  %v340_v38 = vld [vmem:[%s2800_s21 + $0xf8] sm:$0xff]  ;;  %s3449_s21 = scalar_lea.vmem %s3554_s8, %s2077_s18 }
  0x1e   : > { %2363 = vmatprep.mubr.msk.f32.mxu0 %vm349_vm1, %v315_v13 }
  0x21   : > { %2364 = vmatmul.mubr.msk.f32.gmra.mrb[6].mxu0 %vm349_vm1, %v316_v14 }
  0x22   : > { %2366 = vmatprep.mubr.msk.f32.mxu0 %vm349_vm1, %v317_v15 }
  0x25   : > { %2367 = vmatmul.mubr.msk.f32.gmra.mrb[8].mxu0 %vm349_vm1, %v318_v16 }
  0x26   : > { %2369 = vmatprep.mubr.msk.f32.mxu0 %vm349_vm1, %v319_v17 }
  0x29   : > { %2370 = vmatmul.mubr.msk.f32.gmra.mrb[10].mxu0 %vm349_vm1, %v320_v18 }
  0x2a   : > { %2372 = vmatprep.mubr.msk.f32.mxu0 %vm349_vm1, %v321_v19 }
  0x2d   : > { %2373 = vmatmul.mubr.msk.f32.gmra.mrb[12].mxu0 %vm349_vm1, %v322_v20 }
  0x2e   : > { %2375 = vmatprep.mubr.msk.f32.mxu0 %vm349_vm1, %v323_v21 }
  0x31   : > { %2376 = vmatmul.mubr.msk.f32.gmra.mrb[14].mxu0 %vm349_vm1, %v324_v22 }
  0x32   : > { %2378 = vmatprep.mubr.msk.f32.mxu0 %vm349_vm1, %v325_v23 }
  0x35   : > { %2379 = vmatmul.mubr.msk.f32.gmra.mrb[16].mxu0 %vm349_vm1, %v326_v24 }
  0x36   : > { %2381 = vmatprep.mubr.msk.f32.mxu0 %vm349_vm1, %v327_v25 }
  0x39   : > { %2382 = vmatmul.mubr.msk.f32.gmra.mrb[18].mxu0 %vm349_vm1, %v328_v26 }
  0x3a   : > { %2384 = vmatprep.mubr.msk.f32.mxu0 %vm349_vm1, %v329_v27 }
  0x3d   : > { %2385 = vmatmul.mubr.msk.f32.gmra.mrb[20].mxu0 %vm349_vm1, %v330_v28 }
  0x3e   : > { %2387 = vmatprep.mubr.msk.f32.mxu0 %vm349_vm1, %v331_v29 }
  0x41   : > { %2388 = vmatmul.mubr.msk.f32.gmra.mrb[22].mxu0 %vm349_vm1, %v332_v30 }
  0x42   : > { %2390 = vmatprep.mubr.msk.f32.mxu0 %vm349_vm1, %v333_v31 }
  0x45   : > { %2391 = vmatmul.mubr.msk.f32.gmra.mrb[24].mxu0 %vm349_vm1, %v334_v32 }
  0x46   : > { %2393 = vmatprep.mubr.msk.f32.mxu0 %vm349_vm1, %v335_v33 }
  0x49   : > { %2394 = vmatmul.mubr.msk.f32.gmra.mrb[26].mxu0 %vm349_vm1, %v336_v34 }
  0x4a   : > { %2396 = vmatprep.mubr.msk.f32.mxu0 %vm349_vm1, %v337_v35 }
  0x4d   : > { %2397 = vmatmul.mubr.msk.f32.gmra.mrb[28].mxu0 %vm349_vm1, %v338_v36 }
  0x4e   : > { %2399 = vmatprep.mubr.msk.f32.mxu0 %vm349_vm1, %v339_v37 }
  0x51   : > { %2400 = vmatmul.mubr.msk.f32.gmra.mrb[30].mxu0 %vm349_vm1, %v340_v38 }
  0xe8   : > { %v2356_v46 = vpop.f32.mrb[0].mxu0 }
  0xe9   : > { %v522_v47 = vadd.f32 %v2356_v46, %v2881_v45  ;;  %v516_v48 = vpop.f32.mrb[1].mxu0 }
  0xea   : > { %v517_v49 = vadd.f32 %v2881_v45, %v516_v48 }
  0xeb   : > { %v676_v52 = vmax.f32 %v522_v47, 0.0 }
  0xec   : > { %v675_v50 = vmax.f32 %v517_v49, 0.0  ;;  %v2359_v51 = vpop.f32.mrb[2].mxu0 }
  0xed   : > { %v532_v53 = vadd.f32 %v2359_v51, %v2881_v45  ;;  %v526_v54 = vpop.f32.mrb[3].mxu0 }
  0xee   : > { %v527_v55 = vadd.f32 %v2881_v45, %v526_v54  ;;  %2410 = vmatprep.mubr.msk.f32.mxu1 %vm718_vm2, %v675_v50  ;;  %2466 = vmatprep.mubr.msk.f32.mxu0 %vm718_vm2, %v675_v50 }
  0xef   : > { %2411 = vmatmul.mubr.msk.f32.vlgmr.msra.gmra.mrb[0].mxu1 %vm718_vm2, %v676_v52  ;;  %2467 = vmatmul.mubr.msk.f32.vlgmr.msra.gmra.mrb[32].mxu0 %vm718_vm2, %v676_v52  ;;  %v678_v58 = vmax.f32 %v532_v53, 0.0 }
  0xf0   : > { %v677_v56 = vmax.f32 %v527_v55, 0.0  ;;  %v2362_v57 = vpop.f32.mrb[4].mxu0 }
  0xf1   : > { %v542_v59 = vadd.f32 %v2362_v57, %v2881_v45  ;;  %v536_v60 = vpop.f32.mrb[5].mxu0 }
  0xf2   : > { %v537_v61 = vadd.f32 %v2881_v45, %v536_v60  ;;  %2413 = vmatprep.mubr.msk.f32.mxu1 %vm718_vm2, %v677_v56  ;;  %2469 = vmatprep.mubr.msk.f32.mxu0 %vm718_vm2, %v677_v56 }
  0xf3   : > { %v680_v62 = vmax.f32 %v542_v59, 0.0  ;;  %2414 = vmatmul.mubr.msk.f32.gmra.mrb[2].mxu1 %vm718_vm2, %v678_v58  ;;  %2470 = vmatmul.mubr.msk.f32.gmra.mrb[34].mxu0 %vm718_vm2, %v678_v58 }
  0xf4   : > { %v679_v63 = vmax.f32 %v537_v61, 0.0  ;;  %v2365_v0 = vpop.f32.mrb[6].mxu0 }
  0xf5   : > { %v552_v1 = vadd.f32 %v2365_v0, %v2881_v45  ;;  %v546_v2 = vpop.f32.mrb[7].mxu0 }
  0xf6   : > { %v547_v3 = vadd.f32 %v2881_v45, %v546_v2  ;;  %2416 = vmatprep.mubr.msk.f32.mxu1 %vm718_vm2, %v679_v63  ;;  %2472 = vmatprep.mubr.msk.f32.mxu0 %vm718_vm2, %v679_v63 }
  0xf7   : > { %v682_v4 = vmax.f32 %v552_v1, 0.0  ;;  %2417 = vmatmul.mubr.msk.f32.gmra.mrb[4].mxu1 %vm718_vm2, %v680_v62  ;;  %2473 = vmatmul.mubr.msk.f32.gmra.mrb[36].mxu0 %vm718_vm2, %v680_v62 }
  0xf8   : > { %v681_v5 = vmax.f32 %v547_v3, 0.0  ;;  %v2368_v6 = vpop.f32.mrb[8].mxu0 }
  0xf9   : > { %v562_v7 = vadd.f32 %v2368_v6, %v2881_v45  ;;  %v556_v8 = vpop.f32.mrb[9].mxu0 }
  0xfa   : > { %v557_v9 = vadd.f32 %v2881_v45, %v556_v8  ;;  %2419 = vmatprep.mubr.msk.f32.mxu1 %vm718_vm2, %v681_v5  ;;  %2475 = vmatprep.mubr.msk.f32.mxu0 %vm718_vm2, %v681_v5 }
  0xfb   : > { %v684_v10 = vmax.f32 %v562_v7, 0.0  ;;  %2420 = vmatmul.mubr.msk.f32.gmra.mrb[6].mxu1 %vm718_vm2, %v682_v4  ;;  %2476 = vmatmul.mubr.msk.f32.gmra.mrb[38].mxu0 %vm718_vm2, %v682_v4 }
  0xfc   : > { %v683_v11 = vmax.f32 %v557_v9, 0.0  ;;  %v2371_v12 = vpop.f32.mrb[10].mxu0 }
  0xfd   : > { %v572_v13 = vadd.f32 %v2371_v12, %v2881_v45  ;;  %v566_v14 = vpop.f32.mrb[11].mxu0 }
  0xfe   : > { %v567_v15 = vadd.f32 %v2881_v45, %v566_v14  ;;  %2422 = vmatprep.mubr.msk.f32.mxu1 %vm718_vm2, %v683_v11  ;;  %2478 = vmatprep.mubr.msk.f32.mxu0 %vm718_vm2, %v683_v11 }
  0xff   : > { %v686_v16 = vmax.f32 %v572_v13, 0.0  ;;  %2423 = vmatmul.mubr.msk.f32.gmra.mrb[8].mxu1 %vm718_vm2, %v684_v10  ;;  %2479 = vmatmul.mubr.msk.f32.gmra.mrb[40].mxu0 %vm718_vm2, %v684_v10 }
 0x100   : > { %v685_v17 = vmax.f32 %v567_v15, 0.0  ;;  %v2374_v18 = vpop.f32.mrb[12].mxu0 }
 0x101   : > { %v582_v19 = vadd.f32 %v2374_v18, %v2881_v45  ;;  %v576_v20 = vpop.f32.mrb[13].mxu0 }
 0x102   : > { %v577_v21 = vadd.f32 %v2881_v45, %v576_v20  ;;  %2425 = vmatprep.mubr.msk.f32.mxu1 %vm718_vm2, %v685_v17  ;;  %2481 = vmatprep.mubr.msk.f32.mxu0 %vm718_vm2, %v685_v17 }
 0x103   : > { %v688_v22 = vmax.f32 %v582_v19, 0.0  ;;  %2426 = vmatmul.mubr.msk.f32.gmra.mrb[10].mxu1 %vm718_vm2, %v686_v16  ;;  %2482 = vmatmul.mubr.msk.f32.gmra.mrb[42].mxu0 %vm718_vm2, %v686_v16 }
 0x104   : > { %v687_v23 = vmax.f32 %v577_v21, 0.0  ;;  %v2377_v24 = vpop.f32.mrb[14].mxu0 }
 0x105   : > { %v592_v25 = vadd.f32 %v2377_v24, %v2881_v45  ;;  %v586_v26 = vpop.f32.mrb[15].mxu0 }
 0x106   : > { %v587_v27 = vadd.f32 %v2881_v45, %v586_v26  ;;  %2428 = vmatprep.mubr.msk.f32.mxu1 %vm718_vm2, %v687_v23  ;;  %2484 = vmatprep.mubr.msk.f32.mxu0 %vm718_vm2, %v687_v23 }
 0x107   : > { %v690_v28 = vmax.f32 %v592_v25, 0.0  ;;  %2429 = vmatmul.mubr.msk.f32.gmra.mrb[12].mxu1 %vm718_vm2, %v688_v22  ;;  %2485 = vmatmul.mubr.msk.f32.gmra.mrb[44].mxu0 %vm718_vm2, %v688_v22 }
 0x108   : > { %v689_v29 = vmax.f32 %v587_v27, 0.0  ;;  %v2380_v30 = vpop.f32.mrb[16].mxu0 }
 0x109   : > { %v602_v31 = vadd.f32 %v2380_v30, %v2881_v45  ;;  %v596_v32 = vpop.f32.mrb[17].mxu0 }
 0x10a   : > { %v597_v33 = vadd.f32 %v2881_v45, %v596_v32  ;;  %2431 = vmatprep.mubr.msk.f32.mxu1 %vm718_vm2, %v689_v29  ;;  %2487 = vmatprep.mubr.msk.f32.mxu0 %vm718_vm2, %v689_v29 }
 0x10b   : > { %v692_v34 = vmax.f32 %v602_v31, 0.0  ;;  %2432 = vmatmul.mubr.msk.f32.gmra.mrb[14].mxu1 %vm718_vm2, %v690_v28  ;;  %2488 = vmatmul.mubr.msk.f32.gmra.mrb[46].mxu0 %vm718_vm2, %v690_v28 }
 0x10c   : > { %v691_v35 = vmax.f32 %v597_v33, 0.0  ;;  %v2383_v36 = vpop.f32.mrb[18].mxu0 }
 0x10d   : > { %v612_v37 = vadd.f32 %v2383_v36, %v2881_v45  ;;  %v606_v38 = vpop.f32.mrb[19].mxu0 }
 0x10e   : > { %v607_v39 = vadd.f32 %v2881_v45, %v606_v38  ;;  %2434 = vmatprep.mubr.msk.f32.mxu1 %vm718_vm2, %v691_v35  ;;  %2490 = vmatprep.mubr.msk.f32.mxu0 %vm718_vm2, %v691_v35 }
 0x10f   : > { %v694_v40 = vmax.f32 %v612_v37, 0.0  ;;  %2435 = vmatmul.mubr.msk.f32.gmra.mrb[16].mxu1 %vm718_vm2, %v692_v34  ;;  %2491 = vmatmul.mubr.msk.f32.gmra.mrb[48].mxu0 %vm718_vm2, %v692_v34 }
 0x110   : > { %v693_v41 = vmax.f32 %v607_v39, 0.0  ;;  %v2386_v42 = vpop.f32.mrb[20].mxu0 }
 0x111   : > { %v622_v43 = vadd.f32 %v2386_v42, %v2881_v45  ;;  %v616_v44 = vpop.f32.mrb[21].mxu0 }
 0x112   : > { %v617_v46 = vadd.f32 %v2881_v45, %v616_v44  ;;  %2437 = vmatprep.mubr.msk.f32.mxu1 %vm718_vm2, %v693_v41  ;;  %2493 = vmatprep.mubr.msk.f32.mxu0 %vm718_vm2, %v693_v41 }
 0x113   : > { %v696_v47 = vmax.f32 %v622_v43, 0.0  ;;  %2438 = vmatmul.mubr.msk.f32.gmra.mrb[18].mxu1 %vm718_vm2, %v694_v40  ;;  %2494 = vmatmul.mubr.msk.f32.gmra.mrb[50].mxu0 %vm718_vm2, %v694_v40 }
 0x114   : > { %v695_v48 = vmax.f32 %v617_v46, 0.0  ;;  %v2389_v49 = vpop.f32.mrb[22].mxu0 }
 0x115   : > { %v632_v50 = vadd.f32 %v2389_v49, %v2881_v45  ;;  %v626_v51 = vpop.f32.mrb[23].mxu0 }
 0x116   : > { %v627_v52 = vadd.f32 %v2881_v45, %v626_v51  ;;  %2440 = vmatprep.mubr.msk.f32.mxu1 %vm718_vm2, %v695_v48  ;;  %2496 = vmatprep.mubr.msk.f32.mxu0 %vm718_vm2, %v695_v48 }
 0x117   : > { %v698_v53 = vmax.f32 %v632_v50, 0.0  ;;  %2441 = vmatmul.mubr.msk.f32.gmra.mrb[20].mxu1 %vm718_vm2, %v696_v47  ;;  %2497 = vmatmul.mubr.msk.f32.gmra.mrb[52].mxu0 %vm718_vm2, %v696_v47 }
 0x118   : > { %v697_v54 = vmax.f32 %v627_v52, 0.0  ;;  %v2392_v55 = vpop.f32.mrb[24].mxu0 }
 0x119   : > { %v642_v56 = vadd.f32 %v2392_v55, %v2881_v45  ;;  %v636_v57 = vpop.f32.mrb[25].mxu0 }
 0x11a   : > { %v637_v58 = vadd.f32 %v2881_v45, %v636_v57  ;;  %2443 = vmatprep.mubr.msk.f32.mxu1 %vm718_vm2, %v697_v54  ;;  %2499 = vmatprep.mubr.msk.f32.mxu0 %vm718_vm2, %v697_v54 }
 0x11b   : > { %v700_v59 = vmax.f32 %v642_v56, 0.0  ;;  %2444 = vmatmul.mubr.msk.f32.gmra.mrb[22].mxu1 %vm718_vm2, %v698_v53  ;;  %2500 = vmatmul.mubr.msk.f32.gmra.mrb[54].mxu0 %vm718_vm2, %v698_v53 }
 0x11c   : > { %v699_v60 = vmax.f32 %v637_v58, 0.0  ;;  %v2395_v61 = vpop.f32.mrb[26].mxu0 }
 0x11d   : > { %v652_v62 = vadd.f32 %v2395_v61, %v2881_v45  ;;  %v646_v63 = vpop.f32.mrb[27].mxu0 }
 0x11e   : > { %v647_v0 = vadd.f32 %v2881_v45, %v646_v63  ;;  %2446 = vmatprep.mubr.msk.f32.mxu1 %vm718_vm2, %v699_v60  ;;  %2502 = vmatprep.mubr.msk.f32.mxu0 %vm718_vm2, %v699_v60 }
 0x11f   : > { %v702_v1 = vmax.f32 %v652_v62, 0.0  ;;  %2447 = vmatmul.mubr.msk.f32.gmra.mrb[24].mxu1 %vm718_vm2, %v700_v59  ;;  %2503 = vmatmul.mubr.msk.f32.gmra.mrb[56].mxu0 %vm718_vm2, %v700_v59 }
 0x120   : > { %v701_v2 = vmax.f32 %v647_v0, 0.0  ;;  %v2398_v3 = vpop.f32.mrb[28].mxu0 }
 0x121   : > { %v662_v4 = vadd.f32 %v2398_v3, %v2881_v45  ;;  %v656_v5 = vpop.f32.mrb[29].mxu0 }
 0x122   : > { %v657_v6 = vadd.f32 %v2881_v45, %v656_v5  ;;  %2449 = vmatprep.mubr.msk.f32.mxu1 %vm718_vm2, %v701_v2  ;;  %2505 = vmatprep.mubr.msk.f32.mxu0 %vm718_vm2, %v701_v2 }
 0x123   : > { %v704_v7 = vmax.f32 %v662_v4, 0.0  ;;  %2450 = vmatmul.mubr.msk.f32.gmra.mrb[26].mxu1 %vm718_vm2, %v702_v1  ;;  %2506 = vmatmul.mubr.msk.f32.gmra.mrb[58].mxu0 %vm718_vm2, %v702_v1 }
 0x124   : > { %v703_v8 = vmax.f32 %v657_v6, 0.0  ;;  %v2401_v9 = vpop.f32.mrb[30].mxu0 }
 0x125   : > { %v672_v10 = vadd.f32 %v2401_v9, %v2881_v45  ;;  %v666_v11 = vpop.f32.mrb[31].mxu0 }
 0x126   : > { %v667_v12 = vadd.f32 %v2881_v45, %v666_v11  ;;  %2452 = vmatprep.mubr.msk.f32.mxu1 %vm718_vm2, %v703_v8  ;;  %2508 = vmatprep.mubr.msk.f32.mxu0 %vm718_vm2, %v703_v8  ;;  %v2982_v45 = vld [vmem:[%s3550_s4] ss:$0 sm:$0xff] }
 0x127   : > { %v706_v13 = vmax.f32 %v672_v10, 0.0  ;;  %2453 = vmatmul.mubr.msk.f32.gmra.mrb[28].mxu1 %vm718_vm2, %v704_v7  ;;  %2509 = vmatmul.mubr.msk.f32.gmra.mrb[60].mxu0 %vm718_vm2, %v704_v7 }
 0x128   : > { %v705_v14 = vmax.f32 %v667_v12, 0.0 }
 0x12a   : > { %2455 = vmatprep.mubr.msk.f32.mxu1 %vm718_vm2, %v705_v14  ;;  %2511 = vmatprep.mubr.msk.f32.mxu0 %vm718_vm2, %v705_v14 }
 0x12b   : > { %2456 = vmatmul.mubr.msk.f32.gmra.mrb[30].mxu1 %vm718_vm2, %v706_v13  ;;  %2512 = vmatmul.mubr.msk.f32.gmra.mrb[62].mxu0 %vm718_vm2, %v706_v13 }
 0x1c2   : > { %v2412_v15 = vpop.f32.mrb[0].mxu1  ;;  %v2984_v16 = vpop.f32.mrb[32].mxu0 }
 0x1c3   : > { %v881_v17 = vpop.f32.mrb[1].mxu1  ;;  %v2986_v18 = vpop.f32.mrb[33].mxu0  ;;  %v2992_v20 = vadd.f32 %v2412_v15, %v2982_v45 }
 0x1c4   : > { %v2989_v19 = vadd.f32 %v2982_v45, %v881_v17 }
 0x1c5   : > { %v1280_v31 = vsel %vm1276_vm3, %v2992_v20, -inf }
 0x1c6   : > { %v2415_v21 = vpop.f32.mrb[2].mxu1  ;;  %v2994_v22 = vpop.f32.mrb[34].mxu0  ;;  %v1277_v23 = vsel %vm1276_vm3, %v2989_v19, -inf }
 0x1c7   : > { %v891_v24 = vpop.f32.mrb[3].mxu1  ;;  %v2998_v25 = vpop.f32.mrb[35].mxu0  ;;  %1278 = vmax.xlane.f32.xlu0 %v1277_v23  ;;  %v3004_v27 = vadd.f32 %v2415_v21, %v2982_v45 }
 0x1c8   : > { %v3001_v26 = vadd.f32 %v2982_v45, %v891_v24 }
 0x1c9   : > { %v1286_v38 = vsel %vm1276_vm3, %v3004_v27, -inf }
 0x1ca   : > { %v2418_v28 = vpop.f32.mrb[4].mxu1  ;;  %v3006_v29 = vpop.f32.mrb[36].mxu0  ;;  %v1283_v30 = vsel %vm1276_vm3, %v3001_v26, -inf }
 0x1cb   : > { %v901_v32 = vpop.f32.mrb[5].mxu1  ;;  %v3012_v33 = vpop.f32.mrb[37].mxu0  ;;  %1284 = vmax.xlane.f32.xlu1 %v1283_v30  ;;  %1281 = vmax.xlane.f32.xlu0 %v1280_v31  ;;  %v3018_v35 = vadd.f32 %v2418_v28, %v2982_v45 }
 0x1cc   : > { %v3015_v34 = vadd.f32 %v2982_v45, %v901_v32 }
 0x1cd   : > { %v1292_v47 = vsel %vm1276_vm3, %v3018_v35, -inf }
 0x1ce   : > { %v2421_v36 = vpop.f32.mrb[6].mxu1  ;;  %v3020_v37 = vpop.f32.mrb[38].mxu0  ;;  %v1289_v39 = vsel %vm1276_vm3, %v3015_v34, -inf }
 0x1cf   : > { %v911_v40 = vpop.f32.mrb[7].mxu1  ;;  %v3026_v41 = vpop.f32.mrb[39].mxu0  ;;  %1287 = vmax.xlane.f32.xlu1 %v1286_v38  ;;  %1290 = vmax.xlane.f32.xlu0 %v1289_v39  ;;  %v3032_v43 = vadd.f32 %v2421_v36, %v2982_v45 }
 0x1d0   : > { %v3029_v42 = vadd.f32 %v2982_v45, %v911_v40 }
 0x1d1   : > { %v1298_v55 = vsel %vm1276_vm3, %v3032_v43, -inf }
 0x1d2   : > { %v2424_v44 = vpop.f32.mrb[8].mxu1  ;;  %v3034_v46 = vpop.f32.mrb[40].mxu0  ;;  %v1295_v48 = vsel %vm1276_vm3, %v3029_v42, -inf }
 0x1d3   : > { %v921_v49 = vpop.f32.mrb[9].mxu1  ;;  %v3040_v50 = vpop.f32.mrb[41].mxu0  ;;  %1293 = vmax.xlane.f32.xlu1 %v1292_v47  ;;  %1296 = vmax.xlane.f32.xlu0 %v1295_v48  ;;  %v3046_v52 = vadd.f32 %v2424_v44, %v2982_v45 }
 0x1d4   : > { %v3043_v51 = vadd.f32 %v2982_v45, %v921_v49 }
 0x1d5   : > { %v1304_v63 = vsel %vm1276_vm3, %v3046_v52, -inf }
 0x1d6   : > { %v2427_v53 = vpop.f32.mrb[10].mxu1  ;;  %v3048_v54 = vpop.f32.mrb[42].mxu0  ;;  %v1301_v56 = vsel %vm1276_vm3, %v3043_v51, -inf }
 0x1d7   : > { %v931_v57 = vpop.f32.mrb[11].mxu1  ;;  %v3054_v58 = vpop.f32.mrb[43].mxu0  ;;  %1299 = vmax.xlane.f32.xlu1 %v1298_v55  ;;  %1302 = vmax.xlane.f32.xlu0 %v1301_v56  ;;  %v3060_v60 = vadd.f32 %v2427_v53, %v2982_v45 }
 0x1d8   : > { %v3057_v59 = vadd.f32 %v2982_v45, %v931_v57 }
 0x1d9   : > { %v1310_v7 = vsel %vm1276_vm3, %v3060_v60, -inf }
 0x1da   : > { %v2430_v61 = vpop.f32.mrb[12].mxu1  ;;  %v3062_v62 = vpop.f32.mrb[44].mxu0  ;;  %v1307_v0 = vsel %vm1276_vm3, %v3057_v59, -inf }
 0x1db   : > { %v941_v1 = vpop.f32.mrb[13].mxu1  ;;  %v3068_v2 = vpop.f32.mrb[45].mxu0  ;;  %1305 = vmax.xlane.f32.xlu1 %v1304_v63  ;;  %1308 = vmax.xlane.f32.xlu0 %v1307_v0  ;;  %v3074_v4 = vadd.f32 %v2430_v61, %v2982_v45 }
 0x1dc   : > { %v3071_v3 = vadd.f32 %v2982_v45, %v941_v1 }
 0x1dd   : > { %v1316_v15 = vsel %vm1276_vm3, %v3074_v4, -inf }
 0x1de   : > { %v2433_v5 = vpop.f32.mrb[14].mxu1  ;;  %v3076_v6 = vpop.f32.mrb[46].mxu0  ;;  %v1313_v8 = vsel %vm1276_vm3, %v3071_v3, -inf }
 0x1df   : > { %v951_v9 = vpop.f32.mrb[15].mxu1  ;;  %v3082_v10 = vpop.f32.mrb[47].mxu0  ;;  %1311 = vmax.xlane.f32.xlu1 %v1310_v7  ;;  %1314 = vmax.xlane.f32.xlu0 %v1313_v8  ;;  %v3088_v12 = vadd.f32 %v2433_v5, %v2982_v45 }
 0x1e0   : > { %v3085_v11 = vadd.f32 %v2982_v45, %v951_v9 }
 0x1e1   : > { %v1322_v32 = vsel %vm1276_vm3, %v3088_v12, -inf }
 0x1e2   : > { %v2436_v13 = vpop.f32.mrb[16].mxu1  ;;  %v3090_v14 = vpop.f32.mrb[48].mxu0  ;;  %v1319_v17 = vsel %vm1276_vm3, %v3085_v11, -inf }
 0x1e3   : > { %v961_v21 = vpop.f32.mrb[17].mxu1  ;;  %v3096_v23 = vpop.f32.mrb[49].mxu0  ;;  %1317 = vmax.xlane.f32.xlu1 %v1316_v15  ;;  %1320 = vmax.xlane.f32.xlu0 %v1319_v17  ;;  %v3102_v28 = vadd.f32 %v2436_v13, %v2982_v45 }
 0x1e4   : > { %v3099_v24 = vadd.f32 %v2982_v45, %v961_v21 }
 0x1e5   : > { %v1328_v49 = vsel %vm1276_vm3, %v3102_v28, -inf }
 0x1e6   : > { %v2439_v30 = vpop.f32.mrb[18].mxu1  ;;  %v3104_v31 = vpop.f32.mrb[50].mxu0  ;;  %v1325_v36 = vsel %vm1276_vm3, %v3099_v24, -inf }
 0x1e7   : > { %3555 = vst [vmem:[#allocation2_spill] sm:$0xff] %v3104_v31  ;;  %v971_v38 = vpop.f32.mrb[19].mxu1  ;;  %v3110_v39 = vpop.f32.mrb[51].mxu0  ;;  %1323 = vmax.xlane.f32.xlu1 %v1322_v32  ;;  %1326 = vmax.xlane.f32.xlu0 %v1325_v36  ;;  %v3116_v44 = vadd.f32 %v2439_v30, %v2982_v45 }
 0x1e8   : > { %3556 = vst [vmem:[#allocation3_spill] sm:$0xff] %v3110_v39  ;;  %v3113_v40 = vadd.f32 %v2982_v45, %v971_v38 }
 0x1e9   : > { %v1334_v1 = vsel %vm1276_vm3, %v3116_v44, -inf }
 0x1ea   : > { %v2442_v47 = vpop.f32.mrb[20].mxu1  ;;  %v3118_v48 = vpop.f32.mrb[52].mxu0  ;;  %v1331_v53 = vsel %vm1276_vm3, %v3113_v40, -inf }
 0x1eb   : > { %3557 = vst [vmem:[#allocation4_spill] sm:$0xff] %v3118_v48  ;;  %v981_v55 = vpop.f32.mrb[21].mxu1  ;;  %v3124_v56 = vpop.f32.mrb[53].mxu0  ;;  %1329 = vmax.xlane.f32.xlu1 %v1328_v49  ;;  %1332 = vmax.xlane.f32.xlu0 %v1331_v53  ;;  %v3130_v61 = vadd.f32 %v2442_v47, %v2982_v45 }
 0x1ec   : > { %3558 = vst [vmem:[#allocation5_spill] sm:$0xff] %v3124_v56  ;;  %v3127_v57 = vadd.f32 %v2982_v45, %v981_v55 }
 0x1ed   : > { %v1340_v21 = vsel %vm1276_vm3, %v3130_v61, -inf }
 0x1ee   : > { %v2445_v63 = vpop.f32.mrb[22].mxu1  ;;  %v3132_v0 = vpop.f32.mrb[54].mxu0  ;;  %v1337_v5 = vsel %vm1276_vm3, %v3127_v57, -inf }
 0x1ef   : > { %3559 = vst [vmem:[#allocation6_spill] sm:$0xff] %v3132_v0  ;;  %v991_v7 = vpop.f32.mrb[23].mxu1  ;;  %v3138_v8 = vpop.f32.mrb[55].mxu0  ;;  %1335 = vmax.xlane.f32.xlu1 %v1334_v1  ;;  %1338 = vmax.xlane.f32.xlu0 %v1337_v5  ;;  %v3144_v13 = vadd.f32 %v2445_v63, %v2982_v45 }
 0x1f0   : > { %3560 = vst [vmem:[#allocation7_spill] sm:$0xff] %v3138_v8  ;;  %v3141_v9 = vadd.f32 %v2982_v45, %v991_v7 }
 0x1f1   : > { %v1346_v55 = vsel %vm1276_vm3, %v3144_v13, -inf }
 0x1f2   : > { %v2448_v15 = vpop.f32.mrb[24].mxu1  ;;  %v3146_v17 = vpop.f32.mrb[56].mxu0  ;;  %v1343_v30 = vsel %vm1276_vm3, %v3141_v9, -inf }
 0x1f3   : > { %3561 = vst [vmem:[#allocation8_spill] sm:$0xff] %v3146_v17  ;;  %v1001_v32 = vpop.f32.mrb[25].mxu1  ;;  %v3152_v36 = vpop.f32.mrb[57].mxu0  ;;  %1341 = vmax.xlane.f32.xlu1 %v1340_v21  ;;  %1344 = vmax.xlane.f32.xlu0 %v1343_v30  ;;  %v3158_v47 = vadd.f32 %v2448_v15, %v2982_v45 }
 0x1f4   : > { %3562 = vst [vmem:[#allocation9_spill] sm:$0xff] %v3152_v36  ;;  %v3155_v38 = vadd.f32 %v2982_v45, %v1001_v32 }
 0x1f5   : > { %v1352_v32 = vsel %vm1276_vm3, %v3158_v47, -inf }
 0x1f6   : > { %v2451_v49 = vpop.f32.mrb[26].mxu1  ;;  %v3160_v53 = vpop.f32.mrb[58].mxu0  ;;  %v1349_v63 = vsel %vm1276_vm3, %v3155_v38, -inf }
 0x1f7   : > { %3563 = vst [vmem:[#allocation10_spill] sm:$0xff] %v3160_v53  ;;  %v1011_v1 = vpop.f32.mrb[27].mxu1  ;;  %v3166_v5 = vpop.f32.mrb[59].mxu0  ;;  %1347 = vmax.xlane.f32.xlu1 %v1346_v55  ;;  %1350 = vmax.xlane.f32.xlu0 %v1349_v63  ;;  %v3172_v15 = vadd.f32 %v2451_v49, %v2982_v45 }
 0x1f8   : > { %3564 = vst [vmem:[#allocation11_spill] sm:$0xff] %v3166_v5  ;;  %v3169_v7 = vadd.f32 %v2982_v45, %v1011_v1 }
 0x1fa   : > { %v2454_v21 = vpop.f32.mrb[28].mxu1  ;;  %v3174_v30 = vpop.f32.mrb[60].mxu0  ;;  %v1355_v53 = vsel %vm1276_vm3, %v3169_v7, -inf }
 0x1fb   : > { %3565 = vst [vmem:[#allocation12_spill] sm:$0xff] %v3174_v30  ;;  %v1021_v36 = vpop.f32.mrb[29].mxu1  ;;  %v3180_v17 = vpop.f32.mrb[61].mxu0  ;;  %1353 = vmax.xlane.f32.xlu1 %v1352_v32  ;;  %1356 = vmax.xlane.f32.xlu0 %v1355_v53  ;;  %v3186_v49 = vadd.f32 %v2454_v21, %v2982_v45  ;;  %v1358_v30 = vsel %vm1276_vm3, %v3172_v15, -inf }
 0x1fc   : > { %3566 = vst [vmem:[#allocation13_spill] sm:$0xff] %v3180_v17  ;;  %v3183_v55 = vadd.f32 %v2982_v45, %v1021_v36 }
 0x1fd   : > { %v1364_v21 = vsel %vm1276_vm3, %v3186_v49, -inf }
 0x1fe   : > { %v2457_v63 = vpop.f32.mrb[30].mxu1  ;;  %v3188_v1 = vpop.f32.mrb[62].mxu0  ;;  %v1361_v5 = vsel %vm1276_vm3, %v3183_v55, -inf }
 0x1ff   : > { %3567 = vst [vmem:[#allocation14_spill] sm:$0xff] %v3188_v1  ;;  %v3195_v8 = vadd.f32 %v2457_v63, %v2982_v45  ;;  %v1031_v32 = vpop.f32.mrb[31].mxu1  ;;  %v3197_v53 = vpop.f32.mrb[63].mxu0  ;;  %1359 = vmax.xlane.f32.xlu1 %v1358_v30  ;;  %1362 = vmax.xlane.f32.xlu0 %v1361_v5  ;;  %v1629_v30 = vld [vmem:[%s3553_s7] sm:$0xff] }
 0x200   : > { %3568 = vst [vmem:[#allocation15_spill] sm:$0xff] %v3197_v53  ;;  %v3200_v36 = vadd.f32 %v2982_v45, %v1031_v32  ;;  %2514 = vmatprep.subr.mxu1 %v1629_v30 }
 0x201   : > { %v1370_v63 = vsel %vm1276_vm3, %v3195_v8, -inf  ;;  %2515 = vmatpush3.msra.mxu1 %v1629_v30 }
 0x202   : > { %v1367_v1 = vsel %vm1276_vm3, %v3200_v36, -inf }
 0x203   : > { %1365 = vmax.xlane.f32.xlu1 %v1364_v21  ;;  %1368 = vmax.xlane.f32.xlu0 %v1367_v1 }
 0x207   : > { %1371 = vmax.xlane.f32.xlu1 %v1370_v63 }
 0x254   : > { %v1279_v45 = vpop.xlane.xlu0 %1278 }
 0x255   : > { %v1373_v5 = vsub.f32 %v2989_v19, %v1279_v45 }
 0x257   : > { %v1405_v32 = vmul.f32 1.442695, %v1373_v5 }
 0x258   : > { %v1285_v53 = vpop.xlane.xlu1 %1284  ;;  %v1282_v17 = vpop.xlane.xlu0 %1281 }
 0x259   : > { %2588 = vpow2.f32 %v1405_v32  ;;  %v1375_v21 = vsub.f32 %v3001_v26, %v1285_v53  ;;  %v1374_v1 = vsub.f32 %v2992_v20, %v1282_v17 }
 0x25b   : > { %v1409_v0 = vmul.f32 1.442695, %v1375_v21  ;;  %v1407_v56 = vmul.f32 1.442695, %v1374_v1 }
 0x25c   : > { %v1288_v63 = vpop.xlane.xlu1 %1287  ;;  %v1291_v48 = vpop.xlane.xlu0 %1290 }
 0x25d   : > { %2590 = vpow2.f32 %v1409_v0  ;;  %v1376_v39 = vsub.f32 %v3004_v27, %v1288_v63  ;;  %v1377_v30 = vsub.f32 %v3015_v34, %v1291_v48 }
 0x25e   : > { %2592 = vpow2.f32 %v1407_v56 }
 0x25f   : > { %v1411_v31 = vmul.f32 1.442695, %v1376_v39  ;;  %v1413_v19 = vmul.f32 1.442695, %v1377_v30 }
 0x260   : > { %v1294_v45 = vpop.xlane.xlu1 %1293  ;;  %v1297_v5 = vpop.xlane.xlu0 %1296 }
 0x261   : > { %2594 = vpow2.f32 %v1411_v31  ;;  %v1378_v32 = vsub.f32 %v3018_v35, %v1294_v45  ;;  %v1379_v26 = vsub.f32 %v3029_v42, %v1297_v5 }
 0x262   : > { %2596 = vpow2.f32 %v1413_v19 }
 0x263   : > { %v3218_v20 = vpop.eup %2588  ;;  %v1415_v17 = vmul.f32 1.442695, %v1378_v32  ;;  %v1417_v53 = vmul.f32 1.442695, %v1379_v26 }
 0x264   : > { %v1300_v0 = vpop.xlane.xlu1 %1299  ;;  %v1303_v21 = vpop.xlane.xlu0 %1302  ;;  %v1469_v27 = vsel %vm1276_vm3, %v3218_v20, 0.0 }
 0x265   : > { %2598 = vpow2.f32 %v1415_v17  ;;  %v1380_v34 = vsub.f32 %v3032_v43, %v1300_v0  ;;  %v1381_v39 = vsub.f32 %v3043_v51, %v1303_v21  ;;  %1470 = vadd.xlane.f32.xlu0 %v1469_v27 }
 0x266   : > { %2600 = vpow2.f32 %v1417_v53 }
 0x267   : > { %v3224_v35 = vpop.eup %2590  ;;  %v1419_v42 = vmul.f32 1.442695, %v1380_v34  ;;  %v1421_v31 = vmul.f32 1.442695, %v1381_v39 }
 0x268   : > { %v3226_v48 = vpop.eup %2592  ;;  %v1306_v56 = vpop.xlane.xlu1 %1305  ;;  %v1475_v63 = vsel %vm1276_vm3, %v3224_v35, 0.0 }
 0x269   : > { %v1309_v1 = vpop.xlane.xlu0 %1308  ;;  %2602 = vpow2.f32 %v1419_v42  ;;  %v1382_v30 = vsub.f32 %v3046_v52, %v1306_v56  ;;  %1476 = vadd.xlane.f32.xlu0 %v1475_v63  ;;  %v1472_v51 = vsel %vm1276_vm3, %v3226_v48, 0.0 }
 0x26a   : > { %v1383_v43 = vsub.f32 %v3057_v59, %v1309_v1  ;;  %2604 = vpow2.f32 %v1421_v31  ;;  %1473 = vadd.xlane.f32.xlu1 %v1472_v51 }
 0x26b   : > { %v3234_v19 = vpop.eup %2594  ;;  %v1423_v45 = vmul.f32 1.442695, %v1382_v30 }
 0x26c   : > { %v1425_v5 = vmul.f32 1.442695, %v1383_v43  ;;  %v3236_v32 = vpop.eup %2596  ;;  %v1312_v26 = vpop.xlane.xlu1 %1311  ;;  %v1478_v53 = vsel %vm1276_vm3, %v3234_v19, 0.0 }
 0x26d   : > { %v1315_v17 = vpop.xlane.xlu0 %1314  ;;  %2606 = vpow2.f32 %v1423_v45  ;;  %v1384_v52 = vsub.f32 %v3060_v60, %v1312_v26  ;;  %v1481_v0 = vsel %vm1276_vm3, %v3236_v32, 0.0 }
 0x26e   : > { %v1385_v59 = vsub.f32 %v3071_v3, %v1315_v17  ;;  %2608 = vpow2.f32 %v1425_v5  ;;  %1479 = vadd.xlane.f32.xlu1 %v1478_v53  ;;  %1482 = vadd.xlane.f32.xlu0 %v1481_v0 }
 0x26f   : > { %v3244_v21 = vpop.eup %2598  ;;  %v1427_v27 = vmul.f32 1.442695, %v1384_v52 }
 0x270   : > { %v1429_v34 = vmul.f32 1.442695, %v1385_v59  ;;  %v3246_v39 = vpop.eup %2600  ;;  %v1318_v42 = vpop.xlane.xlu1 %1317  ;;  %v1484_v56 = vsel %vm1276_vm3, %v3244_v21, 0.0 }
 0x271   : > { %v1321_v31 = vpop.xlane.xlu0 %1320  ;;  %2610 = vpow2.f32 %v1427_v27  ;;  %v1386_v60 = vsub.f32 %v3074_v4, %v1318_v42  ;;  %v1487_v1 = vsel %vm1276_vm3, %v3246_v39, 0.0 }
 0x272   : > { %v1387_v3 = vsub.f32 %v3085_v11, %v1321_v31  ;;  %2612 = vpow2.f32 %v1429_v34  ;;  %1485 = vadd.xlane.f32.xlu1 %v1484_v56  ;;  %1488 = vadd.xlane.f32.xlu0 %v1487_v1 }
 0x273   : > { %v3254_v63 = vpop.eup %2602  ;;  %v1431_v30 = vmul.f32 1.442695, %v1386_v60 }
 0x274   : > { %v1433_v43 = vmul.f32 1.442695, %v1387_v3  ;;  %v3256_v51 = vpop.eup %2604  ;;  %v1324_v45 = vpop.xlane.xlu1 %1323  ;;  %v1490_v26 = vsel %vm1276_vm3, %v3254_v63, 0.0 }
 0x275   : > { %v1327_v5 = vpop.xlane.xlu0 %1326  ;;  %2614 = vpow2.f32 %v1431_v30  ;;  %v1388_v4 = vsub.f32 %v3088_v12, %v1324_v45  ;;  %v1493_v17 = vsel %vm1276_vm3, %v3256_v51, 0.0 }
 0x276   : > { %v1389_v11 = vsub.f32 %v3099_v24, %v1327_v5  ;;  %2616 = vpow2.f32 %v1433_v43  ;;  %1491 = vadd.xlane.f32.xlu1 %v1490_v26  ;;  %1494 = vadd.xlane.f32.xlu0 %v1493_v17 }
 0x277   : > { %v3264_v53 = vpop.eup %2606  ;;  %v1435_v52 = vmul.f32 1.442695, %v1388_v4 }
 0x278   : > { %v1437_v59 = vmul.f32 1.442695, %v1389_v11  ;;  %v3266_v0 = vpop.eup %2608  ;;  %v1330_v27 = vpop.xlane.xlu1 %1329  ;;  %v1496_v42 = vsel %vm1276_vm3, %v3264_v53, 0.0 }
 0x279   : > { %v1333_v34 = vpop.xlane.xlu0 %1332  ;;  %2618 = vpow2.f32 %v1435_v52  ;;  %v1390_v12 = vsub.f32 %v3102_v28, %v1330_v27  ;;  %v1499_v31 = vsel %vm1276_vm3, %v3266_v0, 0.0 }
 0x27a   : > { %v1391_v24 = vsub.f32 %v3113_v40, %v1333_v34  ;;  %2620 = vpow2.f32 %v1437_v59  ;;  %1497 = vadd.xlane.f32.xlu1 %v1496_v42  ;;  %1500 = vadd.xlane.f32.xlu0 %v1499_v31 }
 0x27b   : > { %v3274_v56 = vpop.eup %2610  ;;  %v1439_v60 = vmul.f32 1.442695, %v1390_v12 }
 0x27c   : > { %v1441_v3 = vmul.f32 1.442695, %v1391_v24  ;;  %v3276_v1 = vpop.eup %2612  ;;  %v1336_v30 = vpop.xlane.xlu1 %1335  ;;  %v1502_v45 = vsel %vm1276_vm3, %v3274_v56, 0.0 }
 0x27d   : > { %v1339_v43 = vpop.xlane.xlu0 %1338  ;;  %2622 = vpow2.f32 %v1439_v60  ;;  %v1392_v28 = vsub.f32 %v3116_v44, %v1336_v30  ;;  %v1505_v5 = vsel %vm1276_vm3, %v3276_v1, 0.0 }
 0x27e   : > { %v1393_v40 = vsub.f32 %v3127_v57, %v1339_v43  ;;  %2624 = vpow2.f32 %v1441_v3  ;;  %1503 = vadd.xlane.f32.xlu1 %v1502_v45  ;;  %1506 = vadd.xlane.f32.xlu0 %v1505_v5 }
 0x27f   : > { %v3284_v26 = vpop.eup %2614  ;;  %v1443_v4 = vmul.f32 1.442695, %v1392_v28 }
 0x280   : > { %v1445_v11 = vmul.f32 1.442695, %v1393_v40  ;;  %v3286_v17 = vpop.eup %2616  ;;  %v1342_v52 = vpop.xlane.xlu1 %1341  ;;  %v1508_v27 = vsel %vm1276_vm3, %v3284_v26, 0.0 }
 0x281   : > { %v1345_v59 = vpop.xlane.xlu0 %1344  ;;  %2626 = vpow2.f32 %v1443_v4  ;;  %v1394_v44 = vsub.f32 %v3130_v61, %v1342_v52  ;;  %v1511_v34 = vsel %vm1276_vm3, %v3286_v17, 0.0 }
 0x282   : > { %v1395_v57 = vsub.f32 %v3141_v9, %v1345_v59  ;;  %2628 = vpow2.f32 %v1445_v11  ;;  %1509 = vadd.xlane.f32.xlu1 %v1508_v27  ;;  %1512 = vadd.xlane.f32.xlu0 %v1511_v34 }
 0x283   : > { %v3294_v42 = vpop.eup %2618  ;;  %v1447_v12 = vmul.f32 1.442695, %v1394_v44 }
 0x284   : > { %v1449_v24 = vmul.f32 1.442695, %v1395_v57  ;;  %v3296_v31 = vpop.eup %2620  ;;  %v1348_v60 = vpop.xlane.xlu1 %1347  ;;  %v1514_v30 = vsel %vm1276_vm3, %v3294_v42, 0.0 }
 0x285   : > { %v1351_v3 = vpop.xlane.xlu0 %1350  ;;  %2630 = vpow2.f32 %v1447_v12  ;;  %v1396_v61 = vsub.f32 %v3144_v13, %v1348_v60  ;;  %v1517_v43 = vsel %vm1276_vm3, %v3296_v31, 0.0 }
 0x286   : > { %v1397_v9 = vsub.f32 %v3155_v38, %v1351_v3  ;;  %2632 = vpow2.f32 %v1449_v24  ;;  %1515 = vadd.xlane.f32.xlu1 %v1514_v30  ;;  %1518 = vadd.xlane.f32.xlu0 %v1517_v43 }
 0x287   : > { %v3304_v45 = vpop.eup %2622  ;;  %v1451_v28 = vmul.f32 1.442695, %v1396_v61 }
 0x288   : > { %v1453_v40 = vmul.f32 1.442695, %v1397_v9  ;;  %v3306_v5 = vpop.eup %2624  ;;  %v1354_v4 = vpop.xlane.xlu1 %1353  ;;  %v1520_v52 = vsel %vm1276_vm3, %v3304_v45, 0.0 }
 0x289   : > { %v1357_v11 = vpop.xlane.xlu0 %1356  ;;  %2634 = vpow2.f32 %v1451_v28  ;;  %v1398_v13 = vsub.f32 %v3158_v47, %v1354_v4  ;;  %v1523_v59 = vsel %vm1276_vm3, %v3306_v5, 0.0 }
 0x28a   : > { %v1399_v38 = vsub.f32 %v3169_v7, %v1357_v11  ;;  %2636 = vpow2.f32 %v1453_v40  ;;  %1521 = vadd.xlane.f32.xlu1 %v1520_v52  ;;  %1524 = vadd.xlane.f32.xlu0 %v1523_v59 }
 0x28b   : > { %v3314_v27 = vpop.eup %2626  ;;  %v1455_v44 = vmul.f32 1.442695, %v1398_v13 }
 0x28c   : > { %v1457_v57 = vmul.f32 1.442695, %v1399_v38  ;;  %v3316_v34 = vpop.eup %2628  ;;  %v1360_v12 = vpop.xlane.xlu1 %1359  ;;  %v1526_v60 = vsel %vm1276_vm3, %v3314_v27, 0.0 }
 0x28d   : > { %v1363_v24 = vpop.xlane.xlu0 %1362  ;;  %2638 = vpow2.f32 %v1455_v44  ;;  %v1400_v47 = vsub.f32 %v3172_v15, %v1360_v12  ;;  %v1529_v3 = vsel %vm1276_vm3, %v3316_v34, 0.0 }
 0x28e   : > { %v1401_v7 = vsub.f32 %v3183_v55, %v1363_v24  ;;  %2640 = vpow2.f32 %v1457_v57  ;;  %1527 = vadd.xlane.f32.xlu1 %v1526_v60  ;;  %1530 = vadd.xlane.f32.xlu0 %v1529_v3 }
 0x28f   : > { %v3324_v30 = vpop.eup %2630  ;;  %v1459_v61 = vmul.f32 1.442695, %v1400_v47 }
 0x290   : > { %v1461_v9 = vmul.f32 1.442695, %v1401_v7  ;;  %v3326_v43 = vpop.eup %2632  ;;  %v1366_v28 = vpop.xlane.xlu1 %1365  ;;  %v1532_v4 = vsel %vm1276_vm3, %v3324_v30, 0.0 }
 0x291   : > { %v1369_v40 = vpop.xlane.xlu0 %1368  ;;  %2642 = vpow2.f32 %v1459_v61  ;;  %v1402_v15 = vsub.f32 %v3186_v49, %v1366_v28  ;;  %v1535_v11 = vsel %vm1276_vm3, %v3326_v43, 0.0 }
 0x292   : > { %v1403_v55 = vsub.f32 %v3200_v36, %v1369_v40  ;;  %2644 = vpow2.f32 %v1461_v9  ;;  %1533 = vadd.xlane.f32.xlu1 %v1532_v4  ;;  %1536 = vadd.xlane.f32.xlu0 %v1535_v11 }
 0x293   : > { %v3334_v52 = vpop.eup %2634  ;;  %v1463_v13 = vmul.f32 1.442695, %v1402_v15 }
 0x294   : > { %v1465_v38 = vmul.f32 1.442695, %v1403_v55  ;;  %v3336_v59 = vpop.eup %2636  ;;  %v1372_v44 = vpop.xlane.xlu1 %1371  ;;  %v1538_v57 = vsel %vm1276_vm3, %v3334_v52, 0.0 }
 0x295   : > { %2646 = vpow2.f32 %v1463_v13  ;;  %v1404_v49 = vsub.f32 %v3195_v8, %v1372_v44  ;;  %v1541_v36 = vsel %vm1276_vm3, %v3336_v59, 0.0 }
 0x296   : > { %2648 = vpow2.f32 %v1465_v38  ;;  %1539 = vadd.xlane.f32.xlu1 %v1538_v57  ;;  %1542 = vadd.xlane.f32.xlu0 %v1541_v36 }
 0x297   : > { %v3343_v12 = vpop.eup %2638  ;;  %v1467_v24 = vmul.f32 1.442695, %v1404_v49 }
 0x298   : > { %v3345_v60 = vpop.eup %2640  ;;  %v1544_v47 = vsel %vm1276_vm3, %v3343_v12, 0.0 }
 0x299   : > { %2650 = vpow2.f32 %v1467_v24  ;;  %v1547_v7 = vsel %vm1276_vm3, %v3345_v60, 0.0 }
 0x29a   : > { %1545 = vadd.xlane.f32.xlu1 %v1544_v47  ;;  %1548 = vadd.xlane.f32.xlu0 %v1547_v7 }
 0x29b   : > { %v3351_v8 = vpop.eup %2642 }
 0x29c   : > { %v3353_v3 = vpop.eup %2644  ;;  %v1550_v61 = vsel %vm1276_vm3, %v3351_v8, 0.0 }
 0x29d   : > { %v1553_v9 = vsel %vm1276_vm3, %v3353_v3, 0.0 }
 0x29e   : > { %1551 = vadd.xlane.f32.xlu1 %v1550_v61  ;;  %1554 = vadd.xlane.f32.xlu0 %v1553_v9 }
 0x29f   : > { %v3359_v28 = vpop.eup %2646 }
 0x2a0   : > { %v3361_v40 = vpop.eup %2648  ;;  %v1556_v4 = vsel %vm1276_vm3, %v3359_v28, 0.0 }
 0x2a1   : > { %v1559_v15 = vsel %vm1276_vm3, %v3361_v40, 0.0 }
 0x2a2   : > { %1557 = vadd.xlane.f32.xlu1 %v1556_v4  ;;  %1560 = vadd.xlane.f32.xlu0 %v1559_v15 }
 0x2a3   : > { %v3367_v55 = vpop.eup %2650 }
 0x2a4   : > { %v1562_v11 = vsel %vm1276_vm3, %v3367_v55, 0.0 }
 0x2a6   : > { %1563 = vadd.xlane.f32.xlu1 %v1562_v11 }
 0x2f2   : > { %v1471_v13 = vpop.xlane.xlu0 %1470 }
 0x2f3   : > { %2652 = vrcp.f32 %v1471_v13 }
 0x2f6   : > { %v1477_v38 = vpop.xlane.xlu0 %1476 }
 0x2f7   : > { %v1474_v44 = vpop.xlane.xlu1 %1473  ;;  %2654 = vrcp.f32 %v1477_v38 }
 0x2f8   : > { %2656 = vrcp.f32 %v1474_v44 }
 0x2fb   : > { %v1480_v57 = vpop.xlane.xlu1 %1479  ;;  %v1483_v49 = vpop.xlane.xlu0 %1482 }
 0x2fc   : > { %2658 = vrcp.f32 %v1480_v57 }
 0x2fd   : > { %v2653_v36 = vpop.eup %2652  ;;  %2660 = vrcp.f32 %v1483_v49 }
 0x2fe   : > { %v1597_v24 = vmul.f32 %v2653_v36, %v3218_v20 }
 0x2ff   : > { %v1486_v47 = vpop.xlane.xlu1 %1485  ;;  %v1489_v7 = vpop.xlane.xlu0 %1488 }
 0x300   : > { %2662 = vrcp.f32 %v1486_v47  ;;  %2516 = vmatprep.mubr.msk.f32.mxu1 %vm1276_vm3, %v1597_v24 }
 0x301   : > { %v2655_v61 = vpop.eup %2654  ;;  %2664 = vrcp.f32 %v1489_v7 }
 0x302   : > { %v2657_v9 = vpop.eup %2656  ;;  %v1599_v4 = vmul.f32 %v2655_v61, %v3224_v35 }
 0x303   : > { %v1598_v15 = vmul.f32 %v2657_v9, %v3226_v48  ;;  %v1492_v11 = vpop.xlane.xlu1 %1491  ;;  %v1495_v13 = vpop.xlane.xlu0 %1494 }
 0x304   : > { %2666 = vrcp.f32 %v1492_v11 }
 0x305   : > { %2668 = vrcp.f32 %v1495_v13  ;;  %2517 = vmatmul.mubr.msk.f32.vlgmr.msra.gmra.mrb[32].mxu1 %vm1276_vm3, %v1598_v15 }
 0x306   : > { %v2659_v38 = vpop.eup %2658  ;;  %2519 = vmatprep.mubr.msk.f32.mxu1 %vm1276_vm3, %v1599_v4 }
 0x307   : > { %v2661_v20 = vpop.eup %2660  ;;  %v1498_v44 = vpop.xlane.xlu1 %1497  ;;  %v1600_v49 = vmul.f32 %v2659_v38, %v3234_v19 }
 0x308   : > { %v1501_v57 = vpop.xlane.xlu0 %1500  ;;  %2670 = vrcp.f32 %v1498_v44  ;;  %v1601_v36 = vmul.f32 %v2661_v20, %v3236_v32 }
 0x309   : > { %2672 = vrcp.f32 %v1501_v57  ;;  %2520 = vmatmul.mubr.msk.f32.gmra.mrb[34].mxu1 %vm1276_vm3, %v1600_v49 }
 0x30a   : > { %v2663_v35 = vpop.eup %2662  ;;  %2522 = vmatprep.mubr.msk.f32.mxu1 %vm1276_vm3, %v1601_v36 }
 0x30b   : > { %v2665_v48 = vpop.eup %2664  ;;  %v1504_v24 = vpop.xlane.xlu1 %1503  ;;  %v1602_v7 = vmul.f32 %v2663_v35, %v3244_v21 }
 0x30c   : > { %v1507_v47 = vpop.xlane.xlu0 %1506  ;;  %2674 = vrcp.f32 %v1504_v24  ;;  %v1603_v61 = vmul.f32 %v2665_v48, %v3246_v39 }
 0x30d   : > { %2676 = vrcp.f32 %v1507_v47  ;;  %2523 = vmatmul.mubr.msk.f32.gmra.mrb[36].mxu1 %vm1276_vm3, %v1602_v7 }
 0x30e   : > { %v2667_v19 = vpop.eup %2666  ;;  %2525 = vmatprep.mubr.msk.f32.mxu1 %vm1276_vm3, %v1603_v61 }
 0x30f   : > { %v2669_v32 = vpop.eup %2668  ;;  %v1510_v9 = vpop.xlane.xlu1 %1509  ;;  %v1604_v15 = vmul.f32 %v2667_v19, %v3254_v63 }
 0x310   : > { %v1513_v4 = vpop.xlane.xlu0 %1512  ;;  %2678 = vrcp.f32 %v1510_v9  ;;  %v1605_v11 = vmul.f32 %v2669_v32, %v3256_v51 }
 0x311   : > { %2680 = vrcp.f32 %v1513_v4  ;;  %2526 = vmatmul.mubr.msk.f32.gmra.mrb[38].mxu1 %vm1276_vm3, %v1604_v15 }
 0x312   : > { %v2671_v21 = vpop.eup %2670  ;;  %2528 = vmatprep.mubr.msk.f32.mxu1 %vm1276_vm3, %v1605_v11 }
 0x313   : > { %v2673_v39 = vpop.eup %2672  ;;  %v1516_v13 = vpop.xlane.xlu1 %1515  ;;  %v1606_v20 = vmul.f32 %v2671_v21, %v3264_v53 }
 0x314   : > { %v1519_v38 = vpop.xlane.xlu0 %1518  ;;  %2682 = vrcp.f32 %v1516_v13  ;;  %v1607_v44 = vmul.f32 %v2673_v39, %v3266_v0 }
 0x315   : > { %2684 = vrcp.f32 %v1519_v38  ;;  %2529 = vmatmul.mubr.msk.f32.gmra.mrb[40].mxu1 %vm1276_vm3, %v1606_v20 }
 0x316   : > { %v2675_v63 = vpop.eup %2674  ;;  %2531 = vmatprep.mubr.msk.f32.mxu1 %vm1276_vm3, %v1607_v44 }
 0x317   : > { %v2677_v51 = vpop.eup %2676  ;;  %v1522_v57 = vpop.xlane.xlu1 %1521  ;;  %v1608_v36 = vmul.f32 %v2675_v63, %v3274_v56 }
 0x318   : > { %v1525_v49 = vpop.xlane.xlu0 %1524  ;;  %2686 = vrcp.f32 %v1522_v57  ;;  %v1609_v35 = vmul.f32 %v2677_v51, %v3276_v1 }
 0x319   : > { %2688 = vrcp.f32 %v1525_v49  ;;  %2532 = vmatmul.mubr.msk.f32.gmra.mrb[42].mxu1 %vm1276_vm3, %v1608_v36 }
 0x31a   : > { %v2679_v53 = vpop.eup %2678  ;;  %2534 = vmatprep.mubr.msk.f32.mxu1 %vm1276_vm3, %v1609_v35 }
 0x31b   : > { %v2681_v0 = vpop.eup %2680  ;;  %v1528_v48 = vpop.xlane.xlu1 %1527  ;;  %v1610_v47 = vmul.f32 %v2679_v53, %v3284_v26 }
 0x31c   : > { %v1531_v24 = vpop.xlane.xlu0 %1530  ;;  %2690 = vrcp.f32 %v1528_v48  ;;  %v1611_v7 = vmul.f32 %v2681_v0, %v3286_v17 }
 0x31d   : > { %2692 = vrcp.f32 %v1531_v24  ;;  %2535 = vmatmul.mubr.msk.f32.gmra.mrb[44].mxu1 %vm1276_vm3, %v1610_v47 }
 0x31e   : > { %v2683_v56 = vpop.eup %2682  ;;  %2537 = vmatprep.mubr.msk.f32.mxu1 %vm1276_vm3, %v1611_v7 }
 0x31f   : > { %v2685_v1 = vpop.eup %2684  ;;  %v1534_v61 = vpop.xlane.xlu1 %1533  ;;  %v1612_v32 = vmul.f32 %v2683_v56, %v3294_v42 }
 0x320   : > { %v1537_v19 = vpop.xlane.xlu0 %1536  ;;  %2694 = vrcp.f32 %v1534_v61  ;;  %v1613_v9 = vmul.f32 %v2685_v1, %v3296_v31 }
 0x321   : > { %2696 = vrcp.f32 %v1537_v19  ;;  %2538 = vmatmul.mubr.msk.f32.gmra.mrb[46].mxu1 %vm1276_vm3, %v1612_v32 }
 0x322   : > { %v2687_v26 = vpop.eup %2686  ;;  %2540 = vmatprep.mubr.msk.f32.mxu1 %vm1276_vm3, %v1613_v9 }
 0x323   : > { %v2689_v17 = vpop.eup %2688  ;;  %v1540_v4 = vpop.xlane.xlu1 %1539  ;;  %v1614_v11 = vmul.f32 %v2687_v26, %v3304_v45 }
 0x324   : > { %v1543_v15 = vpop.xlane.xlu0 %1542  ;;  %2698 = vrcp.f32 %v1540_v4  ;;  %v1615_v21 = vmul.f32 %v2689_v17, %v3306_v5 }
 0x325   : > { %2700 = vrcp.f32 %v1543_v15  ;;  %2541 = vmatmul.mubr.msk.f32.gmra.mrb[48].mxu1 %vm1276_vm3, %v1614_v11 }
 0x326   : > { %v2691_v42 = vpop.eup %2690  ;;  %2543 = vmatprep.mubr.msk.f32.mxu1 %vm1276_vm3, %v1615_v21 }
 0x327   : > { %v2693_v31 = vpop.eup %2692  ;;  %v1546_v39 = vpop.xlane.xlu1 %1545  ;;  %v1616_v38 = vmul.f32 %v2691_v42, %v3314_v27 }
 0x328   : > { %v1549_v13 = vpop.xlane.xlu0 %1548  ;;  %2702 = vrcp.f32 %v1546_v39  ;;  %v1617_v20 = vmul.f32 %v2693_v31, %v3316_v34 }
 0x329   : > { %2704 = vrcp.f32 %v1549_v13  ;;  %2544 = vmatmul.mubr.msk.f32.gmra.mrb[50].mxu1 %vm1276_vm3, %v1616_v38 }
 0x32a   : > { %v2695_v45 = vpop.eup %2694  ;;  %2546 = vmatprep.mubr.msk.f32.mxu1 %vm1276_vm3, %v1617_v20 }
 0x32b   : > { %v2697_v5 = vpop.eup %2696  ;;  %v1552_v44 = vpop.xlane.xlu1 %1551  ;;  %v1618_v51 = vmul.f32 %v2695_v45, %v3324_v30 }
 0x32c   : > { %v1555_v63 = vpop.xlane.xlu0 %1554  ;;  %2706 = vrcp.f32 %v1552_v44  ;;  %v1619_v57 = vmul.f32 %v2697_v5, %v3326_v43 }
 0x32d   : > { %2708 = vrcp.f32 %v1555_v63  ;;  %2547 = vmatmul.mubr.msk.f32.gmra.mrb[52].mxu1 %vm1276_vm3, %v1618_v51 }
 0x32e   : > { %v2699_v27 = vpop.eup %2698  ;;  %2549 = vmatprep.mubr.msk.f32.mxu1 %vm1276_vm3, %v1619_v57 }
 0x32f   : > { %v2701_v34 = vpop.eup %2700  ;;  %v1558_v49 = vpop.xlane.xlu1 %1557  ;;  %v1620_v35 = vmul.f32 %v2699_v27, %v3334_v52 }
 0x330   : > { %v1561_v36 = vpop.xlane.xlu0 %1560  ;;  %2710 = vrcp.f32 %v1558_v49  ;;  %v1621_v53 = vmul.f32 %v2701_v34, %v3336_v59 }
 0x331   : > { %2712 = vrcp.f32 %v1561_v36  ;;  %2550 = vmatmul.mubr.msk.f32.gmra.mrb[54].mxu1 %vm1276_vm3, %v1620_v35 }
 0x332   : > { %v2703_v30 = vpop.eup %2702  ;;  %2552 = vmatprep.mubr.msk.f32.mxu1 %vm1276_vm3, %v1621_v53 }
 0x333   : > { %v2705_v43 = vpop.eup %2704  ;;  %v1564_v0 = vpop.xlane.xlu1 %1563  ;;  %v1622_v48 = vmul.f32 %v2703_v30, %v3343_v12 }
 0x334   : > { %2714 = vrcp.f32 %v1564_v0  ;;  %v1623_v24 = vmul.f32 %v2705_v43, %v3345_v60 }
 0x335   : > { %2553 = vmatmul.mubr.msk.f32.gmra.mrb[56].mxu1 %vm1276_vm3, %v1622_v48 }
 0x336   : > { %v2707_v47 = vpop.eup %2706  ;;  %2555 = vmatprep.mubr.msk.f32.mxu1 %vm1276_vm3, %v1623_v24 }
 0x337   : > { %v2709_v52 = vpop.eup %2708  ;;  %v1624_v59 = vmul.f32 %v2707_v47, %v3351_v8 }
 0x338   : > { %v1625_v7 = vmul.f32 %v2709_v52, %v3353_v3  ;;  %v3438_v3 = vld [vmem:[%s3552_s6] ss:$0 sm:$0xff] }
 0x339   : > { %2556 = vmatmul.mubr.msk.f32.gmra.mrb[58].mxu1 %vm1276_vm3, %v1624_v59  ;;  %v1123_v19 = vadd.f32 %v2984_v16, %v3438_v3  ;;  %v1133_v16 = vadd.f32 %v2994_v22, %v3438_v3  ;;  %v1143_v11 = vadd.f32 %v3006_v29, %v3438_v3  ;;  %v1138_v21 = vadd.f32 %v3438_v3, %v3012_v33 }
 0x33a   : > { %v2711_v56 = vpop.eup %2710  ;;  %2558 = vmatprep.mubr.msk.f32.mxu1 %vm1276_vm3, %v1625_v7  ;;  %v1153_v39 = vadd.f32 %v3020_v37, %v3438_v3  ;;  %v1148_v13 = vadd.f32 %v3438_v3, %v3026_v41  ;;  %v1163_v45 = vadd.f32 %v3034_v46, %v3438_v3  ;;  %v1158_v5 = vadd.f32 %v3438_v3, %v3040_v50  ;;  %v3569_v7 = vld [vmem:[#allocation2_spill] sm:$0xff] }
 0x33b   : > { %v2713_v12 = vpop.eup %2712  ;;  %v1626_v1 = vmul.f32 %v2711_v56, %v3359_v28  ;;  %v1118_v28 = vadd.f32 %v3438_v3, %v2986_v18  ;;  %v1128_v18 = vadd.f32 %v3438_v3, %v2998_v25  ;;  %v1173_v51 = vadd.f32 %v3048_v54, %v3438_v3 }
 0x33c   : > { %v1627_v60 = vmul.f32 %v2713_v12, %v3361_v40  ;;  %v1168_v57 = vadd.f32 %v3438_v3, %v3054_v58  ;;  %v1183_v49 = vadd.f32 %v3062_v62, %v3438_v3  ;;  %v1178_v36 = vadd.f32 %v3438_v3, %v3068_v2  ;;  %v3570_v12 = vld [vmem:[#allocation3_spill] sm:$0xff] }
 0x33d   : > { %2559 = vmatmul.mubr.msk.f32.gmra.mrb[60].mxu1 %vm1276_vm3, %v1626_v1  ;;  %v1193_v30 = vadd.f32 %v3076_v6, %v3438_v3  ;;  %v1188_v43 = vadd.f32 %v3438_v3, %v3082_v10  ;;  %v1203_v24 = vadd.f32 %v3090_v14, %v3438_v3  ;;  %v1198_v47 = vadd.f32 %v3438_v3, %v3096_v23 }
 0x33e   : > { %v2715_v61 = vpop.eup %2714  ;;  %2561 = vmatprep.mubr.msk.f32.mxu1 %vm1276_vm3, %v1627_v60  ;;  %v1213_v56 = vadd.f32 %v3569_v7, %v3438_v3  ;;  %v1208_v1 = vadd.f32 %v3438_v3, %v3570_v12 }
 0x33f   : > { %v1628_v8 = vmul.f32 %v2715_v61, %v3367_v55 }
 0x341   : > { %2562 = vmatmul.mubr.msk.f32.gmra.mrb[62].mxu1 %vm1276_vm3, %v1628_v8  ;;  %v3571_v8 = vld [vmem:[#allocation4_spill] sm:$0xff] }
 0x3d8   : > { %v2518_v40 = vpop.f32.mrb[32].mxu1 }
 0x3d9   : > { %v1952_v55 = vmul.f32 %v2518_v40, %v1123_v19  ;;  %v1792_v32 = vpop.f32.mrb[33].mxu1  ;;  %v1223_v19 = vadd.f32 %v3571_v8, %v3438_v3 }
 0x3da   : > { %v1951_v9 = vmul.f32 %v1792_v32, %v1118_v28  ;;  %v3572_v28 = vld [vmem:[#allocation5_spill] sm:$0xff] }
 0x3db   : > { %1984 = vst [vmem:[%s3449_s21 + $0x8] sm:$0xff] %v1952_v55  ;;  %v1218_v40 = vadd.f32 %v3438_v3, %v3572_v28 }
 0x3dc   : > { %1983 = vst [vmem:[%s3449_s21] sm:$0xff] %v1951_v9  ;;  %v2521_v26 = vpop.f32.mrb[34].mxu1 }
 0x3dd   : > { %v1954_v17 = vmul.f32 %v2521_v26, %v1133_v16  ;;  %v1802_v4 = vpop.f32.mrb[35].mxu1 }
 0x3de   : > { %v1953_v15 = vmul.f32 %v1802_v4, %v1128_v18  ;;  %v3573_v18 = vld [vmem:[#allocation6_spill] sm:$0xff] }
 0x3df   : > { %1986 = vst [vmem:[%s3449_s21 + $0x18] sm:$0xff] %v1954_v17  ;;  %v1233_v26 = vadd.f32 %v3573_v18, %v3438_v3  ;;  %v3574_v17 = vld [vmem:[#allocation7_spill] sm:$0xff] }
 0x3e0   : > { %1985 = vst [vmem:[%s3449_s21 + $0x10] sm:$0xff] %v1953_v15  ;;  %v2524_v22 = vpop.f32.mrb[36].mxu1  ;;  %v1228_v4 = vadd.f32 %v3438_v3, %v3574_v17 }
 0x3e1   : > { %v1956_v42 = vmul.f32 %v2524_v22, %v1143_v11  ;;  %v1812_v31 = vpop.f32.mrb[37].mxu1 }
 0x3e2   : > { %v1955_v25 = vmul.f32 %v1812_v31, %v1138_v21 }
 0x3e3   : > { %1988 = vst [vmem:[%s3449_s21 + $0x28] sm:$0xff] %v1956_v42  ;;  %v3575_v42 = vld [vmem:[#allocation8_spill] sm:$0xff] }
 0x3e4   : > { %1987 = vst [vmem:[%s3449_s21 + $0x20] sm:$0xff] %v1955_v25  ;;  %v2527_v29 = vpop.f32.mrb[38].mxu1  ;;  %v1243_v31 = vadd.f32 %v3575_v42, %v3438_v3  ;;  %v3576_v25 = vld [vmem:[#allocation9_spill] sm:$0xff] }
 0x3e5   : > { %v1958_v38 = vmul.f32 %v2527_v29, %v1153_v39  ;;  %v1822_v20 = vpop.f32.mrb[39].mxu1  ;;  %v1238_v39 = vadd.f32 %v3438_v3, %v3576_v25 }
 0x3e6   : > { %v1957_v33 = vmul.f32 %v1822_v20, %v1148_v13 }
 0x3e7   : > { %1990 = vst [vmem:[%s3449_s21 + $0x38] sm:$0xff] %v1958_v38 }
 0x3e8   : > { %1989 = vst [vmem:[%s3449_s21 + $0x30] sm:$0xff] %v1957_v33  ;;  %v2530_v37 = vpop.f32.mrb[40].mxu1  ;;  %v3577_v33 = vld [vmem:[#allocation10_spill] sm:$0xff] }
 0x3e9   : > { %v1960_v44 = vmul.f32 %v2530_v37, %v1163_v45  ;;  %v1832_v63 = vpop.f32.mrb[41].mxu1  ;;  %v1253_v45 = vadd.f32 %v3577_v33, %v3438_v3 }
 0x3ea   : > { %v1959_v41 = vmul.f32 %v1832_v63, %v1158_v5  ;;  %v3578_v5 = vld [vmem:[#allocation11_spill] sm:$0xff] }
 0x3eb   : > { %1992 = vst [vmem:[%s3449_s21 + $0x48] sm:$0xff] %v1960_v44  ;;  %v1248_v37 = vadd.f32 %v3438_v3, %v3578_v5 }
 0x3ec   : > { %1991 = vst [vmem:[%s3449_s21 + $0x40] sm:$0xff] %v1959_v41  ;;  %v2533_v46 = vpop.f32.mrb[42].mxu1 }
 0x3ed   : > { %v1962_v27 = vmul.f32 %v2533_v46, %v1173_v51  ;;  %v1842_v34 = vpop.f32.mrb[43].mxu1 }
 0x3ee   : > { %v1961_v50 = vmul.f32 %v1842_v34, %v1168_v57  ;;  %v3579_v57 = vld [vmem:[#allocation12_spill] sm:$0xff] }
 0x3ef   : > { %1994 = vst [vmem:[%s3449_s21 + $0x58] sm:$0xff] %v1962_v27  ;;  %v1263_v46 = vadd.f32 %v3579_v57, %v3438_v3  ;;  %v3580_v27 = vld [vmem:[#allocation13_spill] sm:$0xff] }
 0x3f0   : > { %1993 = vst [vmem:[%s3449_s21 + $0x50] sm:$0xff] %v1961_v50  ;;  %v2536_v54 = vpop.f32.mrb[44].mxu1  ;;  %v1258_v34 = vadd.f32 %v3438_v3, %v3580_v27 }
 0x3f1   : > { %v1964_v35 = vmul.f32 %v2536_v54, %v1183_v49  ;;  %v1852_v53 = vpop.f32.mrb[45].mxu1 }
 0x3f2   : > { %v1963_v58 = vmul.f32 %v1852_v53, %v1178_v36 }
 0x3f3   : > { %1996 = vst [vmem:[%s3449_s21 + $0x68] sm:$0xff] %v1964_v35  ;;  %v3581_v35 = vld [vmem:[#allocation14_spill] sm:$0xff] }
 0x3f4   : > { %1995 = vst [vmem:[%s3449_s21 + $0x60] sm:$0xff] %v1963_v58  ;;  %v2539_v62 = vpop.f32.mrb[46].mxu1  ;;  %v1273_v53 = vadd.f32 %v3581_v35, %v3438_v3  ;;  %v3582_v58 = vld [vmem:[#allocation15_spill] sm:$0xff] }
 0x3f5   : > { %v1966_v0 = vmul.f32 %v2539_v62, %v1193_v30  ;;  %v1862_v48 = vpop.f32.mrb[47].mxu1  ;;  %v1268_v30 = vadd.f32 %v3438_v3, %v3582_v58 }
 0x3f6   : > { %v1965_v2 = vmul.f32 %v1862_v48, %v1188_v43 }
 0x3f7   : > { %1998 = vst [vmem:[%s3449_s21 + $0x78] sm:$0xff] %v1966_v0 }
 0x3f8   : > { %1997 = vst [vmem:[%s3449_s21 + $0x70] sm:$0xff] %v1965_v2  ;;  %v2542_v6 = vpop.f32.mrb[48].mxu1 }
 0x3f9   : > { %v1968_v52 = vmul.f32 %v2542_v6, %v1203_v24  ;;  %v1872_v59 = vpop.f32.mrb[49].mxu1 }
 0x3fa   : > { %v1967_v10 = vmul.f32 %v1872_v59, %v1198_v47 }
 0x3fb   : > { %2000 = vst [vmem:[%s3449_s21 + $0x88] sm:$0xff] %v1968_v52 }
 0x3fc   : > { %1999 = vst [vmem:[%s3449_s21 + $0x80] sm:$0xff] %v1967_v10  ;;  %v2545_v14 = vpop.f32.mrb[50].mxu1 }
 0x3fd   : > { %v1970_v60 = vmul.f32 %v2545_v14, %v1213_v56  ;;  %v1882_v61 = vpop.f32.mrb[51].mxu1 }
 0x3fe   : > { %v1969_v23 = vmul.f32 %v1882_v61, %v1208_v1 }
 0x3ff   : > { %2002 = vst [vmem:[%s3449_s21 + $0x98] sm:$0xff] %v1970_v60 }
 0x400   : > { %2001 = vst [vmem:[%s3449_s21 + $0x90] sm:$0xff] %v1969_v23  ;;  %v2548_v55 = vpop.f32.mrb[52].mxu1 }
 0x401   : > { %v1972_v32 = vmul.f32 %v2548_v55, %v1223_v19  ;;  %v1892_v9 = vpop.f32.mrb[53].mxu1 }
 0x402   : > { %v1971_v16 = vmul.f32 %v1892_v9, %v1218_v40 }
 0x403   : > { %2004 = vst [vmem:[%s3449_s21 + $0xa8] sm:$0xff] %v1972_v32 }
 0x404   : > { %2003 = vst [vmem:[%s3449_s21 + $0xa0] sm:$0xff] %v1971_v16  ;;  %v2551_v15 = vpop.f32.mrb[54].mxu1 }
 0x405   : > { %v1974_v11 = vmul.f32 %v2551_v15, %v1233_v26  ;;  %v1902_v21 = vpop.f32.mrb[55].mxu1 }
 0x406   : > { %v1973_v22 = vmul.f32 %v1902_v21, %v1228_v4 }
 0x407   : > { %2006 = vst [vmem:[%s3449_s21 + $0xb8] sm:$0xff] %v1974_v11 }
 0x408   : > { %2005 = vst [vmem:[%s3449_s21 + $0xb0] sm:$0xff] %v1973_v22  ;;  %v2554_v13 = vpop.f32.mrb[56].mxu1 }
 0x409   : > { %v1976_v29 = vmul.f32 %v2554_v13, %v1243_v31  ;;  %v1912_v38 = vpop.f32.mrb[57].mxu1 }
 0x40a   : > { %v1975_v20 = vmul.f32 %v1912_v38, %v1238_v39 }
 0x40b   : > { %2008 = vst [vmem:[%s3449_s21 + $0xc8] sm:$0xff] %v1976_v29 }
 0x40c   : > { %2007 = vst [vmem:[%s3449_s21 + $0xc0] sm:$0xff] %v1975_v20  ;;  %v2557_v44 = vpop.f32.mrb[58].mxu1 }
 0x40d   : > { %v1978_v63 = vmul.f32 %v2557_v44, %v1253_v45  ;;  %v1922_v41 = vpop.f32.mrb[59].mxu1 }
 0x40e   : > { %v1977_v51 = vmul.f32 %v1922_v41, %v1248_v37 }
 0x40f   : > { %2010 = vst [vmem:[%s3449_s21 + $0xd8] sm:$0xff] %v1978_v63 }
 0x410   : > { %2009 = vst [vmem:[%s3449_s21 + $0xd0] sm:$0xff] %v1977_v51  ;;  %v2560_v50 = vpop.f32.mrb[60].mxu1 }
 0x411   : > { %v1980_v49 = vmul.f32 %v2560_v50, %v1263_v46  ;;  %v1932_v36 = vpop.f32.mrb[61].mxu1 }
 0x412   : > { %v1979_v54 = vmul.f32 %v1932_v36, %v1258_v34 }
 0x413   : > { %2012 = vst [vmem:[%s3449_s21 + $0xe8] sm:$0xff] %v1980_v49 }
 0x414   : > { %2011 = vst [vmem:[%s3449_s21 + $0xe0] sm:$0xff] %v1979_v54  ;;  %v2563_v43 = vpop.f32.mrb[62].mxu1 }
 0x415   : > { %v1982_v62 = vmul.f32 %v2563_v43, %v1273_v53  ;;  %v1942_v0 = vpop.f32.mrb[63].mxu1 }
 0x416   : > { %v1981_v48 = vmul.f32 %v1942_v0, %v1268_v30 }
 0x417   : > { %2014 = vst [vmem:[%s3449_s21 + $0xf8] sm:$0xff] %v1982_v62 }
 0x418   : > { %2013 = vst [vmem:[%s3449_s21 + $0xf0] sm:$0xff] %v1981_v48 }
 0x419 PF: > { %s18_s27 = sadd.s32 1, %s2722_s27  }
 0x41a   : > { %p15_p4 = scmp.ge.s32.totalorder %s18_s27, 6  }
 0x41c   :  { %17 = sbr.rel (!%p15_p4) target bundleno = 1 (0x1), region = 82 }

// kernel: _lambda_.4
= control target key start
LH: loop header
LB: loop body
LE: loop exit
PB: predicated region body
PF: predicated region fallthrough
CT: control target
= control target key end

     0   :  { %s1605_s9 = smov 0   ;;  %s1607_s10 = smov 0   ;;  %s2743_s0 = inlined_call_operand.vmem [shape: s32[2,1,4096], index: 0, kind: input, shape index: {}]   ;;  %s2744_s1 = inlined_call_operand.vmem [shape: bf16[2,16,4096], index: 1, kind: input, shape index: {}]   ;;  %s2745_s2 = inlined_call_operand.vmem [shape: f32[2,16,256], index: 2, kind: output, shape index: {}]  }
   0x1   :  { %s1609_s11 = smov 0   ;;  %s1611_s12 = smov 0  }
   0x2   :  { %s1613_s13 = smov 0   ;;  %s1615_s14 = smov 0  }
   0x3   :  { %s1617_s15 = smov 0   ;;  %s1619_s16 = smov 0  }
   0x4   :  { %s1621_s17 = smov 0   ;;  %s1623_s18 = smov 0  }
   0x5   :  { %s1625_s19 = smov 0  }
   0x6 LB: > { %s24_s20 = sadd.s32 1, %s1575_s16  ;;  %s27_s21 = sadd.s32 1, %s1579_s17  ;;  %s1587_s19 = sphi %s1625_s19, %s12_s19   ;;  %s1583_s18 = sphi %s1623_s18, %s2942_s18   ;;  %s1579_s17 = sphi %s1621_s17, %s2941_s17   ;;  %s1575_s16 = sphi %s1619_s16, %s2940_s16   ;;  %s1571_s15 = sphi %s1617_s15, %s2939_s15   ;;  %s1567_s14 = sphi %s1615_s14, %s2938_s14   ;;  %s1563_s13 = sphi %s1613_s13, %s2937_s13   ;;  %s1559_s12 = sphi %s1611_s12, %s2936_s12   ;;  %s1555_s11 = sphi %s1609_s11, %s2935_s11   ;;  %s1551_s10 = sphi %s1607_s10, %s2934_s10   ;;  %s1547_s9 = sphi %s1605_s9, %s2933_s9  }
   0x7   : > { %p25_p0 = scmp.ge.s32.totalorder %s24_s20, 4  ;;  %s1117_s22 = sadd.s32 4294967295, %s1587_s19  }
   0x8   : > { %s31_s23 = sadd.s32 1, %s1583_s18  ;;  %p75_p1 = scmp.ne.s32.totalorder %s1559_s12, %s1555_s11 }
   0x9   : > { %s2944_s21 = smov (!%p25_p0, %s27_s21), %s1579_s17  ;;  %p76_p3 = scmp.eq.s32.totalorder %s1587_s19, 0 }
   0xa   : > { %p29_p2 = scmp.ge.s32.totalorder %s2944_s21, 2  ;;  %s2946_s20 = smov (%p25_p0, %s24_s20), 0 }
   0xb   : > { %p1673_p4 = por %p76_p3, %p75_p1  ;;  %p106_p5 = scmp.ne.s32.totalorder %s1551_s10, %s1547_s9 }
   0xc   : > { %s2948_s21 = smov (%p29_p2, %s2944_s21), 0  ;;  %s2950_s23 = smov (!%p29_p2, %s31_s23), %s1583_s18 }
   0xd   : > { %p33_p6 = scmp.ge.s32.totalorder %s2950_s23, 2  ;;  %p107_p7 = scmp.eq.s32.totalorder %s1117_s22, 15 }
   0xe   : > { %s64_s25 = ssub.s32 %s1575_s16, %s2946_s20  ;;  %s92_s26 = ssub.s32 %s1579_s17, %s2948_s21 }
   0xf   : > { %s2952_s23 = smov (%p33_p6, %s2950_s23), 0  ;;  %s68_s27 = sadd.s32 1, %s1559_s12 }
  0x10   : > { %p1686_p8 = por %p107_p7, %p106_p5  ;;  %s63_s29 = ssub.s32 %s1583_s18, %s2952_s23 }
  0x11   : > { %s96_s30 = sadd.s32 1, %s1551_s10  ;;  %s65_s3 = sor.u32 %s64_s25, %s63_s29 }
  0x12   : > { %s93_s4 = sor.u32 %s92_s26, %s63_s29  ;;  %p66_p9 = scmp.eq.s32.totalorder %s65_s3, 0 }
  0x13   : > { %p94_p10 = scmp.eq.s32.totalorder %s93_s4, 0  ;;  %p1120_p11 = scmp.ge.s32.totalorder %s1587_s19, 16 }
  0x14   : > { %s1694_s5 = scalar_select %p66_p9, %s1559_s12, %s68_s27  }
  0x15   : > { %s1697_s6 = scalar_select %p94_p10, %s1551_s10, %s96_s30  }
  0x16   : > { %129 = sbr.rel (%p1120_p11) target bundleno = 40 (0x28), region = 16 }
  0x1d   : > { %144 = sbr.rel (!%p1673_p4) target bundleno = 40 (0x28), region = 24  ;;  %s146_s7 = sand.u32 (%p1673_p4), 1, %s1559_s12  }
  0x1e   : > { %s1122_s8 = sshll.u32 (%p1673_p4), %s1575_s16, 3  ;;  %s1121_s22 = sshll.u32 (%p1673_p4), %s146_s7, 6 }
  0x1f   : > { %s1123_s25 = sshll.u32 (%p1673_p4), %s1583_s18, 6  ;;  %s148_s4 = scalar_lea.vmem (%p1673_p4), [#allocation2], %s1121_s22 }
  0x20   : > { %s151_s26 = sadd.s32 (%p1673_p4), %s1123_s25, %s1122_s8 }
  0x21   : > { %s1124_s29 = sshll.u32 (%p1673_p4), %s151_s26, 2 }
  0x22   : > { %s153_s30 = scalar_lea.vmem (%p1673_p4), %s2744_s1, %s1124_s29 }
  0x23   : > { %v166_v0 = vld [vmem:[%s153_s30] sm:$0xff] (%p1673_p4)  ;;  %v168_v1 = vld [vmem:[%s153_s30 + $0x8] sm:$0xff] (%p1673_p4)  ;;  %v170_v2 = vld [vmem:[%s153_s30 + $0x10] sm:$0xff] (%p1673_p4) }
  0x24   : > { %167 = vst [vmem:[%s148_s4] sm:$0xff] %v166_v0  ;;  %169 = vst [vmem:[%s148_s4 + $0x8] sm:$0xff] %v168_v1  ;;  %v172_v3 = vld [vmem:[%s153_s30 + $0x18] sm:$0xff]  ;;  %v174_v4 = vld [vmem:[%s153_s30 + $0x80] sm:$0xff] }
  0x25   : > { %171 = vst [vmem:[%s148_s4 + $0x10] sm:$0xff] %v170_v2  ;;  %v176_v5 = vld [vmem:[%s153_s30 + $0x88] sm:$0xff]  ;;  %173 = vst [vmem:[%s148_s4 + $0x18] sm:$0xff] %v172_v3  ;;  %v178_v6 = vld [vmem:[%s153_s30 + $0x90] sm:$0xff] }
  0x26   : > { %175 = vst [vmem:[%s148_s4 + $0x20] sm:$0xff] %v174_v4  ;;  %177 = vst [vmem:[%s148_s4 + $0x28] sm:$0xff] %v176_v5  ;;  %v180_v7 = vld [vmem:[%s153_s30 + $0x98] sm:$0xff] }
  0x27   : > { %179 = vst [vmem:[%s148_s4 + $0x30] sm:$0xff] %v178_v6  ;;  %181 = vst [vmem:[%s148_s4 + $0x38] sm:$0xff] %v180_v7 }
  0x28 PF: > { %p1125_p12 = scmp.ge.s32.totalorder %s1587_s19, 1  ;;  %p186_p13 = scmp.lt.s32.totalorder %s1587_s19, 17 }
  0x2a   : > { %p187_p0 = pnand %p1125_p12, %p186_p13 }
  0x2b   : > { %s218_s24 = sand.u32 (!%p187_p0), 1, %s1547_s9   ;;  %s1128_s7 = sshll.u32 (!%p187_p0), %s1563_s13, 3  ;;  %v241_v8 = vlaneseq (!%p187_p0)  ;;  %v1589_v29 = vmov (!%p187_p0), 1.0|1.0   ;;  %v2843_v44 = vmov (!%p187_p0), 0  ;;  %v2847_v46 = vmov (!%p187_p0), 0 }
  0x2c   : > { %190 = sbr.rel (%p187_p0) target bundleno = 434 (0x1b2), region = 47  ;;  %s1712_s8 = sshll.u32 (!%p187_p0), %s218_s24, 4  ;;  %v2866_v49 = vmov (!%p187_p0), 0  ;;  %v2871_v52 = vmov (!%p187_p0), 0 }
  0x2d   : > { %p222_p1 = scmp.lt.s32.totalorder (!%p187_p0), %s1571_s15, 1  ;;  %p224_p2 = scmp.lt.s32.totalorder (!%p187_p0), %s1128_s7, 31  ;;  %v1715_v9 = vshrl.u32 (!%p187_p0), %v241_v8, 7 }
  0x2e   : > { %s1130_s26 = sshll.u32 (!%p187_p0), %s1567_s14, 7  ;;  %s193_s30 = sand.u32 (!%p187_p0), 1, %s1555_s11  }
  0x2f   : > { %v243_v10 = vadd.s32 (!%p187_p0), 8, %v1715_v9  ;;  %v282_v11 = vsub.s32 (!%p187_p0), 1, %v1715_v9  ;;  %v298_v12 = vsub.s32 (!%p187_p0), 5, %v1715_v9  ;;  %v278_v13 = vsub.s32 (!%p187_p0), 0, %v1715_v9  ;;  %s1126_s11 = sshll.u32 (!%p187_p0), %s193_s30, 6  ;;  %s220_s24 = scalar_lea.vmem (!%p187_p0), [#allocation3], %s1712_s8 }
  0x30   : > { %v294_v14 = vsub.s32 (!%p187_p0), 4, %v1715_v9  ;;  %v244_v15 = vadd.s32 (!%p187_p0), 16, %v1715_v9  ;;  %v245_v16 = vadd.s32 (!%p187_p0), 24, %v1715_v9  ;;  %v1726_v17 = vstv (!%p187_p0), %s1130_s26  ;;  %s1827_s4 = scalar_lea.vmem (!%p187_p0), [#allocation2], %s1126_s11  ;;  %p1395_p3 = scmp.ne.s32.totalorder (!%p187_p0), %s1563_s13, 0 }
  0x31   : > { %v1733_v18 = vadd.s32 (!%p187_p0), %v1726_v17, %v1715_v9  ;;  %v1736_v19 = vadd.s32 (!%p187_p0), %v1726_v17, %v243_v10  ;;  %v246_v27 = vadd.s32 (!%p187_p0), 32, %v1715_v9  ;;  %v247_v28 = vadd.s32 (!%p187_p0), 40, %v1715_v9  ;;  %v1830_v38 = vld [vmem:[%s1827_s4] sm:$0xff] (!%p187_p0)  ;;  %v1877_v47 = vld [vmem:[%s1827_s4 + $0x10] sm:$0xff] (!%p187_p0)  ;;  %v234_v63 = vld [vmem:[%s1827_s4 + $0x8] sm:$0xff] (!%p187_p0) }
  0x32   : > { %v1741_v21 = vadd.s32 (!%p187_p0), %v1726_v17, %v244_v15  ;;  %v1744_v22 = vadd.s32 (!%p187_p0), %v1726_v17, %v245_v16  ;;  %v248_v32 = vadd.s32 (!%p187_p0), 48, %v1715_v9  ;;  %v249_v33 = vadd.s32 (!%p187_p0), 56, %v1715_v9  ;;  %v1833_v39 = vld [vmem:[%s1827_s4 + $0x20] sm:$0xff] (!%p187_p0)  ;;  %v1880_v48 = vld [vmem:[%s1827_s4 + $0x30] sm:$0xff] (!%p187_p0) }
  0x33   : > { %s223_s22 = scalar_select %p222_p1, %s1571_s15, 1  ;;  %v1787_v30 = vadd.s32 %v1726_v17, %v246_v27  ;;  %v1790_v31 = vadd.s32 %v1726_v17, %v247_v28  ;;  %v250_v36 = vadd.s32 64, %v1715_v9  ;;  %v251_v37 = vadd.s32 72, %v1715_v9 }
  0x34   : > { %s2954_s7 = smov (!%p224_p2, %s1128_s7), 31  ;;  %v1819_v34 = vadd.s32 %v1726_v17, %v248_v32  ;;  %v1822_v35 = vadd.s32 %v1726_v17, %v249_v33  ;;  %v252_v40 = vadd.s32 80, %v1715_v9  ;;  %v253_v41 = vadd.s32 88, %v1715_v9 }
  0x35   : > { %s1129_s25 = sshll.u32 %s223_s22, 5  ;;  %v1853_v42 = vadd.s32 %v1726_v17, %v250_v36  ;;  %v1260_v43 = vcombine.high %v1830_v38, %v1833_v39  ;;  %v1866_v45 = vadd.s32 %v1726_v17, %v251_v37  ;;  %v254_v53 = vadd.s32 96, %v1715_v9 }
  0x36   : > { %s227_s9 = sadd.s32 %s1129_s25, %s2954_s7  ;;  %v1891_v50 = vadd.s32 %v1726_v17, %v252_v40  ;;  %v1894_v51 = vadd.s32 %v1726_v17, %v253_v41  ;;  %v255_v54 = vadd.s32 104, %v1715_v9  ;;  %v256_v55 = vadd.s32 112, %v1715_v9 }
  0x37   : > { %s228_s27 = scalar_lea.vmem %s2743_s0, %s227_s9  ;;  %828 = vmatprep.mubr.bf16.mxu1 %v1260_v43  ;;  %v1264_v56 = vcombine.high %v1877_v47, %v1880_v48  ;;  %v286_v57 = vsub.s32 2, %v1715_v9  ;;  %v302_v58 = vsub.s32 6, %v1715_v9  ;;  %v257_v59 = vadd.s32 120, %v1715_v9 }
  0x38   : > { %v1738_v20 = vld [vmem:[%s228_s27] sm:$0xff]  ;;  %v290_v0 = vsub.s32 3, %v1715_v9  ;;  %v1994_v2 = vadd.s32 %v1726_v17, %v254_v53  ;;  %v1997_v3 = vadd.s32 %v1726_v17, %v255_v54  ;;  %v2025_v5 = vadd.s32 %v1726_v17, %v256_v55 }
  0x39   : > { %v1747_v23 = vrot.slane %v1738_v20, %v282_v11  ;;  %v1750_v24 = vrot.slane %v1738_v20, %v298_v12  ;;  %v1753_v25 = vrot.slane %v1738_v20, %v278_v13  ;;  %v1756_v26 = vrot.slane %v1738_v20, %v294_v14  ;;  %910 = vmatprep.mubr.bf16.mxu0 %v1264_v56 }
  0x3a   : > { %v1943_v60 = vrot.slane %v1738_v20, %v286_v57  ;;  %v1946_v61 = vrot.slane %v1738_v20, %v302_v58  ;;  %v2028_v6 = vadd.s32 %v1726_v17, %v257_v59  ;;  %v2051_v8 = vrot.slane %v1738_v20, %v290_v0  ;;  %v238_v0 = vld [vmem:[%s1827_s4 + $0x28] sm:$0xff] }
  0x3b   : > { %vm309_vm0 = vcmp.eq.s32.totalorder %v1733_v18, %v1747_v23  ;;  %vm317_vm1 = vcmp.eq.s32.totalorder %v1736_v19, %v1747_v23  ;;  %vm313_vm2 = vcmp.eq.s32.totalorder %v1733_v18, %v1750_v24  ;;  %vm321_vm3 = vcmp.eq.s32.totalorder %v1736_v19, %v1750_v24 }
  0x3c   : > { %vm1267_vm4 = vmpackc.low %vm317_vm1, %vm309_vm0  ;;  %vm308_vm5 = vcmp.eq.s32.totalorder %v1733_v18, %v1753_v25  ;;  %vm316_vm6 = vcmp.eq.s32.totalorder %v1736_v19, %v1753_v25  ;;  %vm312_vm7 = vcmp.eq.s32.totalorder %v1733_v18, %v1756_v26  ;;  %vm320_vm8 = vcmp.eq.s32.totalorder %v1736_v19, %v1756_v26 }
  0x3d   : > { %1268 = vmatprep.subr.msk.bf16.mxu1 %vm1267_vm4, %v1589_v29  ;;  %vm1331_vm9 = vmpackc.low %vm321_vm3, %vm313_vm2  ;;  %vm325_vm10 = vcmp.eq.s32.totalorder %v1741_v21, %v1747_v23  ;;  %vm333_vm11 = vcmp.eq.s32.totalorder %v1744_v22, %v1747_v23  ;;  %vm329_vm13 = vcmp.eq.s32.totalorder %v1741_v21, %v1750_v24  ;;  %vm337_vm14 = vcmp.eq.s32.totalorder %v1744_v22, %v1750_v24 }
  0x3e   : > { %1332 = vmatprep.subr.msk.bf16.mxu0 %vm1331_vm9, %v1589_v29  ;;  %vm1269_vm12 = vmpackc.low %vm316_vm6, %vm308_vm5  ;;  %vm324_vm1 = vcmp.eq.s32.totalorder %v1741_v21, %v1753_v25  ;;  %vm332_vm2 = vcmp.eq.s32.totalorder %v1744_v22, %v1753_v25  ;;  %vm328_vm4 = vcmp.eq.s32.totalorder %v1741_v21, %v1756_v26  ;;  %vm336_vm5 = vcmp.eq.s32.totalorder %v1744_v22, %v1756_v26 }
  0x3f   : > { %1270 = vmatpush1.bf16.xpose.msk.msra.mxu1 %vm1269_vm12, %v1589_v29  ;;  %vm1333_vm15 = vmpackc.low %vm320_vm8, %vm312_vm7  ;;  %vm341_vm6 = vcmp.eq.s32.totalorder %v1787_v30, %v1747_v23  ;;  %vm349_vm7 = vcmp.eq.s32.totalorder %v1790_v31, %v1747_v23  ;;  %vm345_vm9 = vcmp.eq.s32.totalorder %v1787_v30, %v1750_v24  ;;  %v306_v10 = vsub.s32 7, %v1715_v9 }
  0x40   : > { %1334 = vmatpush1.bf16.xpose.msk.msra.mxu0 %vm1333_vm15, %v1589_v29  ;;  %vm1271_vm0 = vmpackc.low %vm333_vm11, %vm325_vm10  ;;  %vm353_vm10 = vcmp.eq.s32.totalorder %v1790_v31, %v1750_v24  ;;  %vm348_vm15 = vcmp.eq.s32.totalorder %v1790_v31, %v1753_v25  ;;  %v2780_v15 = vmov 0  ;;  %v2782_v16 = vmov 0 }
  0x41   : > { %1272 = vmatprep.subr.msk.bf16.mxu1 %vm1271_vm0, %v1589_v29  ;;  %vm1335_vm3 = vmpackc.low %vm337_vm14, %vm329_vm13  ;;  %vm340_vm14 = vcmp.eq.s32.totalorder %v1787_v30, %v1753_v25  ;;  %vm344_vm0 = vcmp.eq.s32.totalorder %v1787_v30, %v1756_v26  ;;  %v2128_v14 = vrot.slane %v1738_v20, %v306_v10  ;;  %v2784_v17 = vmov 0 }
  0x42   : > { %1336 = vmatprep.subr.msk.bf16.mxu0 %vm1335_vm3, %v1589_v29  ;;  %vm1273_vm8 = vmpackc.low %vm332_vm2, %vm324_vm1  ;;  %vm352_vm1 = vcmp.eq.s32.totalorder %v1790_v31, %v1756_v26  ;;  %vm357_vm2 = vcmp.eq.s32.totalorder %v1819_v34, %v1747_v23  ;;  %vm365_vm3 = vcmp.eq.s32.totalorder %v1822_v35, %v1747_v23  ;;  %v2788_v20 = vmov 0 }
  0x43   : > { %vm1337_vm11 = vmpackc.low %vm336_vm5, %vm328_vm4  ;;  %vm361_vm5 = vcmp.eq.s32.totalorder %v1819_v34, %v1750_v24  ;;  %v2792_v27 = vmov 0  ;;  %v2795_v28 = vmov 0  ;;  %v2799_v32 = vmov 0 }
  0x44   : > { %vm1275_vm12 = vmpackc.low %vm349_vm7, %vm341_vm6  ;;  %vm369_vm6 = vcmp.eq.s32.totalorder %v1822_v35, %v1750_v24  ;;  %v2803_v33 = vmov 0  ;;  %v2811_v36 = vmov 0  ;;  %v2822_v37 = vmov 0 }
  0x45   : > { %vm1339_vm13 = vmpackc.low %vm353_vm10, %vm345_vm9  ;;  %vm364_vm9 = vcmp.eq.s32.totalorder %v1822_v35, %v1753_v25  ;;  %v2824_v40 = vmov 0  ;;  %v2828_v41 = vmov 0  ;;  %v2832_v43 = vmov 0 }
  0x46   : > { %vm1857_vm4 = vmpackc.low %vm348_vm15, %vm340_vm14  ;;  %vm373_vm14 = vcmp.eq.s32.totalorder %v1853_v42, %v1747_v23  ;;  %vm381_vm15 = vcmp.eq.s32.totalorder %v1866_v45, %v1747_v23  ;;  %v2875_v53 = vmov 0  ;;  %v1259_v59 = vcombine.low %v1830_v38, %v1833_v39  ;;  %v236_v39 = vld [vmem:[%s1827_s4 + $0x18] sm:$0xff] }
  0x47   : > { %1274 = vmatpush1.bf16.xpose.msk.msra.mxu1 %vm1273_vm8, %v1589_v29  ;;  %vm1868_vm7 = vmpackc.low %vm352_vm1, %vm344_vm0  ;;  %vm356_vm8 = vcmp.eq.s32.totalorder %v1819_v34, %v1753_v25  ;;  %vm377_vm0 = vcmp.eq.s32.totalorder %v1853_v42, %v1750_v24  ;;  %vm385_vm1 = vcmp.eq.s32.totalorder %v1866_v45, %v1750_v24  ;;  %v1263_v1 = vcombine.low %v1877_v47, %v1880_v48 }
  0x48   : > { %1338 = vmatpush1.bf16.xpose.msk.msra.mxu0 %vm1337_vm11, %v1589_v29  ;;  %1276 = vmatprep.subr.msk.bf16.mxu1 %vm1275_vm12, %v1589_v29  ;;  %vm1882_vm10 = vmpackc.low %vm365_vm3, %vm357_vm2  ;;  %vm360_vm11 = vcmp.eq.s32.totalorder %v1819_v34, %v1756_v26  ;;  %vm368_vm12 = vcmp.eq.s32.totalorder %v1822_v35, %v1756_v26  ;;  %vm372_vm2 = vcmp.eq.s32.totalorder %v1853_v42, %v1753_v25 }
  0x49   : > { %1340 = vmatprep.subr.msk.bf16.mxu0 %vm1339_vm13, %v1589_v29  ;;  %vm1896_vm13 = vmpackc.low %vm369_vm6, %vm361_vm5  ;;  %vm380_vm3 = vcmp.eq.s32.totalorder %v1866_v45, %v1753_v25  ;;  %vm413_vm5 = vcmp.eq.s32.totalorder %v1997_v3, %v1747_v23  ;;  %vm2779_vm6 = vcmp.eq.s32.totalorder %v1891_v50, %v1756_v26  ;;  %v1261_v47 = vcombine.low %v234_v63, %v238_v0 }
  0x4f   : > { %1278 = vmatpush1.bf16.xpose.msk.msra.mxu1 %vm1857_vm4, %v1589_v29  ;;  %vm376_vm4 = vcmp.eq.s32.totalorder %v1853_v42, %v1756_v26 }
  0x50   : > { %1342 = vmatpush1.bf16.xpose.msk.msra.mxu0 %vm1868_vm7, %v1589_v29  ;;  %1280 = vmatprep.subr.msk.bf16.mxu1 %vm1882_vm10, %v1589_v29  ;;  %vm401_vm7 = vcmp.eq.s32.totalorder %v1894_v51, %v1750_v24  ;;  %vm388_vm10 = vcmp.eq.s32.totalorder %v1891_v50, %v1753_v25 }
  0x51   : > { %1344 = vmatprep.subr.msk.bf16.mxu0 %vm1896_vm13, %v1589_v29  ;;  %vm1954_vm13 = vmpackc.low %vm364_vm9, %vm356_vm8  ;;  %vm400_vm9 = vcmp.eq.s32.totalorder %v1894_v51, %v1756_v26 }
  0x52   : > { %vm1972_vm8 = vmpackc.low %vm368_vm12, %vm360_vm11  ;;  %vm2773_vm12 = vcmp.eq.s32.totalorder %v1891_v50, %v1750_v24 }
  0x53   : > { %vm1989_vm11 = vmpackc.low %vm381_vm15, %vm373_vm14  ;;  %vm2787_vm15 = vcmp.eq.s32.totalorder %v1736_v19, %v1943_v60 }
  0x54   : > { %vm2009_vm14 = vmpackc.low %vm385_vm1, %vm377_vm0  ;;  %vm2769_vm0 = vcmp.eq.s32.totalorder %v1891_v50, %v1747_v23  ;;  %vm2791_vm1 = vcmp.eq.s32.totalorder %v1736_v19, %v1946_v61 }
  0x57   : > { %1282 = vmatpush1.bf16.xpose.msk.msra.mxu1 %vm1954_vm13, %v1589_v29  ;;  %vm2046_vm13 = vmpackc.low %vm380_vm3, %vm372_vm2  ;;  %vm2766_vm2 = vcmp.eq.s32.totalorder %v1866_v45, %v1756_v26 }
  0x58   : > { %1346 = vmatpush1.bf16.xpose.msk.msra.mxu0 %vm1972_vm8, %v1589_v29  ;;  %1284 = vmatprep.subr.msk.bf16.mxu1 %vm1989_vm11, %v1589_v29  ;;  %vm2067_vm3 = vmpackc.low %vm2766_vm2, %vm376_vm4  ;;  %vm405_vm8 = vcmp.eq.s32.totalorder %v1994_v2, %v1747_v23  ;;  %vm2770_vm4 = vcmp.eq.s32.totalorder %v1894_v51, %v1747_v23  ;;  %vm409_vm11 = vcmp.eq.s32.totalorder %v1994_v2, %v1750_v24 }
  0x59   : > { %1348 = vmatprep.subr.msk.bf16.mxu0 %vm2009_vm14, %v1589_v29  ;;  %vm2085_vm2 = vmpackc.low %vm2770_vm4, %vm2769_vm0  ;;  %vm417_vm4 = vcmp.eq.s32.totalorder %v1997_v3, %v1750_v24  ;;  %vm327_vm14 = vcmp.eq.s32.totalorder %v1741_v21, %v2051_v8 }
  0x5a   : > { %vm2103_vm0 = vmpackc.low %vm401_vm7, %vm2773_vm12  ;;  %vm2776_vm7 = vcmp.eq.s32.totalorder %v1894_v51, %v1753_v25 }
  0x5b   : > { %vm2121_vm12 = vmpackc.low %vm2776_vm7, %vm388_vm10 }
  0x5c   : > { %vm2140_vm10 = vmpackc.low %vm400_vm9, %vm2779_vm6  ;;  %vm2790_vm9 = vcmp.eq.s32.totalorder %v1733_v18, %v1946_v61 }
  0x5d   : > { %v2781_v15 = vsel %vm2140_vm10, 4294967295, %v2780_v15  ;;  %vm2150_vm7 = vmpackc.low %vm413_vm5, %vm405_vm8  ;;  %vm2786_vm8 = vcmp.eq.s32.totalorder %v1733_v18, %v1943_v60 }
  0x5e   : > { %v2783_v16 = vsel %vm2150_vm7, 4294967295, %v2782_v16  ;;  %vm2168_vm5 = vmpackc.low %vm417_vm4, %vm409_vm11  ;;  %vm2813_vm7 = vcmp.eq.s32.totalorder %v1787_v30, %v2051_v8 }
  0x5f   : > { %v2785_v17 = vsel %vm2168_vm5, 4294967295, %v2784_v17  ;;  %vm2178_vm6 = vmpackc.low %vm2787_vm15, %vm2786_vm8  ;;  %1286 = vmatpush1.bf16.xpose.msk.msra.mxu1 %vm2046_vm13, %v1589_v29  ;;  %vm2802_vm15 = vcmp.eq.s32.totalorder %v1744_v22, %v1943_v60  ;;  %vm347_vm8 = vcmp.eq.s32.totalorder %v1787_v30, %v2128_v14  ;;  %vm425_vm13 = vcmp.eq.s32.totalorder %v2025_v5, %v1750_v24 }
  0x60   : > { %v2789_v20 = vsel %vm2178_vm6, 4294967295, %v2788_v20  ;;  %vm2203_vm11 = vmpackc.low %vm2791_vm1, %vm2790_vm9  ;;  %1350 = vmatpush1.bf16.xpose.msk.msra.mxu0 %vm2067_vm3, %v1589_v29  ;;  %1288 = vmatprep.subr.msk.bf16.mxu1 %vm2085_vm2, %v1589_v29  ;;  %vm2794_vm9 = vcmp.eq.s32.totalorder %v1744_v22, %v2051_v8  ;;  %vm2797_vm2 = vcmp.eq.s32.totalorder %v1741_v21, %v2128_v14  ;;  %vm2798_vm1 = vcmp.eq.s32.totalorder %v1744_v22, %v2128_v14 }
  0x61   : > { %v2793_v27 = vsel %vm2203_vm11, 4294967295, %v2792_v27  ;;  %vm2225_vm4 = vmpackc.low %vm2794_vm9, %vm327_vm14  ;;  %1352 = vmatprep.subr.msk.bf16.mxu0 %vm2103_vm0, %v1589_v29  ;;  %vm351_vm9 = vcmp.eq.s32.totalorder %v1790_v31, %v2051_v8  ;;  %vm421_vm3 = vcmp.eq.s32.totalorder %v2025_v5, %v1747_v23  ;;  %vm355_vm0 = vcmp.eq.s32.totalorder %v1790_v31, %v2128_v14 }
  0x62   : > { %v2796_v28 = vsel %vm2225_vm4, 4294967295, %v2795_v28  ;;  %vm2242_vm14 = vmpackc.low %vm2798_vm1, %vm2797_vm2  ;;  %vm429_vm1 = vcmp.eq.s32.totalorder %v2028_v6, %v1747_v23  ;;  %vm2801_vm2 = vcmp.eq.s32.totalorder %v1741_v21, %v1943_v60  ;;  %vm433_vm4 = vcmp.eq.s32.totalorder %v2028_v6, %v1750_v24 }
  0x63   : > { %v2800_v32 = vsel %vm2242_vm14, 4294967295, %v2799_v32  ;;  %vm2264_vm14 = vmpackc.low %vm2802_vm15, %vm2801_vm2  ;;  %vm2805_vm11 = vcmp.eq.s32.totalorder %v1741_v21, %v1946_v61  ;;  %vm2806_vm15 = vcmp.eq.s32.totalorder %v1744_v22, %v1946_v61  ;;  %v2807_v23 = vmov 0 }
  0x64   : > { %v2804_v33 = vsel %vm2264_vm14, 4294967295, %v2803_v33  ;;  %vm2282_vm2 = vmpackc.low %vm2806_vm15, %vm2805_vm11  ;;  %vm2809_vm14 = vcmp.eq.s32.totalorder %v1994_v2, %v1753_v25  ;;  %vm2810_vm6 = vcmp.eq.s32.totalorder %v1997_v3, %v1753_v25  ;;  %v2814_v21 = vmov 0 }
  0x65   : > { %v2808_v23 = vsel %vm2282_vm2, 4294967295, %v2807_v23  ;;  %vm2292_vm5 = vmpackc.low %vm2810_vm6, %vm2809_vm14  ;;  %vm2816_vm11 = vcmp.eq.s32.totalorder %v1994_v2, %v1756_v26  ;;  %vm2817_vm15 = vcmp.eq.s32.totalorder %v1997_v3, %v1756_v26  ;;  %v2818_v22 = vmov 0 }
  0x66   : > { %v2812_v36 = vsel %vm2292_vm5, 4294967295, %v2811_v36  ;;  %vm2299_vm10 = vmpackc.low %vm351_vm9, %vm2813_vm7  ;;  %v2820_v24 = vmov 0  ;;  %vm359_vm7 = vcmp.eq.s32.totalorder %v1819_v34, %v2051_v8  ;;  %vm367_vm9 = vcmp.eq.s32.totalorder %v1822_v35, %v2051_v8 }
  0x67   : > { %v2815_v21 = vsel %vm2299_vm10, 4294967295, %v2814_v21  ;;  %vm2309_vm2 = vmpackc.low %vm2817_vm15, %vm2816_vm11  ;;  %vm371_vm11 = vcmp.eq.s32.totalorder %v1822_v35, %v2128_v14  ;;  %1290 = vmatpush1.bf16.xpose.msk.msra.mxu1 %vm2121_vm12, %v1589_v29  ;;  %vm379_vm12 = vcmp.eq.s32.totalorder %v1853_v42, %v2128_v14 }
  0x68   : > { %v2819_v22 = vsel %vm2309_vm2, 4294967295, %v2818_v22  ;;  %vm2313_vm6 = vmpackc.low %vm429_vm1, %vm421_vm3  ;;  %vm2826_vm3 = vcmp.eq.s32.totalorder %v1787_v30, %v1943_v60  ;;  %vm2827_vm1 = vcmp.eq.s32.totalorder %v1790_v31, %v1943_v60 }
  0x69   : > { %v2821_v24 = vsel %vm2313_vm6, 4294967295, %v2820_v24  ;;  %vm2317_vm14 = vmpackc.low %vm355_vm0, %vm347_vm8  ;;  %vm363_vm0 = vcmp.eq.s32.totalorder %v1819_v34, %v2128_v14  ;;  %vm2850_vm6 = vcmp.eq.s32.totalorder %v2028_v6, %v1753_v25 }
  0x6a   : > { %v2823_v37 = vsel %vm2317_vm14, 4294967295, %v2822_v37  ;;  %vm2325_vm10 = vmpackc.low %vm433_vm4, %vm425_vm13  ;;  %vm2830_vm4 = vcmp.eq.s32.totalorder %v1787_v30, %v1946_v61  ;;  %vm2831_vm13 = vcmp.eq.s32.totalorder %v1790_v31, %v1946_v61  ;;  %v2836_v30 = vmov 0 }
  0x6b   : > { %v2825_v40 = vsel %vm2325_vm10, 4294967295, %v2824_v40  ;;  %vm2335_vm8 = vmpackc.low %vm2827_vm1, %vm2826_vm3  ;;  %vm2834_vm3 = vnez %v2781_v15  ;;  %vm2835_vm1 = vnez %v2783_v16  ;;  %v2839_v31 = vmov 0 }
  0x6c   : > { %v2829_v41 = vsel %vm2335_vm8, 4294967295, %v2828_v41  ;;  %vm2352_vm15 = vmpackc.low %vm2831_vm13, %vm2830_vm4  ;;  %1354 = vmatpush1.bf16.xpose.msk.msra.mxu0 %vm2834_vm3, %v1589_v29  ;;  %1292 = vmatprep.subr.msk.bf16.mxu1 %vm2835_vm1, %v1589_v29  ;;  %vm2838_vm4 = vnez %v2785_v17  ;;  %vm432_vm3 = vcmp.eq.s32.totalorder %v2028_v6, %v1756_v26  ;;  %vm311_vm8 = vcmp.eq.s32.totalorder %v1733_v18, %v2051_v8 }
  0x6d   : > { %v2833_v43 = vsel %vm2352_vm15, 4294967295, %v2832_v43  ;;  %vm2366_vm14 = vmpackc.low %vm367_vm9, %vm359_vm7  ;;  %1356 = vmatprep.subr.msk.bf16.mxu0 %vm2838_vm4, %v1589_v29  ;;  %vm375_vm7 = vcmp.eq.s32.totalorder %v1853_v42, %v2051_v8  ;;  %vm383_vm9 = vcmp.eq.s32.totalorder %v1866_v45, %v2051_v8  ;;  %vm319_vm4 = vcmp.eq.s32.totalorder %v1736_v19, %v2051_v8 }
  0x6e   : > { %v2837_v30 = vsel %vm2366_vm14, 4294967295, %v2836_v30  ;;  %vm2377_vm1 = vmpackc.low %vm371_vm11, %vm363_vm0  ;;  %vm2841_vm13 = vcmp.eq.s32.totalorder %v1819_v34, %v1943_v60  ;;  %vm2842_vm0 = vcmp.eq.s32.totalorder %v1822_v35, %v1943_v60  ;;  %vm315_vm14 = vcmp.eq.s32.totalorder %v1733_v18, %v2128_v14 }
  0x6f   : > { %v2840_v31 = vsel %vm2377_vm1, 4294967295, %v2839_v31  ;;  %vm2395_vm11 = vmpackc.low %vm2842_vm0, %vm2841_vm13  ;;  %vm387_vm1 = vcmp.eq.s32.totalorder %v1866_v45, %v2128_v14  ;;  %vm323_vm15 = vcmp.eq.s32.totalorder %v1736_v19, %v2128_v14  ;;  %vm2845_vm10 = vcmp.eq.s32.totalorder %v1819_v34, %v1946_v61 }
  0x70   : > { %v2844_v44 = vsel %vm2395_vm11, 4294967295, %v2843_v44  ;;  %vm2846_vm13 = vcmp.eq.s32.totalorder %v1822_v35, %v1946_v61  ;;  %vm2849_vm11 = vcmp.eq.s32.totalorder %v2025_v5, %v1753_v25  ;;  %vm2427_vm5 = vmpackc.low %vm383_vm9, %vm375_vm7  ;;  %v2860_v25 = vmov 0 }
  0x71   : > { %vm2413_vm0 = vmpackc.low %vm2846_vm13, %vm2845_vm10  ;;  %vm2855_vm10 = vcmp.eq.s32.totalorder %v2025_v5, %v1756_v26  ;;  %vm391_vm7 = vcmp.eq.s32.totalorder %v1891_v50, %v2051_v8  ;;  %vm399_vm9 = vcmp.eq.s32.totalorder %v1894_v51, %v2051_v8 }
  0x72   : > { %v2848_v46 = vsel %vm2413_vm0, 4294967295, %v2847_v46  ;;  %vm2423_vm2 = vmpackc.low %vm2850_vm6, %vm2849_vm11 }
  0x73   : > { %vm2434_vm13 = vmpackc.low %vm432_vm3, %vm2855_vm10  ;;  %vm2865_vm3 = vcmp.eq.s32.totalorder %v1866_v45, %v1943_v60  ;;  %vm2870_vm10 = vcmp.eq.s32.totalorder %v1866_v45, %v1946_v61  ;;  %v2882_v45 = vmov 0 }
  0x74   : > { %vm2438_vm0 = vmpackc.low %vm319_vm4, %vm311_vm8  ;;  %vm2864_vm8 = vcmp.eq.s32.totalorder %v1853_v42, %v1943_v60  ;;  %vm403_vm4 = vcmp.eq.s32.totalorder %v1894_v51, %v2128_v14 }
  0x75   : > { %vm2442_vm6 = vmpackc.low %vm387_vm1, %vm379_vm12  ;;  %vm395_vm1 = vcmp.eq.s32.totalorder %v1891_v50, %v2128_v14 }
  0x76   : > { %v2861_v25 = vsel %vm2442_vm6, 4294967295, %v2860_v25  ;;  %vm2450_vm11 = vmpackc.low %vm323_vm15, %vm315_vm14  ;;  %vm2868_vm14 = vnez %v2812_v36  ;;  %vm2869_vm15 = vcmp.eq.s32.totalorder %v1853_v42, %v1946_v61  ;;  %v2878_v42 = vmov 0 }
  0x77   : > { %vm2460_vm12 = vmpackc.low %vm2865_vm3, %vm2864_vm8  ;;  %1294 = vmatpush1.bf16.xpose.msk.msra.mxu1 %vm2868_vm14, %v1589_v29  ;;  %vm2873_vm3 = vnez %v2819_v22  ;;  %vm2877_vm14 = vnez %v2825_v40 }
  0x78   : > { %v2867_v49 = vsel %vm2460_vm12, 4294967295, %v2866_v49  ;;  %vm2477_vm8 = vmpackc.low %vm2870_vm10, %vm2869_vm15  ;;  %1358 = vmatpush1.bf16.xpose.msk.msra.mxu0 %vm2873_vm3, %v1589_v29  ;;  %vm2874_vm12 = vnez %v2821_v24  ;;  %vm407_vm10 = vcmp.eq.s32.totalorder %v1994_v2, %v2051_v8  ;;  %vm415_vm3 = vcmp.eq.s32.totalorder %v1997_v3, %v2051_v8 }
  0x79   : > { %v2872_v52 = vsel %vm2477_vm8, 4294967295, %v2871_v52  ;;  %1296 = vmatprep.subr.msk.bf16.mxu1 %vm2874_vm12, %v1589_v29  ;;  %vm2487_vm6 = vmpackc.low %vm399_vm9, %vm391_vm7  ;;  %1360 = vmatprep.subr.msk.bf16.mxu0 %vm2877_vm14, %v1589_v29  ;;  %vm2880_vm7 = vcmp.eq.s32.totalorder %v1891_v50, %v1943_v60  ;;  %vm2881_vm9 = vcmp.eq.s32.totalorder %v1894_v51, %v1943_v60  ;;  %vm2884_vm14 = vcmp.eq.s32.totalorder %v1891_v50, %v1946_v61 }
  0x7a   : > { %v2876_v53 = vsel %vm2487_vm6, 4294967295, %v2875_v53  ;;  %vm2494_vm15 = vmpackc.low %vm403_vm4, %vm395_vm1  ;;  %vm411_vm1 = vcmp.eq.s32.totalorder %v1994_v2, %v2128_v14  ;;  %vm419_vm4 = vcmp.eq.s32.totalorder %v1997_v3, %v2128_v14  ;;  %vm431_vm8 = vcmp.eq.s32.totalorder %v2028_v6, %v2051_v8 }
  0x7b   : > { %v2879_v42 = vsel %vm2494_vm15, 4294967295, %v2878_v42  ;;  %vm2508_vm12 = vmpackc.low %vm2881_vm9, %vm2880_vm7  ;;  %vm2885_vm15 = vcmp.eq.s32.totalorder %v1894_v51, %v1946_v61  ;;  %v2894_v50 = vmov 0 }
  0x7c   : > { %v2883_v45 = vsel %vm2508_vm12, 4294967295, %v2882_v45  ;;  %vm2522_vm6 = vmpackc.low %vm2885_vm15, %vm2884_vm14  ;;  %vm423_vm12 = vcmp.eq.s32.totalorder %v2025_v5, %v2051_v8  ;;  %vm2892_vm15 = vcmp.eq.s32.totalorder %v1994_v2, %v1943_v60  ;;  %vm2896_vm14 = vcmp.eq.s32.totalorder %v1994_v2, %v1946_v61 }
  0x7d   : > { %vm2526_vm7 = vmpackc.low %vm415_vm3, %vm407_vm10  ;;  %vm2893_vm10 = vcmp.eq.s32.totalorder %v1997_v3, %v1943_v60  ;;  %v1262_v2 = vcombine.high %v234_v63, %v238_v0 }
  0x7e   : > { %vm2530_vm9 = vmpackc.low %vm419_vm4, %vm411_vm1  ;;  %vm427_vm1 = vcmp.eq.s32.totalorder %v2025_v5, %v2128_v14  ;;  %vm435_vm4 = vcmp.eq.s32.totalorder %v2028_v6, %v2128_v14 }
  0x7f   : > { %vm2544_vm3 = vmpackc.low %vm2893_vm10, %vm2892_vm15  ;;  %1298 = vmatpush1.bf16.xpose.msk.msra.mxu1 %vm2423_vm2, %v1589_v29  ;;  %vm2897_vm15 = vcmp.eq.s32.totalorder %v1997_v3, %v1946_v61 }
  0x80   : > { %v2895_v50 = vsel %vm2544_vm3, 4294967295, %v2894_v50  ;;  %vm2561_vm10 = vmpackc.low %vm2897_vm15, %vm2896_vm14  ;;  %1362 = vmatpush1.bf16.xpose.msk.msra.mxu0 %vm2434_vm13, %v1589_v29  ;;  %1300 = vmatprep.subr.msk.bf16.mxu1 %vm2438_vm0, %v1589_v29  ;;  %vm2904_vm13 = vcmp.eq.s32.totalorder %v2025_v5, %v1943_v60  ;;  %vm2905_vm0 = vcmp.eq.s32.totalorder %v2028_v6, %v1943_v60  ;;  %v240_v60 = vld [vmem:[%s1827_s4 + $0x38] sm:$0xff]  ;;  %vm2913_vm14 = vnez %v2793_v27 }
  0x81   : > { %vm2571_vm3 = vmpackc.low %vm431_vm8, %vm423_vm12  ;;  %1364 = vmatprep.subr.msk.bf16.mxu0 %vm2450_vm11, %v1589_v29  ;;  %vm2908_vm11 = vcmp.eq.s32.totalorder %v2025_v5, %v1946_v61  ;;  %vm2909_vm12 = vcmp.eq.s32.totalorder %v2028_v6, %v1946_v61  ;;  %v1266_v3 = vcombine.high %v236_v39, %v240_v60  ;;  %vm2914_vm15 = vnez %v2796_v28 }
  0x82   : > { %vm2578_vm2 = vmpackc.low %vm435_vm4, %vm427_vm1  ;;  %vm2912_vm4 = vnez %v2789_v20  ;;  %v1265_v48 = vcombine.low %v236_v39, %v240_v60 }
  0x83   : > { %vm2590_vm8 = vmpackc.low %vm2905_vm0, %vm2904_vm13  ;;  %vm2915_vm13 = vnez %v2800_v32  ;;  %vm2916_vm0 = vnez %v2804_v33 }
  0x84   : > { %vm2604_vm1 = vmpackc.low %vm2909_vm12, %vm2908_vm11  ;;  %vm2917_vm11 = vnez %v2808_v23  ;;  %vm2918_vm12 = vnez %v2815_v21 }
  0x86   : > { %829 = vmatmul.mubr.bf16.vlgmr.msra.gmra.mrb[0].mxu1 %v1259_v59 }
  0x87   : > { %1302 = vmatpush1.bf16.xpose.msk.msra.mxu1 %vm2912_vm4, %v1589_v29  ;;  %911 = vmatmul.mubr.bf16.vlgmr.msra.gmra.mrb[0].mxu0 %v1263_v1  ;;  %vm2919_vm4 = vnez %v2823_v37 }
  0x88   : > { %1366 = vmatpush1.bf16.xpose.msk.msra.mxu0 %vm2913_vm14, %v1589_v29  ;;  %1304 = vmatprep.subr.msk.bf16.mxu1 %vm2914_vm15, %v1589_v29  ;;  %vm2920_vm14 = vnez %v2829_v41  ;;  %vm2921_vm15 = vnez %v2833_v43 }
  0x89   : > { %1368 = vmatprep.subr.msk.bf16.mxu0 %vm2915_vm13, %v1589_v29  ;;  %869 = vmatprep.mubr.bf16.mxu1 %v1262_v2  ;;  %vm2922_vm13 = vnez %v2837_v30 }
  0x8a   : > { %951 = vmatprep.mubr.bf16.mxu0 %v1266_v3 }
  0x8f   : > { %1306 = vmatpush1.bf16.xpose.msk.msra.mxu1 %vm2916_vm0, %v1589_v29  ;;  %vm2923_vm0 = vnez %v2840_v31 }
  0x90   : > { %1370 = vmatpush1.bf16.xpose.msk.msra.mxu0 %vm2917_vm11, %v1589_v29  ;;  %1308 = vmatprep.subr.msk.bf16.mxu1 %vm2918_vm12, %v1589_v29  ;;  %vm2924_vm11 = vnez %v2844_v44  ;;  %vm2925_vm12 = vnez %v2848_v46 }
  0x91   : > { %1372 = vmatprep.subr.msk.bf16.mxu0 %vm2919_vm4, %v1589_v29  ;;  %vm2926_vm4 = vnez %v2861_v25 }
  0x97   : > { %1310 = vmatpush1.bf16.xpose.msk.msra.mxu1 %vm2920_vm14, %v1589_v29  ;;  %vm2927_vm14 = vnez %v2867_v49 }
  0x98   : > { %1374 = vmatpush1.bf16.xpose.msk.msra.mxu0 %vm2921_vm15, %v1589_v29  ;;  %1312 = vmatprep.subr.msk.bf16.mxu1 %vm2922_vm13, %v1589_v29  ;;  %vm2928_vm15 = vnez %v2872_v52  ;;  %vm2929_vm13 = vnez %v2876_v53 }
  0x99   : > { %1376 = vmatprep.subr.msk.bf16.mxu0 %vm2923_vm0, %v1589_v29  ;;  %vm2930_vm0 = vnez %v2879_v42 }
  0x9f   : > { %1314 = vmatpush1.bf16.xpose.msk.msra.mxu1 %vm2924_vm11, %v1589_v29  ;;  %vm2932_vm11 = vnez %v2895_v50 }
  0xa0   : > { %1378 = vmatpush1.bf16.xpose.msk.msra.mxu0 %vm2925_vm12, %v1589_v29  ;;  %1316 = vmatprep.subr.msk.bf16.mxu1 %vm2427_vm5, %v1589_v29  ;;  %vm2931_vm5 = vnez %v2883_v45 }
  0xa1   : > { %1380 = vmatprep.subr.msk.bf16.mxu0 %vm2926_vm4, %v1589_v29 }
  0xa7   : > { %1318 = vmatpush1.bf16.xpose.msk.msra.mxu1 %vm2927_vm14, %v1589_v29 }
  0xa8   : > { %1382 = vmatpush1.bf16.xpose.msk.msra.mxu0 %vm2928_vm15, %v1589_v29  ;;  %1320 = vmatprep.subr.msk.bf16.mxu1 %vm2929_vm13, %v1589_v29 }
  0xa9   : > { %1384 = vmatprep.subr.msk.bf16.mxu0 %vm2930_vm0, %v1589_v29 }
  0xaf   : > { %1322 = vmatpush1.bf16.xpose.msk.msra.mxu1 %vm2931_vm5, %v1589_v29 }
  0xb0   : > { %1386 = vmatpush1.bf16.xpose.msk.msra.mxu0 %vm2522_vm6, %v1589_v29  ;;  %1324 = vmatprep.subr.msk.bf16.mxu1 %vm2526_vm7, %v1589_v29 }
  0xb1   : > { %1388 = vmatprep.subr.msk.bf16.mxu0 %vm2530_vm9, %v1589_v29 }
  0xb7   : > { %1326 = vmatpush1.bf16.xpose.msk.msra.mxu1 %vm2932_vm11, %v1589_v29 }
  0xb8   : > { %1390 = vmatpush1.bf16.xpose.msk.msra.mxu0 %vm2561_vm10, %v1589_v29  ;;  %1328 = vmatprep.subr.msk.bf16.mxu1 %vm2571_vm3, %v1589_v29 }
  0xb9   : > { %1392 = vmatprep.subr.msk.bf16.mxu0 %vm2578_vm2, %v1589_v29 }
  0xbf   : > { %1330 = vmatpush1.bf16.xpose.msk.msra.mxu1 %vm2590_vm8, %v1589_v29 }
  0xc0   : > { %1394 = vmatpush1.bf16.xpose.msk.msra.mxu0 %vm2604_vm1, %v1589_v29 }
  0xc6   : > { %870 = vmatmul.mubr.bf16.vlgmr.msra.gmra.mrb[0].mxu1 %v1261_v47 }
  0xc7   : > { %952 = vmatmul.mubr.bf16.vlgmr.msra.gmra.mrb[0].mxu0 %v1265_v48 }
 0x197   : > { %963 = sbr.rel (%p1395_p3) target bundleno = 416 (0x1a0), region = 55 }
 0x199   : > { %v871_v61 = vpop.f32.mrb[0].mxu1 }
 0x19a   : > { %v953_v4 = vpop.f32.mrb[0].mxu0  ;;  %v873_v5 = vpop.f32.mrb[1].mxu1 }
 0x19b   : > { %v1402_v6 = vadd.f32 %v953_v4, %v871_v61  ;;  %v955_v7 = vpop.f32.mrb[1].mxu0  ;;  %v874_v8 = vpop.f32.mrb[2].mxu1 }
 0x19c   : > { %v956_v10 = vpop.f32.mrb[2].mxu0  ;;  %v876_v11 = vpop.f32.mrb[3].mxu1 }
 0x19d   : > { %v1403_v9 = vadd.f32 %v956_v10, %v874_v8  ;;  %v958_v12 = vpop.f32.mrb[3].mxu0  ;;  %964 = vst [vmem:[%s220_s24] sm:$0xff] (!%p1395_p3), %v1402_v6 }
 0x19f   : > { %965 = vst [vmem:[%s220_s24 + $0x8] sm:$0xff] %v1403_v9 }
 0x1a0 PF: > { %p1396_p4 = scmp.le.s32.totalorder %s1563_s13, 0 }
 0x1a2   : > { %969 = sbr.rel (%p1396_p4) target bundleno = 426 (0x1aa), region = 59 }
 0x1a6   : > { %v970_v29 = vld [vmem:[%s220_s24] sm:$0xff] (!%p1396_p4)  ;;  %v971_v13 = vld [vmem:[%s220_s24 + $0x8] sm:$0xff] (!%p1396_p4) }
 0x1a7   : > { %v972_v14 = vadd.f32 (!%p1396_p4), %v1402_v6, %v970_v29  ;;  %v973_v15 = vadd.f32 (!%p1396_p4), %v1403_v9, %v971_v13 }
 0x1a9   : > { %974 = vst [vmem:[%s220_s24] sm:$0xff] %v972_v14  ;;  %975 = vst [vmem:[%s220_s24 + $0x8] sm:$0xff] %v973_v15 }
 0x1aa PF: > { %982 = sbr.rel (!%p1686_p8) target bundleno = 434 (0x1b2), region = 63  ;;  %s1398_s7 = sshll.u32 (%p1686_p8), %s1571_s15, 2 }
 0x1ab   : > { %s984_s8 = sadd.s32 (%p1686_p8), %s1567_s14, %s1398_s7 }
 0x1ac   : > { %s1399_s22 = sshll.u32 (%p1686_p8), %s984_s8, 3 }
 0x1ad   : > { %s986_s26 = scalar_lea.vmem (%p1686_p8), %s2745_s2, %s1399_s22 }
 0x1b0   : > { %v1016_v16 = vld [vmem:[%s220_s24] sm:$0xff] (%p1686_p8)  ;;  %v1018_v17 = vld [vmem:[%s220_s24 + $0x8] sm:$0xff] (%p1686_p8) }
 0x1b1   : > { %1017 = vst [vmem:[%s986_s26] sm:$0xff] %v1016_v16  ;;  %1019 = vst [vmem:[%s986_s26 + $0x10] sm:$0xff] %v1018_v17 }
 0x1b2 PF: > { %s12_s19 = sadd.s32 1, %s1587_s19   ;;  %s2933_s9 = smov %s1551_s10 }
 0x1b3   : > { %p9_p5 = scmp.ge.s32.totalorder %s12_s19, 18   ;;  %s2934_s10 = smov %s1697_s6 }
 0x1b4   : > { %s2935_s11 = smov %s1559_s12  ;;  %s2936_s12 = smov %s1694_s5 }
 0x1b5   : > { %s2937_s13 = smov %s1575_s16  ;;  %s2938_s14 = smov %s1579_s17 }
 0x1b6   : > { %s2939_s15 = smov %s1583_s18  ;;  %s2940_s16 = smov %s2946_s20 }
 0x1b7   : > { %s2941_s17 = smov %s2948_s21  ;;  %s2942_s18 = smov %s2952_s23 }
 0x1b8   :  { %11 = sbr.rel (!%p9_p5) target bundleno = 6 (0x6), region = 135 }

// kernel: _lambda_.5
= control target key start
LH: loop header
LB: loop body
LE: loop exit
PB: predicated region body
PF: predicated region fallthrough
CT: control target
= control target key end

     0   :  { %s1153_s24 = smov 0   ;;  %s1155_s25 = smov 0   ;;  %s1376_s0 = inlined_call_operand.vmem [shape: f32[2,16,256], index: 0, kind: input, shape index: {}]   ;;  %s1377_s1 = inlined_call_operand.vmem [shape: f32[2,16,256], index: 1, kind: input, shape index: {}]   ;;  %s1378_s2 = inlined_call_operand.vmem [shape: f32[2,16,256], index: 2, kind: input, shape index: {}]   ;;  %s1379_s3 = inlined_call_operand.vmem [shape: f32[32,144], index: 3, kind: input, shape index: {}]   ;;  %s1380_s4 = inlined_call_operand.vmem [shape: f32[32,1], index: 4, kind: input, shape index: {}]   ;;  %s1381_s5 = inlined_call_operand.vmem [shape: f32[10,32], index: 5, kind: input, shape index: {}]   ;;  %s1382_s6 = inlined_call_operand.vmem [shape: f32[10,1], index: 6, kind: input, shape index: {}]   ;;  %s1383_s7 = inlined_call_operand.vmem [shape: f32[2,10,256], index: 7, kind: output, shape index: {}]  }
   0x1   :  { %s1157_s26 = smov 0   ;;  %s1159_s27 = smov 0  }
   0x2   :  { %s1161_s28 = smov 0   ;;  %s1163_s29 = smov 0  }
   0x3   :  { %s1165_s30 = smov 0  }
   0x4 LB: > { %s26_s8 = sadd.s32 1, %s1098_s28  ;;  %s29_s9 = sadd.s32 1, %s1102_s29  ;;  %s1106_s30 = sphi %s1165_s30, %s17_s30   ;;  %s1102_s29 = sphi %s1163_s29, %s1394_s29   ;;  %s1098_s28 = sphi %s1161_s28, %s1393_s28   ;;  %s1094_s27 = sphi %s1159_s27, %s1392_s27   ;;  %s1090_s26 = sphi %s1157_s26, %s1391_s26   ;;  %s1086_s25 = sphi %s1155_s25, %s1390_s25   ;;  %s1082_s24 = sphi %s1153_s24, %s1389_s24  }
   0x5   : > { %p27_p0 = scmp.ge.s32.totalorder %s26_s8, 2  ;;  %s906_s10 = sadd.s32 4294967295, %s1106_s30  }
   0x6   : > { %p45_p1 = scmp.ne.s32.totalorder %s1086_s25, %s1082_s24  ;;  %p46_p2 = scmp.eq.s32.totalorder %s1106_s30, 0 }
   0x7   : > { %s1396_s8 = smov (%p27_p0, %s26_s8), 0  ;;  %s1398_s9 = smov (!%p27_p0, %s29_s9), %s1102_s29 }
   0x8   : > { %p31_p3 = scmp.ge.s32.totalorder %s1398_s9, 2  ;;  %p217_p4 = scmp.eq.s32.totalorder %s906_s10, 3 }
   0x9   : > { %s34_s11 = ssub.s32 %s1098_s28, %s1396_s8  ;;  %p1199_p5 = por %p46_p2, %p45_p1 }
   0xa   : > { %s1400_s9 = smov (%p31_p3, %s1398_s9), 0  ;;  %p1205_p6 = por %p217_p4, %p45_p1 }
   0xb   : > { %1386 = sst [smem:[#allocation6_spill]] %s1400_s9  ;;  %s33_s14 = ssub.s32 %s1102_s29, %s1400_s9 }
   0xc   : > { %s35_s15 = sor.u32 %s34_s11, %s33_s14  ;;  %s38_s16 = sadd.s32 1, %s1086_s25 }
   0xd   : > { %p36_p7 = scmp.eq.s32.totalorder %s35_s15, 0  ;;  %p909_p8 = scmp.ge.s32.totalorder %s1106_s30, 4 }
   0xf   : > { %s1213_s17 = scalar_select %p36_p7, %s1086_s25, %s38_s16  }
  0x10   : > { %251 = sbr.rel (%p909_p8) target bundleno = 44 (0x2c), region = 32 }
  0x17   : > { %254 = sbr.rel (!%p1199_p5) target bundleno = 30 (0x1e), region = 36  ;;  %s256_s18 = sand.u32 (%p1199_p5), 1, %s1086_s25  }
  0x18   : > { %s911_s19 = sshll.u32 (%p1199_p5), %s1102_s29, 2  ;;  %s910_s20 = sshll.u32 (%p1199_p5), %s256_s18, 4 }
  0x19   : > { %s260_s21 = sadd.s32 (%p1199_p5), %s1098_s28, %s911_s19  ;;  %s258_s14 = scalar_lea.vmem (%p1199_p5), [#allocation2], %s910_s20 }
  0x1a   : > { %s912_s22 = sshll.u32 (%p1199_p5), %s260_s21, 3 }
  0x1b   : > { %s262_s11 = scalar_lea.vmem (%p1199_p5), %s1376_s0, %s912_s22 }
  0x1c   : > { %v292_v0 = vld [vmem:[%s262_s11] sm:$0xff] (%p1199_p5)  ;;  %v294_v1 = vld [vmem:[%s262_s11 + $0x10] sm:$0xff] (%p1199_p5) }
  0x1d   : > { %293 = vst [vmem:[%s258_s14] sm:$0xff] (%p1199_p5), %v292_v0  ;;  %295 = vst [vmem:[%s258_s14 + $0x8] sm:$0xff] (%p1199_p5), %v294_v1 }
  0x1e PF: > { %301 = sbr.rel (!%p1199_p5) target bundleno = 37 (0x25), region = 74  ;;  %s303_s15 = sand.u32 (%p1199_p5), 1, %s1086_s25  }
  0x1f   : > { %s914_s16 = sshll.u32 (%p1199_p5), %s1102_s29, 2  ;;  %s913_s18 = sshll.u32 (%p1199_p5), %s303_s15, 4 }
  0x20   : > { %s307_s19 = sadd.s32 (%p1199_p5), %s1098_s28, %s914_s16  ;;  %s305_s20 = scalar_lea.vmem (%p1199_p5), [#allocation3], %s913_s18 }
  0x21   : > { %s915_s21 = sshll.u32 (%p1199_p5), %s307_s19, 3 }
  0x22   : > { %s309_s22 = scalar_lea.vmem (%p1199_p5), %s1377_s1, %s915_s21 }
  0x23   : > { %v339_v2 = vld [vmem:[%s309_s22] sm:$0xff] (%p1199_p5)  ;;  %v341_v3 = vld [vmem:[%s309_s22 + $0x10] sm:$0xff] (%p1199_p5) }
  0x24   : > { %340 = vst [vmem:[%s305_s20] sm:$0xff] (%p1199_p5), %v339_v2  ;;  %342 = vst [vmem:[%s305_s20 + $0x8] sm:$0xff] (%p1199_p5), %v341_v3 }
  0x25 PF: > { %348 = sbr.rel (!%p1199_p5) target bundleno = 44 (0x2c), region = 112  ;;  %s350_s10 = sand.u32 (%p1199_p5), 1, %s1086_s25  }
  0x26   : > { %s917_s11 = sshll.u32 (%p1199_p5), %s1102_s29, 2  ;;  %s916_s14 = sshll.u32 (%p1199_p5), %s350_s10, 4 }
  0x27   : > { %s354_s15 = sadd.s32 (%p1199_p5), %s1098_s28, %s917_s11  ;;  %s352_s18 = scalar_lea.vmem (%p1199_p5), [#allocation4], %s916_s14 }
  0x28   : > { %s918_s16 = sshll.u32 (%p1199_p5), %s354_s15, 3 }
  0x29   : > { %s356_s21 = scalar_lea.vmem (%p1199_p5), %s1378_s2, %s918_s16 }
  0x2a   : > { %v386_v4 = vld [vmem:[%s356_s21] sm:$0xff] (%p1199_p5)  ;;  %v388_v5 = vld [vmem:[%s356_s21 + $0x10] sm:$0xff] (%p1199_p5) }
  0x2b   : > { %387 = vst [vmem:[%s352_s18] sm:$0xff] (%p1199_p5), %v386_v4  ;;  %389 = vst [vmem:[%s352_s18 + $0x8] sm:$0xff] (%p1199_p5), %v388_v5 }
  0x2c PF: > { %p919_p9 = scmp.ge.s32.totalorder %s1106_s30, 1  ;;  %p394_p10 = scmp.lt.s32.totalorder %s1106_s30, 5 }
  0x2e   : > { %p395_p11 = pnand %p919_p9, %p394_p10 }
  0x2f   : > { %s401_s12 = sand.u32 (!%p395_p11), 1, %s1082_s24   ;;  %v1108_v6 = vmov (!%p395_p11), 0.0|0.0   ;;  %s1109_s20 = smov (!%p395_p11), 1   ;;  %v516_v16 = vld [vmem:[%s1379_s3 + $0x8] sm:$0xff] (!%p395_p11)  ;;  %vm547_vm0 = vcmask (!%p395_p11), 130048   ;;  %v523_v18 = vld [vmem:[%s1380_s4] sm:$0xff] (!%p395_p11)  ;;  %v453_v24 = vlaneseq (!%p395_p11) }
  0x30   : > { %398 = sbr.rel (%p395_p11) target bundleno = 667 (0x29b), region = 150  ;;  %s1243_s23 = sshll.u32 (!%p395_p11), %s401_s12, 4  ;;  %954 = vmatprep.subr.bf16.mxu0 (!%p395_p11), %v1108_v6  ;;  %926 = vmatprep.mubr.msk.f32.mxu0 (!%p395_p11), %vm547_vm0, %v516_v16  ;;  %v524_v17 = vld [vmem:[%s1380_s4 + $0x8] sm:$0xff] (!%p395_p11)  ;;  %v1111_v19 = vmov (!%p395_p11), 0   ;;  %v525_v20 = vld [vmem:[%s1380_s4 + $0x10] sm:$0xff] (!%p395_p11)  ;;  %v526_v21 = vld [vmem:[%s1380_s4 + $0x18] sm:$0xff] (!%p395_p11) }
  0x31   : > { %s403_s22 = scalar_lea.vmem (!%p395_p11), [#allocation2], %s1243_s23  ;;  %s1110_s10 = smov (!%p395_p11), 127   ;;  %1051 = vset.pattern.permute.xlu1 (!%p395_p11), %v1111_v19  ;;  %1050 = vset.pattern.permute.xlu0 (!%p395_p11), %v1111_v19  ;;  %v651_v22 = vld [vmem:[%s1382_s6] sm:$0xff] (!%p395_p11)  ;;  %v652_v23 = vld [vmem:[%s1382_s6 + $0x8] sm:$0x3] (!%p395_p11)  ;;  %v454_v25 = vand.u32 (!%p395_p11), 127, %v453_v24 }
  0x32   : > { %v1247_v7 = vld [vmem:[%s403_s22] sm:$0xff] (!%p395_p11)  ;;  %v1249_v8 = vld [vmem:[%s403_s22 + $0x8] sm:$0xff] (!%p395_p11)  ;;  %s410_s24 = scalar_lea.vmem (!%p395_p11), [#allocation3], %s1243_s23  ;;  %s417_s11 = scalar_lea.vmem (!%p395_p11), [#allocation4], %s1243_s23  ;;  %v1112_v29 = vmov (!%p395_p11), 0.0   ;;  %vm663_vm3 = vcmask (!%p395_p11), 261120  }
  0x33   : > { %475 = vrot.lane.b32.xlu0 (!%p395_p11), %v1247_v7, %s1109_s20  ;;  %481 = vrot.lane.b32.xlu1 (!%p395_p11), %v1247_v7, %s1110_s10  ;;  %v958_v9 = vpack.c.bf16 (!%p395_p11), %v1249_v8, %v1247_v7  ;;  %v1258_v10 = vld [vmem:[%s410_s24 + $0x8] sm:$0xff] (!%p395_p11)  ;;  %v1260_v11 = vld [vmem:[%s410_s24] sm:$0xff] (!%p395_p11)  ;;  %v459_v26 = vand.u32 (!%p395_p11), 15, %v454_v25  ;;  %s452_s18 = scalar_lea.vmem (!%p395_p11), [#allocation5], %s1243_s23 }
  0x34   : > { %v967_v12 = vpack.c.bf16 (!%p395_p11), %v1258_v10, %v1260_v11  ;;  %v1269_v13 = vld [vmem:[%s417_s11 + $0x8] sm:$0xff] (!%p395_p11)  ;;  %v1271_v14 = vld [vmem:[%s417_s11] sm:$0xff] (!%p395_p11) }
  0x35   : > { %v976_v15 = vpack.c.bf16 (!%p395_p11), %v1269_v13, %v1271_v14  ;;  %vm467_vm1 = vcmp.ge.s32.totalorder (!%p395_p11), %v459_v26, 1  ;;  %vm470_vm2 = vcmp.lt.s32.totalorder (!%p395_p11), %v459_v26, 15  ;;  %v515_v60 = vld [vmem:[%s1379_s3] sm:$0xff] (!%p395_p11)  ;;  %v518_v61 = vld [vmem:[%s1379_s3 + $0x18] sm:$0xff] (!%p395_p11)  ;;  %v517_v62 = vld [vmem:[%s1379_s3 + $0x10] sm:$0xff] (!%p395_p11) }
  0x36   : > { %v924_v30 = vsel (!%p395_p11), %vm467_vm1, 1.0, %v1112_v29  ;;  %v925_v36 = vsel (!%p395_p11), %vm470_vm2, 1.0, %v1112_v29  ;;  %v520_v63 = vld [vmem:[%s1379_s3 + $0x28] sm:$0xff] (!%p395_p11)  ;;  %v519_v0 = vld [vmem:[%s1379_s3 + $0x20] sm:$0xff] (!%p395_p11)  ;;  %v522_v1 = vld [vmem:[%s1379_s3 + $0x38] sm:$0xff] (!%p395_p11) }
  0x37   : > { %477 = vrot.lane.b32.xlu0 %v1249_v8, %s1109_s20  ;;  %483 = vrot.lane.b32.xlu1 %v1249_v8, %s1110_s10  ;;  %v521_v2 = vld [vmem:[%s1379_s3 + $0x30] sm:$0xff]  ;;  %v649_v3 = vld [vmem:[%s1381_s5] sm:$0xff]  ;;  %s933_s12 = sshll.u32 (%p1205_p6), %s1094_s27, 2 }
  0x38   : > { %951 = vmatprep.mubr.msk.f32.mxu1 %vm663_vm3, %v649_v3  ;;  %v650_v26 = vld [vmem:[%s1381_s5 + $0x8] sm:$0x3]  ;;  %s755_s22 = sadd.s32 (%p1205_p6), %s1090_s26, %s933_s12 }
  0x3b   : > { %491 = vrot.lane.b32.xlu1 %v1258_v10, %s1109_s20  ;;  %489 = vrot.lane.b32.xlu0 %v1260_v11, %s1109_s20 }
  0x3f   : > { %497 = vrot.lane.b32.xlu1 %v1258_v10, %s1110_s10  ;;  %495 = vrot.lane.b32.xlu0 %v1260_v11, %s1110_s10 }
  0x43   : > { %505 = vrot.lane.b32.xlu1 %v1269_v13, %s1109_s20  ;;  %503 = vrot.lane.b32.xlu0 %v1271_v14, %s1109_s20  ;;  %s934_s20 = sshll.u32 (%p1205_p6), %s755_s22, 3 }
  0x44   : > { %s757_s11 = scalar_lea.vmem (%p1205_p6), %s1383_s7, %s934_s20 }
  0x47   : > { %511 = vrot.lane.b32.xlu1 %v1269_v13, %s1110_s10  ;;  %509 = vrot.lane.b32.xlu0 %v1271_v14, %s1110_s10 }
  0x4b   : > { %534 = vperm.xlu1 %1051, %v524_v17   ;;  %529 = vperm.xlu0 %1050, %v523_v18  }
  0x4f   : > { %539 = vperm.xlu1 %1051, %v525_v20   ;;  %544 = vperm.xlu0 %1050, %v526_v21  }
  0x53   : > { %655 = vperm.xlu1 %1051, %v651_v22   ;;  %660 = vperm.xlu0 %1050, %v652_v23  }
  0xa5   : > { %v476_v27 = vpop.permute.xlu0 %475  ;;  %v482_v28 = vpop.permute.xlu1 %481 }
  0xa6   : > { %v479_v32 = vmul.f32 %v924_v30, %v476_v27  ;;  %v485_v39 = vmul.f32 %v925_v36, %v482_v28 }
  0xa9   : > { %v478_v31 = vpop.permute.xlu0 %477  ;;  %v484_v34 = vpop.permute.xlu1 %483 }
  0xaa   : > { %v480_v33 = vmul.f32 %v924_v30, %v478_v31  ;;  %v486_v40 = vmul.f32 %v925_v36, %v484_v34 }
  0xac   : > { %v955_v35 = vpack.c.bf16 %v480_v33, %v479_v32  ;;  %v961_v43 = vpack.c.bf16 %v486_v40, %v485_v39 }
  0xad   : > { %v492_v37 = vpop.permute.xlu1 %491  ;;  %v490_v38 = vpop.permute.xlu0 %489 }
  0xae   : > { %956 = vmatpush1.bf16.msra.mxu0 %v955_v35  ;;  %v494_v41 = vmul.f32 %v924_v30, %v492_v37  ;;  %v493_v42 = vmul.f32 %v924_v30, %v490_v38 }
  0xaf   : > { %957 = vmatprep.subr.bf16.mxu0 %v1108_v6 }
  0xb0   : > { %v964_v46 = vpack.c.bf16 %v494_v41, %v493_v42 }
  0xb1   : > { %v498_v44 = vpop.permute.xlu1 %497  ;;  %v496_v45 = vpop.permute.xlu0 %495 }
  0xb2   : > { %959 = vmatpush1.bf16.msra.mxu0 %v958_v9  ;;  %v500_v47 = vmul.f32 %v925_v36, %v498_v44  ;;  %v499_v48 = vmul.f32 %v925_v36, %v496_v45 }
  0xb3   : > { %960 = vmatprep.subr.bf16.mxu0 %v1108_v6 }
  0xb4   : > { %v970_v51 = vpack.c.bf16 %v500_v47, %v499_v48 }
  0xb5   : > { %v506_v49 = vpop.permute.xlu1 %505  ;;  %v504_v50 = vpop.permute.xlu0 %503 }
  0xb6   : > { %962 = vmatpush1.bf16.msra.mxu0 %v961_v43  ;;  %v508_v52 = vmul.f32 %v924_v30, %v506_v49  ;;  %v507_v53 = vmul.f32 %v924_v30, %v504_v50 }
  0xb7   : > { %963 = vmatprep.subr.bf16.mxu0 %v1108_v6 }
  0xb8   : > { %v973_v54 = vpack.c.bf16 %v508_v52, %v507_v53 }
  0xb9   : > { %v512_v55 = vpop.permute.xlu1 %511  ;;  %v510_v56 = vpop.permute.xlu0 %509 }
  0xba   : > { %965 = vmatpush1.bf16.msra.mxu0 %v964_v46  ;;  %v514_v57 = vmul.f32 %v925_v36, %v512_v55  ;;  %v513_v58 = vmul.f32 %v925_v36, %v510_v56 }
  0xbb   : > { %966 = vmatprep.subr.bf16.mxu0 %v1108_v6 }
  0xbc   : > { %v979_v59 = vpack.c.bf16 %v514_v57, %v513_v58 }
  0xbe   : > { %968 = vmatpush1.bf16.msra.mxu0 %v967_v12 }
  0xbf   : > { %969 = vmatprep.subr.bf16.mxu0 %v1108_v6 }
  0xc2   : > { %971 = vmatpush1.bf16.msra.mxu0 %v970_v51 }
  0xc3   : > { %972 = vmatprep.subr.bf16.mxu0 %v1108_v6 }
  0xc6   : > { %974 = vmatpush1.bf16.msra.mxu0 %v973_v54 }
  0xc7   : > { %975 = vmatprep.subr.bf16.mxu0 %v1108_v6 }
  0xca   : > { %977 = vmatpush1.bf16.msra.mxu0 %v976_v15  ;;  %v530_v4 = vpop.permute.xlu0 %529  ;;  %v535_v8 = vpop.permute.xlu1 %534 }
  0xcb   : > { %978 = vmatprep.subr.bf16.mxu0 %v1108_v6 }
  0xce   : > { %980 = vmatpush1.bf16.msra.mxu0 %v979_v59  ;;  %v540_v17 = vpop.permute.xlu1 %539  ;;  %v545_v19 = vpop.permute.xlu0 %544 }
  0xd1   : > { %625 = vmatmul.mubr.f32.vlgmr.msra.gmra.mrb[0].mxu0 %v515_v60 }
  0xd2   : > { %927 = vmatprep.mubr.msk.f32.mxu0 %vm547_vm0, %v518_v61  ;;  %v661_v27 = vpop.permute.xlu0 %660  ;;  %v656_v29 = vpop.permute.xlu1 %655 }
  0xd5   : > { %630 = vmatmul.mubr.f32.gmra.mrb[2].mxu0 %v517_v62 }
  0xd6   : > { %928 = vmatprep.mubr.msk.f32.mxu0 %vm547_vm0, %v520_v63 }
  0xd9   : > { %635 = vmatmul.mubr.f32.gmra.mrb[4].mxu0 %v519_v0 }
  0xda   : > { %929 = vmatprep.mubr.msk.f32.mxu0 %vm547_vm0, %v522_v1 }
  0xdd   : > { %640 = vmatmul.mubr.f32.gmra.mrb[6].mxu0 %v521_v2 }
 0x1a4   : > { %v626_v5 = vpop.f32.mrb[0].mxu0 }
 0x1a5   : > { %v628_v6 = vpop.f32.mrb[1].mxu0  ;;  %v627_v7 = vadd.f32 %v626_v5, %v530_v4 }
 0x1a7   : > { %v645_v12 = vmax.f32 %v627_v7, 0.0 }
 0x1a8   : > { %v631_v9 = vpop.f32.mrb[2].mxu0 }
 0x1a9   : > { %v632_v10 = vadd.f32 %v631_v9, %v535_v8  ;;  %v633_v11 = vpop.f32.mrb[3].mxu0 }
 0x1ab   : > { %v646_v13 = vmax.f32 %v632_v10, 0.0 }
 0x1ac   : > { %v636_v14 = vpop.f32.mrb[4].mxu0 }
 0x1ad   : > { %v638_v15 = vpop.f32.mrb[5].mxu0  ;;  %v981_v16 = vpack.c.bf16 %v646_v13, %v645_v12  ;;  %v637_v18 = vadd.f32 %v636_v14, %v540_v17 }
 0x1af   : > { %982 = vmatprep.subr.bf16.mxu1 %v981_v16  ;;  %v647_v23 = vmax.f32 %v637_v18, 0.0 }
 0x1b0   : > { %v641_v20 = vpop.f32.mrb[6].mxu0  ;;  %984 = vmatpush3.bf16.msra.mxu1 %v981_v16 }
 0x1b1   : > { %v642_v21 = vadd.f32 %v641_v20, %v545_v19  ;;  %v643_v22 = vpop.f32.mrb[7].mxu0 }
 0x1b3   : > { %v648_v24 = vmax.f32 %v642_v21, 0.0 }
 0x1b5   : > { %v985_v25 = vpack.c.bf16 %v648_v24, %v647_v23 }
 0x1b7   : > { %986 = vmatprep.subr.bf16.mxu1 %v985_v25 }
 0x1b8   : > { %988 = vmatpush3.bf16.msra.mxu1 %v985_v25 }
 0x1bb   : > { %952 = vmatmul.mubr.msk.f32.vlgmr.msra.gmra.mrb[0].mxu1 %vm663_vm3, %v650_v26 }
 0x28c   : > { %753 = sbr.rel (!%p1205_p6) target bundleno = 667 (0x29b), region = 166 }
 0x28e   : > { %v953_v28 = vpop.f32.mrb[0].mxu1 }
 0x28f   : > { %v742_v30 = vadd.f32 %v953_v28, %v661_v27  ;;  %v736_v31 = vpop.f32.mrb[1].mxu1 }
 0x290   : > { %v737_v32 = vadd.f32 %v736_v31, %v656_v29 }
 0x291   : > { %746 = vst [vmem:[%s452_s18 + $0x8] sm:$0x3] %v742_v30 }
 0x292   : > { %745 = vst [vmem:[%s452_s18] sm:$0xff] %v737_v32 }
 0x298   : > { %v789_v34 = vld [vmem:[%s452_s18 + $0x8] sm:$0xff] }
 0x299   : > { %v787_v33 = vld [vmem:[%s452_s18] sm:$0xff]  ;;  %790 = vst [vmem:[%s757_s11 + $0x10] sm:$0xff] %v789_v34 }
 0x29a   : > { %788 = vst [vmem:[%s757_s11] sm:$0xff] %v787_v33 }
 0x29b PF: > { %s17_s30 = sadd.s32 1, %s1106_s30   ;;  %s1388_s13 = sld [smem:[#allocation6_spill]] }
 0x29c   : > { %p14_p12 = scmp.ge.s32.totalorder %s17_s30, 6   ;;  %s1389_s24 = smov %s1086_s25 }
 0x29d   : > { %s1390_s25 = smov %s1213_s17  ;;  %s1391_s26 = smov %s1098_s28 }
 0x29e   : > { %s1392_s27 = smov %s1102_s29  ;;  %s1393_s28 = smov %s1396_s8 }
 0x29f   :  { %16 = sbr.rel (!%p14_p12) target bundleno = 4 (0x4), region = 251 }
 0x2a1   : > { %s1394_s29 = smov %s1388_s13 }

</bundles_post_ra>
